<compile_context>
chip_gen: v6e
topology: v6e:2x2x1
jax: 0.10.0
libtpu: 0.0.40
codegen_flags: <defaults>
</compile_context>

<pallas_src>
import functools

import jax
import jax.numpy as jnp
from jax import lax
from jax.experimental import pallas as pl
from jax.experimental.pallas import tpu as pltpu

# Matmul-operand dtype.  Keep f32 to match the PyTorch reference numerics; set
# to jnp.bfloat16 on v6e/v7x for native-MXU throughput (gate math and all
# accumulation stay f32 via preferred_element_type).
_MXU_DTYPE = jnp.float32


# ----------------------------------------------------------------------------
# Fully fused forward kernel.
#
# refs = [x (T,B,D), lengths (B,1) int32,
#         per layer: wih (Din,8H), whh (2H,8H), b (1,8H),
#         wa (2H,da), wa2 (da,r), w1 (r*2H,H_f), b1 (1,H_f), w2 (H_f,O), b2 (1,O),
#         logits (B,O), loss_p (B,1),                         # outputs
#         xg_scratch (T,B,8H), out_fwd (T,B,H), out_bwd (T,B,H)]  # VMEM scratch
# ----------------------------------------------------------------------------
def _fused_kernel(*refs, num_layers, H, r):
    nw = 3 * num_layers
    x_ref, len_ref = refs[0], refs[1]
    lw = refs[2:2 + nw]
    wa_ref, wa2_ref, w1_ref, b1_ref, w2_ref, b2_ref = refs[2 + nw:8 + nw]
    logits_ref, lossp_ref = refs[8 + nw:10 + nw]
    xg_ref, outf_ref, outb_ref = refs[10 + nw:]

    T, B, _ = x_ref.shape
    H2, H8 = 2 * H, 8 * H
    mxu = _MXU_DTYPE

    lengths = len_ref[...]                                    # (B, 1) int32

    # Loop-invariant direction/column masks (hoisted out of the recurrence).
    col2 = lax.broadcasted_iota(jnp.int32, (1, H2), 1)
    fwd_sel2 = (col2 < H).astype(jnp.int32)                   # 1 on fwd columns
    fwd_col2 = fwd_sel2 == 1                                  # (1, 2H) bool
    bwd_col2 = fwd_sel2 == 0
    sel8 = jnp.concatenate([fwd_sel2] * 4, axis=1)            # gate-major tiling
    bwd_col8 = sel8 == 0                                      # (1, 8H) bool

    # ------------------- bidirectional LSTM stack -------------------
    for layer in range(num_layers):
        wih_ref, whh_ref, b_ref = lw[3 * layer:3 * layer + 3]

        # Hoisted input projection (all timesteps, both directions) -> scratch.
        if layer == 0:
            din = x_ref.shape[-1]
            xin = x_ref[...].reshape(T * B, din).astype(mxu)
            xg = jnp.dot(xin, wih_ref[...].astype(mxu),
                         preferred_element_type=jnp.float32)
        else:
            wih = wih_ref[...].astype(mxu)
            xg = (jnp.dot(outf_ref[...].reshape(T * B, H).astype(mxu),
                          wih[:H], preferred_element_type=jnp.float32)
                  + jnp.dot(outb_ref[...].reshape(T * B, H).astype(mxu),
                            wih[H:], preferred_element_type=jnp.float32))
        # TODO(synk): at large T*B chunk this projection over time (and/or
        # store it bf16) to stay inside v7x's 64 MiB VMEM budget.
        xg_ref[...] = (xg + b_ref[...]).reshape(T, B, H8)

        whh = whh_ref[...].astype(mxu)                        # (2H, 8H)
        # TODO(synk): hold whh resident in the MXU across the time loop via
        # pltpu.matmul_push_rhs / matmul_acc_lhs (v7x MRB) when H grows.

        h = jnp.zeros((B, H2), jnp.float32)                   # [h_fwd | h_bwd]
        c = jnp.zeros((B, H2), jnp.float32)

        # Static time loop (T is small); per-step results go straight into the
        # VMEM output scratch so only (h, c) stays live across steps.
        # TODO(synk): switch to lax.fori_loop over the scratch refs if T or
        # num_layers grows.
        for s in range(T):
            tb = T - 1 - s
            # Gate inputs: fwd columns from time s, bwd columns from time tb.
            # (Independent of h -> off the recurrent dependency chain.)
            gx = jnp.where(bwd_col8, xg_ref[tb], xg_ref[s])               # (B, 8H)
            rec = jnp.dot(h.astype(mxu), whh,
                          preferred_element_type=jnp.float32)             # (B, 8H)
            g = gx + rec
            # Fused gate math for both directions at (B, 2H) width
            # (gate-major packing: [i_f i_b | f_f f_b | g_f g_b | o_f o_b]).
            i_g = jax.nn.sigmoid(g[:, 0 * H2:1 * H2])
            f_g = jax.nn.sigmoid(g[:, 1 * H2:2 * H2])
            g_g = jnp.tanh(g[:, 2 * H2:3 * H2])
            o_g = jax.nn.sigmoid(g[:, 3 * H2:4 * H2])
            c_new = f_g * c + i_g * g_g
            h_new = o_g * jnp.tanh(c_new)

            # pack_padded_sequence semantics: freeze state and zero outputs at
            # padded steps (sequences are left-aligned).
            vf = lengths > s                                               # (B, 1)
            vb = lengths > tb
            upd = jnp.logical_or(jnp.logical_and(fwd_col2, vf),
                                 jnp.logical_and(bwd_col2, vb))            # (B, 2H)
            h = jnp.where(upd, h_new, h)
            c = jnp.where(upd, c_new, c)
            outf_ref[s] = jnp.where(vf, h_new[:, :H], 0.0)
            outb_ref[tb] = jnp.where(vb, h_new[:, H:], 0.0)

    # ------------------- structured self-attention -------------------
    o = jnp.concatenate([outf_ref[...], outb_ref[...]], axis=-1)   # (T, B, 2H)
    o2 = o.reshape(T * B, H2)

    a1 = jnp.tanh(jnp.dot(o2.astype(mxu), wa_ref[...].astype(mxu),
                          preferred_element_type=jnp.float32))      # (T*B, da)
    score = jnp.dot(a1.astype(mxu), wa2_ref[...].astype(mxu),
                    preferred_element_type=jnp.float32).reshape(T, B, r)

    # Softmax over T  (== Softmax(dim=2) of the (B, r, T) tensor in PyTorch).
    smax = jnp.max(score, axis=0, keepdims=True)
    e = jnp.exp(score - smax)
    A = e / jnp.sum(e, axis=0, keepdims=True)                       # (T, B, r)

    # ------------------- FC head + penalization -------------------
    # Row k of M = A.bmm(output) and row k of G = A A^T are produced together
    # in one pass over [o | A]; flatten(M) is never materialised -- its r row
    # blocks are accumulated straight into the first FC matmul.
    oa = jnp.concatenate([o, A], axis=-1)                           # (T, B, 2H+r)
    w1 = w1_ref[...].astype(mxu)
    h1 = b1_ref[...]
    frob2 = jnp.zeros((B, 1), jnp.float32)
    for k in range(r):
        row_k = jnp.sum(A[:, :, k:k + 1] * oa, axis=0)              # (B, 2H+r)
        m_k = row_k[:, :H2]                                         # M[:, k, :]
        g_k = row_k[:, H2:]                                         # G[:, k, :]
        h1 = h1 + jnp.dot(m_k.astype(mxu), w1[k * H2:(k + 1) * H2],
                          preferred_element_type=jnp.float32)
        e_k = (lax.broadcasted_iota(jnp.int32, (1, r), 1) == k
               ).astype(jnp.float32)
        p_k = g_k - e_k                                             # (A A^T - I) row k
        frob2 = frob2 + jnp.sum(p_k * p_k, axis=1, keepdims=True)

    h1 = jnp.maximum(h1, 0.0)
    logits_ref[...] = (jnp.dot(h1.astype(mxu), w2_ref[...].astype(mxu),
                               preferred_element_type=jnp.float32)
                       + b2_ref[...])
    # torch: ((P**2).sum(1).sum(1) + 1e-10) ** 0.5
    lossp_ref[...] = jnp.sqrt(frob2 + 1e-10)


def run_fused(x_tbd, lengths_b1, lstm_flat_weights, wa, wa2, w1, b1, w2, b2,
              num_layers, H, r, num_batch_blocks=1):
    T, B, D = x_tbd.shape
    O = w2.shape[1]
    nb = num_batch_blocks
    assert B % nb == 0
    Bb = B // nb
    assert nb == 1 or Bb % 8 == 0, "batch block must keep 8-sublane alignment"
    H8 = 8 * H

    weights = list(lstm_flat_weights) + [wa, wa2, w1, b1, w2, b2]

    def full_spec(w):
        assert w.ndim == 2
        return pl.BlockSpec(w.shape, lambda i: (0, 0))

    in_specs = ([pl.BlockSpec((T, Bb, D), lambda i: (0, i, 0)),
                 pl.BlockSpec((Bb, 1), lambda i: (i, 0))]
                + [full_spec(w) for w in weights])
    out_specs = [pl.BlockSpec((Bb, O), lambda i: (i, 0)),
                 pl.BlockSpec((Bb, 1), lambda i: (i, 0))]

    kernel = functools.partial(_fused_kernel, num_layers=num_layers, H=H, r=r)
    logits, lossp = pl.pallas_call(
        kernel,
        out_shape=(jax.ShapeDtypeStruct((B, O), jnp.float32),
                   jax.ShapeDtypeStruct((B, 1), jnp.float32)),
        grid_spec=pltpu.PrefetchScalarGridSpec(
            num_scalar_prefetch=0,
            grid=(nb,),
            in_specs=in_specs,
            out_specs=out_specs,
            scratch_shapes=[pltpu.VMEM((T, Bb, H8), jnp.float32),
                            pltpu.VMEM((T, Bb, H), jnp.float32),
                            pltpu.VMEM((T, Bb, H), jnp.float32)]),
        compiler_params=pltpu.CompilerParams(
            dimension_semantics=("parallel",)),
    )(x_tbd, lengths_b1, *weights)
    return logits, lossp


# ----------------------------------------------------------------------------
# Full forward (only the embedding gather + final mean stay in plain JAX).
# ----------------------------------------------------------------------------
def bidirec_lstm_forward(token_ids, lengths, params, num_layers, r,
                         num_batch_blocks=None):
    B, T = token_ids.shape
    H = params['lstm'][0][1].shape[0] // 2            # whh is (2H, 8H)
    if num_batch_blocks is None:
        # Shard the batch across v7x's two TensorCores when the (8,128) block
        # constraint allows (B multiple of 16); single block otherwise.
        num_batch_blocks = 2 if B % 16 == 0 else 1

    # Embedding lookup gathered directly in time-major order (T, B, D).
    x = params['embedding'][token_ids.T].astype(jnp.float32)
    lengths_b1 = lengths.astype(jnp.int32).reshape(B, 1)

    flat_w = [w for triple in params['lstm'] for w in triple]
    logits, lossp = run_fused(x, lengths_b1, flat_w,
                              params['wa'], params['wa2'],
                              params['w1'], params['b1'],
                              params['w2'], params['b2'],
                              num_layers, H, r,
                              num_batch_blocks=num_batch_blocks)
    loss_P = jnp.sum(lossp) / B
    return logits, loss_P


# ----------------------------------------------------------------------------
# Parameter init with the kernel's gate-major, both-directions packing.
# ----------------------------------------------------------------------------
def _pack_dir_gate_major(w_f, w_b, H):
    """Column packing [i_f i_b | f_f f_b | g_f g_b | o_f o_b]."""
    cols = []
    for g in range(4):
        cols.append(w_f[..., g * H:(g + 1) * H])
        cols.append(w_b[..., g * H:(g + 1) * H])
    return jnp.concatenate(cols, axis=-1)


def init_params(key, V, D, H, num_layers, da, r, H_f, O):
    keys = iter(jax.random.split(key, 64))

    def rnd(shape, scale=0.1):
        return (scale * jax.random.normal(next(keys), shape)).astype(jnp.float32)

    lstm = []
    for layer in range(num_layers):
        din = D if layer == 0 else 2 * H
        # Per-direction weights (pre-transposed for x @ W), gate order [i,f,g,o].
        wih_f, wih_b = rnd((din, 4 * H)), rnd((din, 4 * H))
        whh_f, whh_b = rnd((H, 4 * H)), rnd((H, 4 * H))
        b_f, b_b = rnd((1, 4 * H)), rnd((1, 4 * H))    # b_ih + b_hh combined

        wih = _pack_dir_gate_major(wih_f, wih_b, H)            # (din, 8H)
        b = _pack_dir_gate_major(b_f, b_b, H)                  # (1, 8H)
        # Block-structured recurrent weights: h_fwd rows feed fwd gate columns,
        # h_bwd rows feed bwd gate columns.
        # TODO(synk): split into two (H, 4H) matmuls once 2H exceeds one MXU
        # K pass (H >= 64 on v5e) to avoid the zero half.
        whh = jnp.zeros((2 * H, 8 * H), jnp.float32)
        for g in range(4):
            whh = whh.at[:H, (2 * g) * H:(2 * g + 1) * H].set(
                whh_f[:, g * H:(g + 1) * H])
            whh = whh.at[H:, (2 * g + 1) * H:(2 * g + 2) * H].set(
                whh_b[:, g * H:(g + 1) * H])
        lstm.append((wih, whh, b))

    return dict(
        embedding=rnd((V, D)),
        lstm=lstm,
        wa=rnd((2 * H, da)),             # attn  (bias=False), transposed
        wa2=rnd((da, r)),                # attn2 (bias=False), transposed
        w1=rnd((r * 2 * H, H_f)),        # fc[0] weight, transposed
        b1=rnd((1, H_f)),                # fc[0] bias
        w2=rnd((H_f, O)),                # fc[2] weight, transposed
        b2=rnd((1, O)),                  # fc[2] bias
    )


if __name__ == "__main__":
    # config: V=50, D=16, H=32, num_layers=1, bidirec=True, da=8, r=4, H_f=32, O=5
    V, D, H, num_layers, da, r, H_f, O = 50, 16, 32, 1, 8, 4, 32, 5
    B, T = 4, 8

    key = jax.random.PRNGKey(0)
    k_param, k_tok = jax.random.split(key)
    params = init_params(k_param, V, D, H, num_layers, da, r, H_f, O)

    token_ids = jax.random.randint(k_tok, (B, T), 0, V, dtype=jnp.int32)
    # pack_padded_sequence requires lengths sorted in decreasing order,
    # max length == T so the padded output keeps T timesteps.
    lengths = jnp.array([8, 7, 5, 3], dtype=jnp.int32)

    logits, loss_P = bidirec_lstm_forward(token_ids, lengths, params,
                                          num_layers, r)
    jax.block_until_ready((logits, loss_P))
    assert logits.shape == (B, O)
    assert loss_P.shape == ()
    print("KERNEL_OK")
</pallas_src>

<mosaic_0001>
module attributes {stable_mosaic.version = 11 : i64} {
  func.func @_fused_kernel(%arg0: i32, %arg1: memref<8x4x16xf32, #tpu.memory_space<vmem>>, %arg2: memref<4x1xi32, #tpu.memory_space<vmem>>, %arg3: memref<16x256xf32, #tpu.memory_space<vmem>>, %arg4: memref<64x256xf32, #tpu.memory_space<vmem>>, %arg5: memref<1x256xf32, #tpu.memory_space<vmem>>, %arg6: memref<64x8xf32, #tpu.memory_space<vmem>>, %arg7: memref<8x4xf32, #tpu.memory_space<vmem>>, %arg8: memref<256x32xf32, #tpu.memory_space<vmem>>, %arg9: memref<1x32xf32, #tpu.memory_space<vmem>>, %arg10: memref<32x5xf32, #tpu.memory_space<vmem>>, %arg11: memref<1x5xf32, #tpu.memory_space<vmem>>, %arg12: memref<4x5xf32, #tpu.memory_space<vmem>>, %arg13: memref<4x1xf32, #tpu.memory_space<vmem>>, %arg14: memref<8x4x256xf32, #tpu.memory_space<vmem>>, %arg15: memref<8x4x32xf32, #tpu.memory_space<vmem>>, %arg16: memref<8x4x32xf32, #tpu.memory_space<vmem>>) attributes {dimension_semantics = [#tpu.dimension_semantics<parallel>], iteration_bounds = array<i64: 1>, scalar_prefetch = 0 : i64, scratch_operands = 3 : i64, tpu.core_type = #tpu.core_type<tc>, window_params = [{transform_indices = @transform_0, window_bounds = array<i64: 8, 4, 16>}, {transform_indices = @transform_1, window_bounds = array<i64: 4, 1>}, {pipeline_mode = #tpu.pipeline_mode<synchronous>, transform_indices = @transform_2, window_bounds = array<i64: 16, 256>}, {pipeline_mode = #tpu.pipeline_mode<synchronous>, transform_indices = @transform_3, window_bounds = array<i64: 64, 256>}, {pipeline_mode = #tpu.pipeline_mode<synchronous>, transform_indices = @transform_4, window_bounds = array<i64: 1, 256>}, {pipeline_mode = #tpu.pipeline_mode<synchronous>, transform_indices = @transform_5, window_bounds = array<i64: 64, 8>}, {pipeline_mode = #tpu.pipeline_mode<synchronous>, transform_indices = @transform_6, window_bounds = array<i64: 8, 4>}, {pipeline_mode = #tpu.pipeline_mode<synchronous>, transform_indices = @transform_7, window_bounds = array<i64: 256, 32>}, {pipeline_mode = #tpu.pipeline_mode<synchronous>, transform_indices = @transform_8, window_bounds = array<i64: 1, 32>}, {pipeline_mode = #tpu.pipeline_mode<synchronous>, transform_indices = @transform_9, window_bounds = array<i64: 32, 5>}, {pipeline_mode = #tpu.pipeline_mode<synchronous>, transform_indices = @transform_10, window_bounds = array<i64: 1, 5>}, {transform_indices = @transform_11, window_bounds = array<i64: 4, 5>}, {transform_indices = @transform_12, window_bounds = array<i64: 4, 1>}]} {
    %c0 = arith.constant 0 : index
    %c0_0 = arith.constant 0 : index
    %0 = vector.load %arg2[%c0, %c0_0] : memref<4x1xi32, #tpu.memory_space<vmem>>, vector<4x1xi32>
    %1 = tpu.iota {dimensions = array<i32: 1>} : vector<1x64xi32>
    %c32_i32 = arith.constant 32 : i32
    %2 = vector.broadcast %c32_i32 : i32 to vector<1x64xi32>
    %3 = arith.cmpi slt, %1, %2 : vector<1x64xi32>
    %4 = arith.extui %3 : vector<1x64xi1> to vector<1x64xi32>
    %c1_i32 = arith.constant 1 : i32
    %5 = vector.broadcast %c1_i32 : i32 to vector<1x64xi32>
    %6 = arith.cmpi eq, %4, %5 : vector<1x64xi32>
    %c0_i32 = arith.constant 0 : i32
    %7 = vector.broadcast %c0_i32 : i32 to vector<1x64xi32>
    %8 = arith.cmpi eq, %4, %7 : vector<1x64xi32>
    %9 = tpu.concatenate %4, %4, %4, %4 in 1 : vector<1x64xi32>, vector<1x64xi32>, vector<1x64xi32>, vector<1x64xi32> -> vector<1x256xi32>
    %c0_i32_1 = arith.constant 0 : i32
    %10 = vector.broadcast %c0_i32_1 : i32 to vector<1x256xi32>
    %11 = arith.cmpi eq, %9, %10 : vector<1x256xi32>
    %c0_2 = arith.constant 0 : index
    %c0_3 = arith.constant 0 : index
    %c0_4 = arith.constant 0 : index
    %12 = vector.load %arg1[%c0_2, %c0_3, %c0_4] : memref<8x4x16xf32, #tpu.memory_space<vmem>>, vector<8x4x16xf32>
    %13 = vector.shape_cast %12 : vector<8x4x16xf32> to vector<32x16xf32>
    %c0_5 = arith.constant 0 : index
    %c0_6 = arith.constant 0 : index
    %14 = vector.load %arg3[%c0_5, %c0_6] : memref<16x256xf32, #tpu.memory_space<vmem>>, vector<16x256xf32>
    %cst = arith.constant dense<0.000000e+00> : vector<32x256xf32>
    %15 = tpu.matmul %13, %14, %cst {dimension_numbers = #tpu.dot_dimension_numbers<[1], [0], [0], [1], [0, 0, 1, 1], [], []>} : vector<32x16xf32>, vector<16x256xf32>, vector<32x256xf32> -> vector<32x256xf32>
    %c0_7 = arith.constant 0 : index
    %c0_8 = arith.constant 0 : index
    %16 = vector.load %arg5[%c0_7, %c0_8] : memref<1x256xf32, #tpu.memory_space<vmem>>, vector<1x256xf32>
    %17 = vector.broadcast %16 : vector<1x256xf32> to vector<32x256xf32>
    %18 = arith.addf %15, %17 : vector<32x256xf32>
    %19 = vector.shape_cast %18 : vector<32x256xf32> to vector<8x4x256xf32>
    %c0_9 = arith.constant 0 : index
    %c0_10 = arith.constant 0 : index
    %c0_11 = arith.constant 0 : index
    %20 = vector.load %arg14[%c0_9, %c0_10, %c0_11] : memref<8x4x256xf32, #tpu.memory_space<vmem>>, vector<8x4x256xf32>
    tpu.vector_store %arg14[%c0_9, %c0_10, %c0_11], %19 {strides = array<i32>} : memref<8x4x256xf32, #tpu.memory_space<vmem>>, vector<8x4x256xf32>,
    %c0_12 = arith.constant 0 : index
    %c0_13 = arith.constant 0 : index
    %21 = vector.load %arg4[%c0_12, %c0_13] : memref<64x256xf32, #tpu.memory_space<vmem>>, vector<64x256xf32>
    %cst_14 = arith.constant 0.000000e+00 : f32
    %22 = vector.broadcast %cst_14 : f32 to vector<4x64xf32>
    %cst_15 = arith.constant 0.000000e+00 : f32
    %23 = vector.broadcast %cst_15 : f32 to vector<4x64xf32>
    %c7 = arith.constant 7 : index
    %c0_16 = arith.constant 0 : index
    %c0_17 = arith.constant 0 : index
    %24 = vector.load %arg14[%c7, %c0_16, %c0_17] : memref<8x4x256xf32, #tpu.memory_space<vmem>>, vector<1x4x256xf32>
    %25 = vector.shape_cast %24 : vector<1x4x256xf32> to vector<4x256xf32>
    %c0_18 = arith.constant 0 : index
    %c0_19 = arith.constant 0 : index
    %c0_20 = arith.constant 0 : index
    %26 = vector.load %arg14[%c0_18, %c0_19, %c0_20] : memref<8x4x256xf32, #tpu.memory_space<vmem>>, vector<1x4x256xf32>
    %27 = vector.shape_cast %26 : vector<1x4x256xf32> to vector<4x256xf32>
    %28 = vector.shape_cast %11 : vector<1x256xi1> to vector<1x256xi1>
    %29 = vector.broadcast %28 : vector<1x256xi1> to vector<4x256xi1>
    %30 = arith.select %29, %25, %27 : vector<4x256xi1>, vector<4x256xf32>
    %cst_21 = arith.constant dense<0.000000e+00> : vector<4x256xf32>
    %31 = tpu.matmul %22, %21, %cst_21 {dimension_numbers = #tpu.dot_dimension_numbers<[1], [0], [0], [1], [0, 0, 1, 1], [], []>} : vector<4x64xf32>, vector<64x256xf32>, vector<4x256xf32> -> vector<4x256xf32>
    %32 = arith.addf %30, %31 : vector<4x256xf32>
    %33 = vector.extract_strided_slice %32 {offsets = [0, 0], sizes = [4, 64], strides = [1, 1]} : vector<4x256xf32> to vector<4x64xf32>
    %34 = arith.negf %33 : vector<4x64xf32>
    %35 = math.exp %34 : vector<4x64xf32>
    %cst_22 = arith.constant 1.000000e+00 : f32
    %36 = vector.broadcast %cst_22 : f32 to vector<4x64xf32>
    %37 = arith.addf %36, %35 : vector<4x64xf32>
    %38 = arith.divf %36, %37 : vector<4x64xf32>
    %39 = vector.extract_strided_slice %32 {offsets = [0, 64], sizes = [4, 64], strides = [1, 1]} : vector<4x256xf32> to vector<4x64xf32>
    %40 = arith.negf %39 : vector<4x64xf32>
    %41 = math.exp %40 : vector<4x64xf32>
    %cst_23 = arith.constant 1.000000e+00 : f32
    %42 = vector.broadcast %cst_23 : f32 to vector<4x64xf32>
    %43 = arith.addf %42, %41 : vector<4x64xf32>
    %44 = arith.divf %42, %43 : vector<4x64xf32>
    %45 = vector.extract_strided_slice %32 {offsets = [0, 128], sizes = [4, 64], strides = [1, 1]} : vector<4x256xf32> to vector<4x64xf32>
    %46 = math.tanh %45 : vector<4x64xf32>
    %47 = vector.extract_strided_slice %32 {offsets = [0, 192], sizes = [4, 64], strides = [1, 1]} : vector<4x256xf32> to vector<4x64xf32>
    %48 = arith.negf %47 : vector<4x64xf32>
    %49 = math.exp %48 : vector<4x64xf32>
    %cst_24 = arith.constant 1.000000e+00 : f32
    %50 = vector.broadcast %cst_24 : f32 to vector<4x64xf32>
    %51 = arith.addf %50, %49 : vector<4x64xf32>
    %52 = arith.divf %50, %51 : vector<4x64xf32>
    %53 = arith.mulf %44, %23 : vector<4x64xf32>
    %54 = arith.mulf %38, %46 : vector<4x64xf32>
    %55 = arith.addf %53, %54 : vector<4x64xf32>
    %56 = math.tanh %55 : vector<4x64xf32>
    %57 = arith.mulf %52, %56 : vector<4x64xf32>
    %c0_i32_25 = arith.constant 0 : i32
    %58 = vector.broadcast %c0_i32_25 : i32 to vector<4x1xi32>
    %59 = arith.cmpi sgt, %0, %58 : vector<4x1xi32>
    %c7_i32 = arith.constant 7 : i32
    %60 = vector.broadcast %c7_i32 : i32 to vector<4x1xi32>
    %61 = arith.cmpi sgt, %0, %60 : vector<4x1xi32>
    %62 = vector.broadcast %6 : vector<1x64xi1> to vector<4x64xi1>
    %63 = vector.broadcast %59 : vector<4x1xi1> to vector<4x64xi1>
    %64 = arith.andi %62, %63 : vector<4x64xi1>
    %65 = vector.broadcast %8 : vector<1x64xi1> to vector<4x64xi1>
    %66 = vector.broadcast %61 : vector<4x1xi1> to vector<4x64xi1>
    %67 = arith.andi %65, %66 : vector<4x64xi1>
    %68 = arith.ori %64, %67 : vector<4x64xi1>
    %69 = arith.select %68, %57, %22 : vector<4x64xi1>, vector<4x64xf32>
    %70 = arith.select %68, %55, %23 : vector<4x64xi1>, vector<4x64xf32>
    %71 = vector.extract_strided_slice %57 {offsets = [0, 0], sizes = [4, 32], strides = [1, 1]} : vector<4x64xf32> to vector<4x32xf32>
    %cst_26 = arith.constant 0.000000e+00 : f32
    %72 = vector.shape_cast %59 : vector<4x1xi1> to vector<4x1xi1>
    %73 = vector.broadcast %72 : vector<4x1xi1> to vector<4x32xi1>
    %74 = vector.broadcast %cst_26 : f32 to vector<4x32xf32>
    %75 = arith.select %73, %71, %74 : vector<4x32xi1>, vector<4x32xf32>
    %c0_27 = arith.constant 0 : index
    %c0_28 = arith.constant 0 : index
    %c0_29 = arith.constant 0 : index
    %76 = vector.load %arg15[%c0_27, %c0_28, %c0_29] : memref<8x4x32xf32, #tpu.memory_space<vmem>>, vector<1x4x32xf32>
    %77 = vector.shape_cast %76 : vector<1x4x32xf32> to vector<4x32xf32>
    %78 = vector.shape_cast %75 : vector<4x32xf32> to vector<1x4x32xf32>
    tpu.vector_store %arg15[%c0_27, %c0_28, %c0_29], %78 {strides = array<i32>} : memref<8x4x32xf32, #tpu.memory_space<vmem>>, vector<1x4x32xf32>,
    %79 = vector.extract_strided_slice %57 {offsets = [0, 32], sizes = [4, 32], strides = [1, 1]} : vector<4x64xf32> to vector<4x32xf32>
    %cst_30 = arith.constant 0.000000e+00 : f32
    %80 = vector.shape_cast %61 : vector<4x1xi1> to vector<4x1xi1>
    %81 = vector.broadcast %80 : vector<4x1xi1> to vector<4x32xi1>
    %82 = vector.broadcast %cst_30 : f32 to vector<4x32xf32>
    %83 = arith.select %81, %79, %82 : vector<4x32xi1>, vector<4x32xf32>
    %c7_31 = arith.constant 7 : index
    %c0_32 = arith.constant 0 : index
    %c0_33 = arith.constant 0 : index
    %84 = vector.load %arg16[%c7_31, %c0_32, %c0_33] : memref<8x4x32xf32, #tpu.memory_space<vmem>>, vector<1x4x32xf32>
    %85 = vector.shape_cast %84 : vector<1x4x32xf32> to vector<4x32xf32>
    %86 = vector.shape_cast %83 : vector<4x32xf32> to vector<1x4x32xf32>
    tpu.vector_store %arg16[%c7_31, %c0_32, %c0_33], %86 {strides = array<i32>} : memref<8x4x32xf32, #tpu.memory_space<vmem>>, vector<1x4x32xf32>,
    %c6 = arith.constant 6 : index
    %c0_34 = arith.constant 0 : index
    %c0_35 = arith.constant 0 : index
    %87 = vector.load %arg14[%c6, %c0_34, %c0_35] : memref<8x4x256xf32, #tpu.memory_space<vmem>>, vector<1x4x256xf32>
    %88 = vector.shape_cast %87 : vector<1x4x256xf32> to vector<4x256xf32>
    %c1 = arith.constant 1 : index
    %c0_36 = arith.constant 0 : index
    %c0_37 = arith.constant 0 : index
    %89 = vector.load %arg14[%c1, %c0_36, %c0_37] : memref<8x4x256xf32, #tpu.memory_space<vmem>>, vector<1x4x256xf32>
    %90 = vector.shape_cast %89 : vector<1x4x256xf32> to vector<4x256xf32>
    %91 = vector.shape_cast %11 : vector<1x256xi1> to vector<1x256xi1>
    %92 = vector.broadcast %91 : vector<1x256xi1> to vector<4x256xi1>
    %93 = arith.select %92, %88, %90 : vector<4x256xi1>, vector<4x256xf32>
    %cst_38 = arith.constant dense<0.000000e+00> : vector<4x256xf32>
    %94 = tpu.matmul %69, %21, %cst_38 {dimension_numbers = #tpu.dot_dimension_numbers<[1], [0], [0], [1], [0, 0, 1, 1], [], []>} : vector<4x64xf32>, vector<64x256xf32>, vector<4x256xf32> -> vector<4x256xf32>
    %95 = arith.addf %93, %94 : vector<4x256xf32>
    %96 = vector.extract_strided_slice %95 {offsets = [0, 0], sizes = [4, 64], strides = [1, 1]} : vector<4x256xf32> to vector<4x64xf32>
    %97 = arith.negf %96 : vector<4x64xf32>
    %98 = math.exp %97 : vector<4x64xf32>
    %cst_39 = arith.constant 1.000000e+00 : f32
    %99 = vector.broadcast %cst_39 : f32 to vector<4x64xf32>
    %100 = arith.addf %99, %98 : vector<4x64xf32>
    %101 = arith.divf %99, %100 : vector<4x64xf32>
    %102 = vector.extract_strided_slice %95 {offsets = [0, 64], sizes = [4, 64], strides = [1, 1]} : vector<4x256xf32> to vector<4x64xf32>
    %103 = arith.negf %102 : vector<4x64xf32>
    %104 = math.exp %103 : vector<4x64xf32>
    %cst_40 = arith.constant 1.000000e+00 : f32
    %105 = vector.broadcast %cst_40 : f32 to vector<4x64xf32>
    %106 = arith.addf %105, %104 : vector<4x64xf32>
    %107 = arith.divf %105, %106 : vector<4x64xf32>
    %108 = vector.extract_strided_slice %95 {offsets = [0, 128], sizes = [4, 64], strides = [1, 1]} : vector<4x256xf32> to vector<4x64xf32>
    %109 = math.tanh %108 : vector<4x64xf32>
    %110 = vector.extract_strided_slice %95 {offsets = [0, 192], sizes = [4, 64], strides = [1, 1]} : vector<4x256xf32> to vector<4x64xf32>
    %111 = arith.negf %110 : vector<4x64xf32>
    %112 = math.exp %111 : vector<4x64xf32>
    %cst_41 = arith.constant 1.000000e+00 : f32
    %113 = vector.broadcast %cst_41 : f32 to vector<4x64xf32>
    %114 = arith.addf %113, %112 : vector<4x64xf32>
    %115 = arith.divf %113, %114 : vector<4x64xf32>
    %116 = arith.mulf %107, %70 : vector<4x64xf32>
    %117 = arith.mulf %101, %109 : vector<4x64xf32>
    %118 = arith.addf %116, %117 : vector<4x64xf32>
    %119 = math.tanh %118 : vector<4x64xf32>
    %120 = arith.mulf %115, %119 : vector<4x64xf32>
    %c1_i32_42 = arith.constant 1 : i32
    %121 = vector.broadcast %c1_i32_42 : i32 to vector<4x1xi32>
    %122 = arith.cmpi sgt, %0, %121 : vector<4x1xi32>
    %c6_i32 = arith.constant 6 : i32
    %123 = vector.broadcast %c6_i32 : i32 to vector<4x1xi32>
    %124 = arith.cmpi sgt, %0, %123 : vector<4x1xi32>
    %125 = vector.broadcast %6 : vector<1x64xi1> to vector<4x64xi1>
    %126 = vector.broadcast %122 : vector<4x1xi1> to vector<4x64xi1>
    %127 = arith.andi %125, %126 : vector<4x64xi1>
    %128 = vector.broadcast %8 : vector<1x64xi1> to vector<4x64xi1>
    %129 = vector.broadcast %124 : vector<4x1xi1> to vector<4x64xi1>
    %130 = arith.andi %128, %129 : vector<4x64xi1>
    %131 = arith.ori %127, %130 : vector<4x64xi1>
    %132 = arith.select %131, %120, %69 : vector<4x64xi1>, vector<4x64xf32>
    %133 = arith.select %131, %118, %70 : vector<4x64xi1>, vector<4x64xf32>
    %134 = vector.extract_strided_slice %120 {offsets = [0, 0], sizes = [4, 32], strides = [1, 1]} : vector<4x64xf32> to vector<4x32xf32>
    %cst_43 = arith.constant 0.000000e+00 : f32
    %135 = vector.shape_cast %122 : vector<4x1xi1> to vector<4x1xi1>
    %136 = vector.broadcast %135 : vector<4x1xi1> to vector<4x32xi1>
    %137 = vector.broadcast %cst_43 : f32 to vector<4x32xf32>
    %138 = arith.select %136, %134, %137 : vector<4x32xi1>, vector<4x32xf32>
    %c1_44 = arith.constant 1 : index
    %c0_45 = arith.constant 0 : index
    %c0_46 = arith.constant 0 : index
    %139 = vector.load %arg15[%c1_44, %c0_45, %c0_46] : memref<8x4x32xf32, #tpu.memory_space<vmem>>, vector<1x4x32xf32>
    %140 = vector.shape_cast %139 : vector<1x4x32xf32> to vector<4x32xf32>
    %141 = vector.shape_cast %138 : vector<4x32xf32> to vector<1x4x32xf32>
    tpu.vector_store %arg15[%c1_44, %c0_45, %c0_46], %141 {strides = array<i32>} : memref<8x4x32xf32, #tpu.memory_space<vmem>>, vector<1x4x32xf32>,
    %142 = vector.extract_strided_slice %120 {offsets = [0, 32], sizes = [4, 32], strides = [1, 1]} : vector<4x64xf32> to vector<4x32xf32>
    %cst_47 = arith.constant 0.000000e+00 : f32
    %143 = vector.shape_cast %124 : vector<4x1xi1> to vector<4x1xi1>
    %144 = vector.broadcast %143 : vector<4x1xi1> to vector<4x32xi1>
    %145 = vector.broadcast %cst_47 : f32 to vector<4x32xf32>
    %146 = arith.select %144, %142, %145 : vector<4x32xi1>, vector<4x32xf32>
    %c6_48 = arith.constant 6 : index
    %c0_49 = arith.constant 0 : index
    %c0_50 = arith.constant 0 : index
    %147 = vector.load %arg16[%c6_48, %c0_49, %c0_50] : memref<8x4x32xf32, #tpu.memory_space<vmem>>, vector<1x4x32xf32>
    %148 = vector.shape_cast %147 : vector<1x4x32xf32> to vector<4x32xf32>
    %149 = vector.shape_cast %146 : vector<4x32xf32> to vector<1x4x32xf32>
    tpu.vector_store %arg16[%c6_48, %c0_49, %c0_50], %149 {strides = array<i32>} : memref<8x4x32xf32, #tpu.memory_space<vmem>>, vector<1x4x32xf32>,
    %c5 = arith.constant 5 : index
    %c0_51 = arith.constant 0 : index
    %c0_52 = arith.constant 0 : index
    %150 = vector.load %arg14[%c5, %c0_51, %c0_52] : memref<8x4x256xf32, #tpu.memory_space<vmem>>, vector<1x4x256xf32>
    %151 = vector.shape_cast %150 : vector<1x4x256xf32> to vector<4x256xf32>
    %c2 = arith.constant 2 : index
    %c0_53 = arith.constant 0 : index
    %c0_54 = arith.constant 0 : index
    %152 = vector.load %arg14[%c2, %c0_53, %c0_54] : memref<8x4x256xf32, #tpu.memory_space<vmem>>, vector<1x4x256xf32>
    %153 = vector.shape_cast %152 : vector<1x4x256xf32> to vector<4x256xf32>
    %154 = vector.shape_cast %11 : vector<1x256xi1> to vector<1x256xi1>
    %155 = vector.broadcast %154 : vector<1x256xi1> to vector<4x256xi1>
    %156 = arith.select %155, %151, %153 : vector<4x256xi1>, vector<4x256xf32>
    %cst_55 = arith.constant dense<0.000000e+00> : vector<4x256xf32>
    %157 = tpu.matmul %132, %21, %cst_55 {dimension_numbers = #tpu.dot_dimension_numbers<[1], [0], [0], [1], [0, 0, 1, 1], [], []>} : vector<4x64xf32>, vector<64x256xf32>, vector<4x256xf32> -> vector<4x256xf32>
    %158 = arith.addf %156, %157 : vector<4x256xf32>
    %159 = vector.extract_strided_slice %158 {offsets = [0, 0], sizes = [4, 64], strides = [1, 1]} : vector<4x256xf32> to vector<4x64xf32>
    %160 = arith.negf %159 : vector<4x64xf32>
    %161 = math.exp %160 : vector<4x64xf32>
    %cst_56 = arith.constant 1.000000e+00 : f32
    %162 = vector.broadcast %cst_56 : f32 to vector<4x64xf32>
    %163 = arith.addf %162, %161 : vector<4x64xf32>
    %164 = arith.divf %162, %163 : vector<4x64xf32>
    %165 = vector.extract_strided_slice %158 {offsets = [0, 64], sizes = [4, 64], strides = [1, 1]} : vector<4x256xf32> to vector<4x64xf32>
    %166 = arith.negf %165 : vector<4x64xf32>
    %167 = math.exp %166 : vector<4x64xf32>
    %cst_57 = arith.constant 1.000000e+00 : f32
    %168 = vector.broadcast %cst_57 : f32 to vector<4x64xf32>
    %169 = arith.addf %168, %167 : vector<4x64xf32>
    %170 = arith.divf %168, %169 : vector<4x64xf32>
    %171 = vector.extract_strided_slice %158 {offsets = [0, 128], sizes = [4, 64], strides = [1, 1]} : vector<4x256xf32> to vector<4x64xf32>
    %172 = math.tanh %171 : vector<4x64xf32>
    %173 = vector.extract_strided_slice %158 {offsets = [0, 192], sizes = [4, 64], strides = [1, 1]} : vector<4x256xf32> to vector<4x64xf32>
    %174 = arith.negf %173 : vector<4x64xf32>
    %175 = math.exp %174 : vector<4x64xf32>
    %cst_58 = arith.constant 1.000000e+00 : f32
    %176 = vector.broadcast %cst_58 : f32 to vector<4x64xf32>
    %177 = arith.addf %176, %175 : vector<4x64xf32>
    %178 = arith.divf %176, %177 : vector<4x64xf32>
    %179 = arith.mulf %170, %133 : vector<4x64xf32>
    %180 = arith.mulf %164, %172 : vector<4x64xf32>
    %181 = arith.addf %179, %180 : vector<4x64xf32>
    %182 = math.tanh %181 : vector<4x64xf32>
    %183 = arith.mulf %178, %182 : vector<4x64xf32>
    %c2_i32 = arith.constant 2 : i32
    %184 = vector.broadcast %c2_i32 : i32 to vector<4x1xi32>
    %185 = arith.cmpi sgt, %0, %184 : vector<4x1xi32>
    %c5_i32 = arith.constant 5 : i32
    %186 = vector.broadcast %c5_i32 : i32 to vector<4x1xi32>
    %187 = arith.cmpi sgt, %0, %186 : vector<4x1xi32>
    %188 = vector.broadcast %6 : vector<1x64xi1> to vector<4x64xi1>
    %189 = vector.broadcast %185 : vector<4x1xi1> to vector<4x64xi1>
    %190 = arith.andi %188, %189 : vector<4x64xi1>
    %191 = vector.broadcast %8 : vector<1x64xi1> to vector<4x64xi1>
    %192 = vector.broadcast %187 : vector<4x1xi1> to vector<4x64xi1>
    %193 = arith.andi %191, %192 : vector<4x64xi1>
    %194 = arith.ori %190, %193 : vector<4x64xi1>
    %195 = arith.select %194, %183, %132 : vector<4x64xi1>, vector<4x64xf32>
    %196 = arith.select %194, %181, %133 : vector<4x64xi1>, vector<4x64xf32>
    %197 = vector.extract_strided_slice %183 {offsets = [0, 0], sizes = [4, 32], strides = [1, 1]} : vector<4x64xf32> to vector<4x32xf32>
    %cst_59 = arith.constant 0.000000e+00 : f32
    %198 = vector.shape_cast %185 : vector<4x1xi1> to vector<4x1xi1>
    %199 = vector.broadcast %198 : vector<4x1xi1> to vector<4x32xi1>
    %200 = vector.broadcast %cst_59 : f32 to vector<4x32xf32>
    %201 = arith.select %199, %197, %200 : vector<4x32xi1>, vector<4x32xf32>
    %c2_60 = arith.constant 2 : index
    %c0_61 = arith.constant 0 : index
    %c0_62 = arith.constant 0 : index
    %202 = vector.load %arg15[%c2_60, %c0_61, %c0_62] : memref<8x4x32xf32, #tpu.memory_space<vmem>>, vector<1x4x32xf32>
    %203 = vector.shape_cast %202 : vector<1x4x32xf32> to vector<4x32xf32>
    %204 = vector.shape_cast %201 : vector<4x32xf32> to vector<1x4x32xf32>
    tpu.vector_store %arg15[%c2_60, %c0_61, %c0_62], %204 {strides = array<i32>} : memref<8x4x32xf32, #tpu.memory_space<vmem>>, vector<1x4x32xf32>,
    %205 = vector.extract_strided_slice %183 {offsets = [0, 32], sizes = [4, 32], strides = [1, 1]} : vector<4x64xf32> to vector<4x32xf32>
    %cst_63 = arith.constant 0.000000e+00 : f32
    %206 = vector.shape_cast %187 : vector<4x1xi1> to vector<4x1xi1>
    %207 = vector.broadcast %206 : vector<4x1xi1> to vector<4x32xi1>
    %208 = vector.broadcast %cst_63 : f32 to vector<4x32xf32>
    %209 = arith.select %207, %205, %208 : vector<4x32xi1>, vector<4x32xf32>
    %c5_64 = arith.constant 5 : index
    %c0_65 = arith.constant 0 : index
    %c0_66 = arith.constant 0 : index
    %210 = vector.load %arg16[%c5_64, %c0_65, %c0_66] : memref<8x4x32xf32, #tpu.memory_space<vmem>>, vector<1x4x32xf32>
    %211 = vector.shape_cast %210 : vector<1x4x32xf32> to vector<4x32xf32>
    %212 = vector.shape_cast %209 : vector<4x32xf32> to vector<1x4x32xf32>
    tpu.vector_store %arg16[%c5_64, %c0_65, %c0_66], %212 {strides = array<i32>} : memref<8x4x32xf32, #tpu.memory_space<vmem>>, vector<1x4x32xf32>,
    %c4 = arith.constant 4 : index
    %c0_67 = arith.constant 0 : index
    %c0_68 = arith.constant 0 : index
    %213 = vector.load %arg14[%c4, %c0_67, %c0_68] : memref<8x4x256xf32, #tpu.memory_space<vmem>>, vector<1x4x256xf32>
    %214 = vector.shape_cast %213 : vector<1x4x256xf32> to vector<4x256xf32>
    %c3 = arith.constant 3 : index
    %c0_69 = arith.constant 0 : index
    %c0_70 = arith.constant 0 : index
    %215 = vector.load %arg14[%c3, %c0_69, %c0_70] : memref<8x4x256xf32, #tpu.memory_space<vmem>>, vector<1x4x256xf32>
    %216 = vector.shape_cast %215 : vector<1x4x256xf32> to vector<4x256xf32>
    %217 = vector.shape_cast %11 : vector<1x256xi1> to vector<1x256xi1>
    %218 = vector.broadcast %217 : vector<1x256xi1> to vector<4x256xi1>
    %219 = arith.select %218, %214, %216 : vector<4x256xi1>, vector<4x256xf32>
    %cst_71 = arith.constant dense<0.000000e+00> : vector<4x256xf32>
    %220 = tpu.matmul %195, %21, %cst_71 {dimension_numbers = #tpu.dot_dimension_numbers<[1], [0], [0], [1], [0, 0, 1, 1], [], []>} : vector<4x64xf32>, vector<64x256xf32>, vector<4x256xf32> -> vector<4x256xf32>
    %221 = arith.addf %219, %220 : vector<4x256xf32>
    %222 = vector.extract_strided_slice %221 {offsets = [0, 0], sizes = [4, 64], strides = [1, 1]} : vector<4x256xf32> to vector<4x64xf32>
    %223 = arith.negf %222 : vector<4x64xf32>
    %224 = math.exp %223 : vector<4x64xf32>
    %cst_72 = arith.constant 1.000000e+00 : f32
    %225 = vector.broadcast %cst_72 : f32 to vector<4x64xf32>
    %226 = arith.addf %225, %224 : vector<4x64xf32>
    %227 = arith.divf %225, %226 : vector<4x64xf32>
    %228 = vector.extract_strided_slice %221 {offsets = [0, 64], sizes = [4, 64], strides = [1, 1]} : vector<4x256xf32> to vector<4x64xf32>
    %229 = arith.negf %228 : vector<4x64xf32>
    %230 = math.exp %229 : vector<4x64xf32>
    %cst_73 = arith.constant 1.000000e+00 : f32
    %231 = vector.broadcast %cst_73 : f32 to vector<4x64xf32>
    %232 = arith.addf %231, %230 : vector<4x64xf32>
    %233 = arith.divf %231, %232 : vector<4x64xf32>
    %234 = vector.extract_strided_slice %221 {offsets = [0, 128], sizes = [4, 64], strides = [1, 1]} : vector<4x256xf32> to vector<4x64xf32>
    %235 = math.tanh %234 : vector<4x64xf32>
    %236 = vector.extract_strided_slice %221 {offsets = [0, 192], sizes = [4, 64], strides = [1, 1]} : vector<4x256xf32> to vector<4x64xf32>
    %237 = arith.negf %236 : vector<4x64xf32>
    %238 = math.exp %237 : vector<4x64xf32>
    %cst_74 = arith.constant 1.000000e+00 : f32
    %239 = vector.broadcast %cst_74 : f32 to vector<4x64xf32>
    %240 = arith.addf %239, %238 : vector<4x64xf32>
    %241 = arith.divf %239, %240 : vector<4x64xf32>
    %242 = arith.mulf %233, %196 : vector<4x64xf32>
    %243 = arith.mulf %227, %235 : vector<4x64xf32>
    %244 = arith.addf %242, %243 : vector<4x64xf32>
    %245 = math.tanh %244 : vector<4x64xf32>
    %246 = arith.mulf %241, %245 : vector<4x64xf32>
    %c3_i32 = arith.constant 3 : i32
    %247 = vector.broadcast %c3_i32 : i32 to vector<4x1xi32>
    %248 = arith.cmpi sgt, %0, %247 : vector<4x1xi32>
    %c4_i32 = arith.constant 4 : i32
    %249 = vector.broadcast %c4_i32 : i32 to vector<4x1xi32>
    %250 = arith.cmpi sgt, %0, %249 : vector<4x1xi32>
    %251 = vector.broadcast %6 : vector<1x64xi1> to vector<4x64xi1>
    %252 = vector.broadcast %248 : vector<4x1xi1> to vector<4x64xi1>
    %253 = arith.andi %251, %252 : vector<4x64xi1>
    %254 = vector.broadcast %8 : vector<1x64xi1> to vector<4x64xi1>
    %255 = vector.broadcast %250 : vector<4x1xi1> to vector<4x64xi1>
    %256 = arith.andi %254, %255 : vector<4x64xi1>
    %257 = arith.ori %253, %256 : vector<4x64xi1>
    %258 = arith.select %257, %246, %195 : vector<4x64xi1>, vector<4x64xf32>
    %259 = arith.select %257, %244, %196 : vector<4x64xi1>, vector<4x64xf32>
    %260 = vector.extract_strided_slice %246 {offsets = [0, 0], sizes = [4, 32], strides = [1, 1]} : vector<4x64xf32> to vector<4x32xf32>
    %cst_75 = arith.constant 0.000000e+00 : f32
    %261 = vector.shape_cast %248 : vector<4x1xi1> to vector<4x1xi1>
    %262 = vector.broadcast %261 : vector<4x1xi1> to vector<4x32xi1>
    %263 = vector.broadcast %cst_75 : f32 to vector<4x32xf32>
    %264 = arith.select %262, %260, %263 : vector<4x32xi1>, vector<4x32xf32>
    %c3_76 = arith.constant 3 : index
    %c0_77 = arith.constant 0 : index
    %c0_78 = arith.constant 0 : index
    %265 = vector.load %arg15[%c3_76, %c0_77, %c0_78] : memref<8x4x32xf32, #tpu.memory_space<vmem>>, vector<1x4x32xf32>
    %266 = vector.shape_cast %265 : vector<1x4x32xf32> to vector<4x32xf32>
    %267 = vector.shape_cast %264 : vector<4x32xf32> to vector<1x4x32xf32>
    tpu.vector_store %arg15[%c3_76, %c0_77, %c0_78], %267 {strides = array<i32>} : memref<8x4x32xf32, #tpu.memory_space<vmem>>, vector<1x4x32xf32>,
    %268 = vector.extract_strided_slice %246 {offsets = [0, 32], sizes = [4, 32], strides = [1, 1]} : vector<4x64xf32> to vector<4x32xf32>
    %cst_79 = arith.constant 0.000000e+00 : f32
    %269 = vector.shape_cast %250 : vector<4x1xi1> to vector<4x1xi1>
    %270 = vector.broadcast %269 : vector<4x1xi1> to vector<4x32xi1>
    %271 = vector.broadcast %cst_79 : f32 to vector<4x32xf32>
    %272 = arith.select %270, %268, %271 : vector<4x32xi1>, vector<4x32xf32>
    %c4_80 = arith.constant 4 : index
    %c0_81 = arith.constant 0 : index
    %c0_82 = arith.constant 0 : index
    %273 = vector.load %arg16[%c4_80, %c0_81, %c0_82] : memref<8x4x32xf32, #tpu.memory_space<vmem>>, vector<1x4x32xf32>
    %274 = vector.shape_cast %273 : vector<1x4x32xf32> to vector<4x32xf32>
    %275 = vector.shape_cast %272 : vector<4x32xf32> to vector<1x4x32xf32>
    tpu.vector_store %arg16[%c4_80, %c0_81, %c0_82], %275 {strides = array<i32>} : memref<8x4x32xf32, #tpu.memory_space<vmem>>, vector<1x4x32xf32>,
    %c3_83 = arith.constant 3 : index
    %c0_84 = arith.constant 0 : index
    %c0_85 = arith.constant 0 : index
    %276 = vector.load %arg14[%c3_83, %c0_84, %c0_85] : memref<8x4x256xf32, #tpu.memory_space<vmem>>, vector<1x4x256xf32>
    %277 = vector.shape_cast %276 : vector<1x4x256xf32> to vector<4x256xf32>
    %c4_86 = arith.constant 4 : index
    %c0_87 = arith.constant 0 : index
    %c0_88 = arith.constant 0 : index
    %278 = vector.load %arg14[%c4_86, %c0_87, %c0_88] : memref<8x4x256xf32, #tpu.memory_space<vmem>>, vector<1x4x256xf32>
    %279 = vector.shape_cast %278 : vector<1x4x256xf32> to vector<4x256xf32>
    %280 = vector.shape_cast %11 : vector<1x256xi1> to vector<1x256xi1>
    %281 = vector.broadcast %280 : vector<1x256xi1> to vector<4x256xi1>
    %282 = arith.select %281, %277, %279 : vector<4x256xi1>, vector<4x256xf32>
    %cst_89 = arith.constant dense<0.000000e+00> : vector<4x256xf32>
    %283 = tpu.matmul %258, %21, %cst_89 {dimension_numbers = #tpu.dot_dimension_numbers<[1], [0], [0], [1], [0, 0, 1, 1], [], []>} : vector<4x64xf32>, vector<64x256xf32>, vector<4x256xf32> -> vector<4x256xf32>
    %284 = arith.addf %282, %283 : vector<4x256xf32>
    %285 = vector.extract_strided_slice %284 {offsets = [0, 0], sizes = [4, 64], strides = [1, 1]} : vector<4x256xf32> to vector<4x64xf32>
    %286 = arith.negf %285 : vector<4x64xf32>
    %287 = math.exp %286 : vector<4x64xf32>
    %cst_90 = arith.constant 1.000000e+00 : f32
    %288 = vector.broadcast %cst_90 : f32 to vector<4x64xf32>
    %289 = arith.addf %288, %287 : vector<4x64xf32>
    %290 = arith.divf %288, %289 : vector<4x64xf32>
    %291 = vector.extract_strided_slice %284 {offsets = [0, 64], sizes = [4, 64], strides = [1, 1]} : vector<4x256xf32> to vector<4x64xf32>
    %292 = arith.negf %291 : vector<4x64xf32>
    %293 = math.exp %292 : vector<4x64xf32>
    %cst_91 = arith.constant 1.000000e+00 : f32
    %294 = vector.broadcast %cst_91 : f32 to vector<4x64xf32>
    %295 = arith.addf %294, %293 : vector<4x64xf32>
    %296 = arith.divf %294, %295 : vector<4x64xf32>
    %297 = vector.extract_strided_slice %284 {offsets = [0, 128], sizes = [4, 64], strides = [1, 1]} : vector<4x256xf32> to vector<4x64xf32>
    %298 = math.tanh %297 : vector<4x64xf32>
    %299 = vector.extract_strided_slice %284 {offsets = [0, 192], sizes = [4, 64], strides = [1, 1]} : vector<4x256xf32> to vector<4x64xf32>
    %300 = arith.negf %299 : vector<4x64xf32>
    %301 = math.exp %300 : vector<4x64xf32>
    %cst_92 = arith.constant 1.000000e+00 : f32
    %302 = vector.broadcast %cst_92 : f32 to vector<4x64xf32>
    %303 = arith.addf %302, %301 : vector<4x64xf32>
    %304 = arith.divf %302, %303 : vector<4x64xf32>
    %305 = arith.mulf %296, %259 : vector<4x64xf32>
    %306 = arith.mulf %290, %298 : vector<4x64xf32>
    %307 = arith.addf %305, %306 : vector<4x64xf32>
    %308 = math.tanh %307 : vector<4x64xf32>
    %309 = arith.mulf %304, %308 : vector<4x64xf32>
    %c4_i32_93 = arith.constant 4 : i32
    %310 = vector.broadcast %c4_i32_93 : i32 to vector<4x1xi32>
    %311 = arith.cmpi sgt, %0, %310 : vector<4x1xi32>
    %c3_i32_94 = arith.constant 3 : i32
    %312 = vector.broadcast %c3_i32_94 : i32 to vector<4x1xi32>
    %313 = arith.cmpi sgt, %0, %312 : vector<4x1xi32>
    %314 = vector.broadcast %6 : vector<1x64xi1> to vector<4x64xi1>
    %315 = vector.broadcast %311 : vector<4x1xi1> to vector<4x64xi1>
    %316 = arith.andi %314, %315 : vector<4x64xi1>
    %317 = vector.broadcast %8 : vector<1x64xi1> to vector<4x64xi1>
    %318 = vector.broadcast %313 : vector<4x1xi1> to vector<4x64xi1>
    %319 = arith.andi %317, %318 : vector<4x64xi1>
    %320 = arith.ori %316, %319 : vector<4x64xi1>
    %321 = arith.select %320, %309, %258 : vector<4x64xi1>, vector<4x64xf32>
    %322 = arith.select %320, %307, %259 : vector<4x64xi1>, vector<4x64xf32>
    %323 = vector.extract_strided_slice %309 {offsets = [0, 0], sizes = [4, 32], strides = [1, 1]} : vector<4x64xf32> to vector<4x32xf32>
    %cst_95 = arith.constant 0.000000e+00 : f32
    %324 = vector.shape_cast %311 : vector<4x1xi1> to vector<4x1xi1>
    %325 = vector.broadcast %324 : vector<4x1xi1> to vector<4x32xi1>
    %326 = vector.broadcast %cst_95 : f32 to vector<4x32xf32>
    %327 = arith.select %325, %323, %326 : vector<4x32xi1>, vector<4x32xf32>
    %c4_96 = arith.constant 4 : index
    %c0_97 = arith.constant 0 : index
    %c0_98 = arith.constant 0 : index
    %328 = vector.load %arg15[%c4_96, %c0_97, %c0_98] : memref<8x4x32xf32, #tpu.memory_space<vmem>>, vector<1x4x32xf32>
    %329 = vector.shape_cast %328 : vector<1x4x32xf32> to vector<4x32xf32>
    %330 = vector.shape_cast %327 : vector<4x32xf32> to vector<1x4x32xf32>
    tpu.vector_store %arg15[%c4_96, %c0_97, %c0_98], %330 {strides = array<i32>} : memref<8x4x32xf32, #tpu.memory_space<vmem>>, vector<1x4x32xf32>,
    %331 = vector.extract_strided_slice %309 {offsets = [0, 32], sizes = [4, 32], strides = [1, 1]} : vector<4x64xf32> to vector<4x32xf32>
    %cst_99 = arith.constant 0.000000e+00 : f32
    %332 = vector.shape_cast %313 : vector<4x1xi1> to vector<4x1xi1>
    %333 = vector.broadcast %332 : vector<4x1xi1> to vector<4x32xi1>
    %334 = vector.broadcast %cst_99 : f32 to vector<4x32xf32>
    %335 = arith.select %333, %331, %334 : vector<4x32xi1>, vector<4x32xf32>
    %c3_100 = arith.constant 3 : index
    %c0_101 = arith.constant 0 : index
    %c0_102 = arith.constant 0 : index
    %336 = vector.load %arg16[%c3_100, %c0_101, %c0_102] : memref<8x4x32xf32, #tpu.memory_space<vmem>>, vector<1x4x32xf32>
    %337 = vector.shape_cast %336 : vector<1x4x32xf32> to vector<4x32xf32>
    %338 = vector.shape_cast %335 : vector<4x32xf32> to vector<1x4x32xf32>
    tpu.vector_store %arg16[%c3_100, %c0_101, %c0_102], %338 {strides = array<i32>} : memref<8x4x32xf32, #tpu.memory_space<vmem>>, vector<1x4x32xf32>,
    %c2_103 = arith.constant 2 : index
    %c0_104 = arith.constant 0 : index
    %c0_105 = arith.constant 0 : index
    %339 = vector.load %arg14[%c2_103, %c0_104, %c0_105] : memref<8x4x256xf32, #tpu.memory_space<vmem>>, vector<1x4x256xf32>
    %340 = vector.shape_cast %339 : vector<1x4x256xf32> to vector<4x256xf32>
    %c5_106 = arith.constant 5 : index
    %c0_107 = arith.constant 0 : index
    %c0_108 = arith.constant 0 : index
    %341 = vector.load %arg14[%c5_106, %c0_107, %c0_108] : memref<8x4x256xf32, #tpu.memory_space<vmem>>, vector<1x4x256xf32>
    %342 = vector.shape_cast %341 : vector<1x4x256xf32> to vector<4x256xf32>
    %343 = vector.shape_cast %11 : vector<1x256xi1> to vector<1x256xi1>
    %344 = vector.broadcast %343 : vector<1x256xi1> to vector<4x256xi1>
    %345 = arith.select %344, %340, %342 : vector<4x256xi1>, vector<4x256xf32>
    %cst_109 = arith.constant dense<0.000000e+00> : vector<4x256xf32>
    %346 = tpu.matmul %321, %21, %cst_109 {dimension_numbers = #tpu.dot_dimension_numbers<[1], [0], [0], [1], [0, 0, 1, 1], [], []>} : vector<4x64xf32>, vector<64x256xf32>, vector<4x256xf32> -> vector<4x256xf32>
    %347 = arith.addf %345, %346 : vector<4x256xf32>
    %348 = vector.extract_strided_slice %347 {offsets = [0, 0], sizes = [4, 64], strides = [1, 1]} : vector<4x256xf32> to vector<4x64xf32>
    %349 = arith.negf %348 : vector<4x64xf32>
    %350 = math.exp %349 : vector<4x64xf32>
    %cst_110 = arith.constant 1.000000e+00 : f32
    %351 = vector.broadcast %cst_110 : f32 to vector<4x64xf32>
    %352 = arith.addf %351, %350 : vector<4x64xf32>
    %353 = arith.divf %351, %352 : vector<4x64xf32>
    %354 = vector.extract_strided_slice %347 {offsets = [0, 64], sizes = [4, 64], strides = [1, 1]} : vector<4x256xf32> to vector<4x64xf32>
    %355 = arith.negf %354 : vector<4x64xf32>
    %356 = math.exp %355 : vector<4x64xf32>
    %cst_111 = arith.constant 1.000000e+00 : f32
    %357 = vector.broadcast %cst_111 : f32 to vector<4x64xf32>
    %358 = arith.addf %357, %356 : vector<4x64xf32>
    %359 = arith.divf %357, %358 : vector<4x64xf32>
    %360 = vector.extract_strided_slice %347 {offsets = [0, 128], sizes = [4, 64], strides = [1, 1]} : vector<4x256xf32> to vector<4x64xf32>
    %361 = math.tanh %360 : vector<4x64xf32>
    %362 = vector.extract_strided_slice %347 {offsets = [0, 192], sizes = [4, 64], strides = [1, 1]} : vector<4x256xf32> to vector<4x64xf32>
    %363 = arith.negf %362 : vector<4x64xf32>
    %364 = math.exp %363 : vector<4x64xf32>
    %cst_112 = arith.constant 1.000000e+00 : f32
    %365 = vector.broadcast %cst_112 : f32 to vector<4x64xf32>
    %366 = arith.addf %365, %364 : vector<4x64xf32>
    %367 = arith.divf %365, %366 : vector<4x64xf32>
    %368 = arith.mulf %359, %322 : vector<4x64xf32>
    %369 = arith.mulf %353, %361 : vector<4x64xf32>
    %370 = arith.addf %368, %369 : vector<4x64xf32>
    %371 = math.tanh %370 : vector<4x64xf32>
    %372 = arith.mulf %367, %371 : vector<4x64xf32>
    %c5_i32_113 = arith.constant 5 : i32
    %373 = vector.broadcast %c5_i32_113 : i32 to vector<4x1xi32>
    %374 = arith.cmpi sgt, %0, %373 : vector<4x1xi32>
    %c2_i32_114 = arith.constant 2 : i32
    %375 = vector.broadcast %c2_i32_114 : i32 to vector<4x1xi32>
    %376 = arith.cmpi sgt, %0, %375 : vector<4x1xi32>
    %377 = vector.broadcast %6 : vector<1x64xi1> to vector<4x64xi1>
    %378 = vector.broadcast %374 : vector<4x1xi1> to vector<4x64xi1>
    %379 = arith.andi %377, %378 : vector<4x64xi1>
    %380 = vector.broadcast %8 : vector<1x64xi1> to vector<4x64xi1>
    %381 = vector.broadcast %376 : vector<4x1xi1> to vector<4x64xi1>
    %382 = arith.andi %380, %381 : vector<4x64xi1>
    %383 = arith.ori %379, %382 : vector<4x64xi1>
    %384 = arith.select %383, %372, %321 : vector<4x64xi1>, vector<4x64xf32>
    %385 = arith.select %383, %370, %322 : vector<4x64xi1>, vector<4x64xf32>
    %386 = vector.extract_strided_slice %372 {offsets = [0, 0], sizes = [4, 32], strides = [1, 1]} : vector<4x64xf32> to vector<4x32xf32>
    %cst_115 = arith.constant 0.000000e+00 : f32
    %387 = vector.shape_cast %374 : vector<4x1xi1> to vector<4x1xi1>
    %388 = vector.broadcast %387 : vector<4x1xi1> to vector<4x32xi1>
    %389 = vector.broadcast %cst_115 : f32 to vector<4x32xf32>
    %390 = arith.select %388, %386, %389 : vector<4x32xi1>, vector<4x32xf32>
    %c5_116 = arith.constant 5 : index
    %c0_117 = arith.constant 0 : index
    %c0_118 = arith.constant 0 : index
    %391 = vector.load %arg15[%c5_116, %c0_117, %c0_118] : memref<8x4x32xf32, #tpu.memory_space<vmem>>, vector<1x4x32xf32>
    %392 = vector.shape_cast %391 : vector<1x4x32xf32> to vector<4x32xf32>
    %393 = vector.shape_cast %390 : vector<4x32xf32> to vector<1x4x32xf32>
    tpu.vector_store %arg15[%c5_116, %c0_117, %c0_118], %393 {strides = array<i32>} : memref<8x4x32xf32, #tpu.memory_space<vmem>>, vector<1x4x32xf32>,
    %394 = vector.extract_strided_slice %372 {offsets = [0, 32], sizes = [4, 32], strides = [1, 1]} : vector<4x64xf32> to vector<4x32xf32>
    %cst_119 = arith.constant 0.000000e+00 : f32
    %395 = vector.shape_cast %376 : vector<4x1xi1> to vector<4x1xi1>
    %396 = vector.broadcast %395 : vector<4x1xi1> to vector<4x32xi1>
    %397 = vector.broadcast %cst_119 : f32 to vector<4x32xf32>
    %398 = arith.select %396, %394, %397 : vector<4x32xi1>, vector<4x32xf32>
    %c2_120 = arith.constant 2 : index
    %c0_121 = arith.constant 0 : index
    %c0_122 = arith.constant 0 : index
    %399 = vector.load %arg16[%c2_120, %c0_121, %c0_122] : memref<8x4x32xf32, #tpu.memory_space<vmem>>, vector<1x4x32xf32>
    %400 = vector.shape_cast %399 : vector<1x4x32xf32> to vector<4x32xf32>
    %401 = vector.shape_cast %398 : vector<4x32xf32> to vector<1x4x32xf32>
    tpu.vector_store %arg16[%c2_120, %c0_121, %c0_122], %401 {strides = array<i32>} : memref<8x4x32xf32, #tpu.memory_space<vmem>>, vector<1x4x32xf32>,
    %c1_123 = arith.constant 1 : index
    %c0_124 = arith.constant 0 : index
    %c0_125 = arith.constant 0 : index
    %402 = vector.load %arg14[%c1_123, %c0_124, %c0_125] : memref<8x4x256xf32, #tpu.memory_space<vmem>>, vector<1x4x256xf32>
    %403 = vector.shape_cast %402 : vector<1x4x256xf32> to vector<4x256xf32>
    %c6_126 = arith.constant 6 : index
    %c0_127 = arith.constant 0 : index
    %c0_128 = arith.constant 0 : index
    %404 = vector.load %arg14[%c6_126, %c0_127, %c0_128] : memref<8x4x256xf32, #tpu.memory_space<vmem>>, vector<1x4x256xf32>
    %405 = vector.shape_cast %404 : vector<1x4x256xf32> to vector<4x256xf32>
    %406 = vector.shape_cast %11 : vector<1x256xi1> to vector<1x256xi1>
    %407 = vector.broadcast %406 : vector<1x256xi1> to vector<4x256xi1>
    %408 = arith.select %407, %403, %405 : vector<4x256xi1>, vector<4x256xf32>
    %cst_129 = arith.constant dense<0.000000e+00> : vector<4x256xf32>
    %409 = tpu.matmul %384, %21, %cst_129 {dimension_numbers = #tpu.dot_dimension_numbers<[1], [0], [0], [1], [0, 0, 1, 1], [], []>} : vector<4x64xf32>, vector<64x256xf32>, vector<4x256xf32> -> vector<4x256xf32>
    %410 = arith.addf %408, %409 : vector<4x256xf32>
    %411 = vector.extract_strided_slice %410 {offsets = [0, 0], sizes = [4, 64], strides = [1, 1]} : vector<4x256xf32> to vector<4x64xf32>
    %412 = arith.negf %411 : vector<4x64xf32>
    %413 = math.exp %412 : vector<4x64xf32>
    %cst_130 = arith.constant 1.000000e+00 : f32
    %414 = vector.broadcast %cst_130 : f32 to vector<4x64xf32>
    %415 = arith.addf %414, %413 : vector<4x64xf32>
    %416 = arith.divf %414, %415 : vector<4x64xf32>
    %417 = vector.extract_strided_slice %410 {offsets = [0, 64], sizes = [4, 64], strides = [1, 1]} : vector<4x256xf32> to vector<4x64xf32>
    %418 = arith.negf %417 : vector<4x64xf32>
    %419 = math.exp %418 : vector<4x64xf32>
    %cst_131 = arith.constant 1.000000e+00 : f32
    %420 = vector.broadcast %cst_131 : f32 to vector<4x64xf32>
    %421 = arith.addf %420, %419 : vector<4x64xf32>
    %422 = arith.divf %420, %421 : vector<4x64xf32>
    %423 = vector.extract_strided_slice %410 {offsets = [0, 128], sizes = [4, 64], strides = [1, 1]} : vector<4x256xf32> to vector<4x64xf32>
    %424 = math.tanh %423 : vector<4x64xf32>
    %425 = vector.extract_strided_slice %410 {offsets = [0, 192], sizes = [4, 64], strides = [1, 1]} : vector<4x256xf32> to vector<4x64xf32>
    %426 = arith.negf %425 : vector<4x64xf32>
    %427 = math.exp %426 : vector<4x64xf32>
    %cst_132 = arith.constant 1.000000e+00 : f32
    %428 = vector.broadcast %cst_132 : f32 to vector<4x64xf32>
    %429 = arith.addf %428, %427 : vector<4x64xf32>
    %430 = arith.divf %428, %429 : vector<4x64xf32>
    %431 = arith.mulf %422, %385 : vector<4x64xf32>
    %432 = arith.mulf %416, %424 : vector<4x64xf32>
    %433 = arith.addf %431, %432 : vector<4x64xf32>
    %434 = math.tanh %433 : vector<4x64xf32>
    %435 = arith.mulf %430, %434 : vector<4x64xf32>
    %c6_i32_133 = arith.constant 6 : i32
    %436 = vector.broadcast %c6_i32_133 : i32 to vector<4x1xi32>
    %437 = arith.cmpi sgt, %0, %436 : vector<4x1xi32>
    %c1_i32_134 = arith.constant 1 : i32
    %438 = vector.broadcast %c1_i32_134 : i32 to vector<4x1xi32>
    %439 = arith.cmpi sgt, %0, %438 : vector<4x1xi32>
    %440 = vector.broadcast %6 : vector<1x64xi1> to vector<4x64xi1>
    %441 = vector.broadcast %437 : vector<4x1xi1> to vector<4x64xi1>
    %442 = arith.andi %440, %441 : vector<4x64xi1>
    %443 = vector.broadcast %8 : vector<1x64xi1> to vector<4x64xi1>
    %444 = vector.broadcast %439 : vector<4x1xi1> to vector<4x64xi1>
    %445 = arith.andi %443, %444 : vector<4x64xi1>
    %446 = arith.ori %442, %445 : vector<4x64xi1>
    %447 = arith.select %446, %435, %384 : vector<4x64xi1>, vector<4x64xf32>
    %448 = arith.select %446, %433, %385 : vector<4x64xi1>, vector<4x64xf32>
    %449 = vector.extract_strided_slice %435 {offsets = [0, 0], sizes = [4, 32], strides = [1, 1]} : vector<4x64xf32> to vector<4x32xf32>
    %cst_135 = arith.constant 0.000000e+00 : f32
    %450 = vector.shape_cast %437 : vector<4x1xi1> to vector<4x1xi1>
    %451 = vector.broadcast %450 : vector<4x1xi1> to vector<4x32xi1>
    %452 = vector.broadcast %cst_135 : f32 to vector<4x32xf32>
    %453 = arith.select %451, %449, %452 : vector<4x32xi1>, vector<4x32xf32>
    %c6_136 = arith.constant 6 : index
    %c0_137 = arith.constant 0 : index
    %c0_138 = arith.constant 0 : index
    %454 = vector.load %arg15[%c6_136, %c0_137, %c0_138] : memref<8x4x32xf32, #tpu.memory_space<vmem>>, vector<1x4x32xf32>
    %455 = vector.shape_cast %454 : vector<1x4x32xf32> to vector<4x32xf32>
    %456 = vector.shape_cast %453 : vector<4x32xf32> to vector<1x4x32xf32>
    tpu.vector_store %arg15[%c6_136, %c0_137, %c0_138], %456 {strides = array<i32>} : memref<8x4x32xf32, #tpu.memory_space<vmem>>, vector<1x4x32xf32>,
    %457 = vector.extract_strided_slice %435 {offsets = [0, 32], sizes = [4, 32], strides = [1, 1]} : vector<4x64xf32> to vector<4x32xf32>
    %cst_139 = arith.constant 0.000000e+00 : f32
    %458 = vector.shape_cast %439 : vector<4x1xi1> to vector<4x1xi1>
    %459 = vector.broadcast %458 : vector<4x1xi1> to vector<4x32xi1>
    %460 = vector.broadcast %cst_139 : f32 to vector<4x32xf32>
    %461 = arith.select %459, %457, %460 : vector<4x32xi1>, vector<4x32xf32>
    %c1_140 = arith.constant 1 : index
    %c0_141 = arith.constant 0 : index
    %c0_142 = arith.constant 0 : index
    %462 = vector.load %arg16[%c1_140, %c0_141, %c0_142] : memref<8x4x32xf32, #tpu.memory_space<vmem>>, vector<1x4x32xf32>
    %463 = vector.shape_cast %462 : vector<1x4x32xf32> to vector<4x32xf32>
    %464 = vector.shape_cast %461 : vector<4x32xf32> to vector<1x4x32xf32>
    tpu.vector_store %arg16[%c1_140, %c0_141, %c0_142], %464 {strides = array<i32>} : memref<8x4x32xf32, #tpu.memory_space<vmem>>, vector<1x4x32xf32>,
    %c0_143 = arith.constant 0 : index
    %c0_144 = arith.constant 0 : index
    %c0_145 = arith.constant 0 : index
    %465 = vector.load %arg14[%c0_143, %c0_144, %c0_145] : memref<8x4x256xf32, #tpu.memory_space<vmem>>, vector<1x4x256xf32>
    %466 = vector.shape_cast %465 : vector<1x4x256xf32> to vector<4x256xf32>
    %c7_146 = arith.constant 7 : index
    %c0_147 = arith.constant 0 : index
    %c0_148 = arith.constant 0 : index
    %467 = vector.load %arg14[%c7_146, %c0_147, %c0_148] : memref<8x4x256xf32, #tpu.memory_space<vmem>>, vector<1x4x256xf32>
    %468 = vector.shape_cast %467 : vector<1x4x256xf32> to vector<4x256xf32>
    %469 = vector.shape_cast %11 : vector<1x256xi1> to vector<1x256xi1>
    %470 = vector.broadcast %469 : vector<1x256xi1> to vector<4x256xi1>
    %471 = arith.select %470, %466, %468 : vector<4x256xi1>, vector<4x256xf32>
    %cst_149 = arith.constant dense<0.000000e+00> : vector<4x256xf32>
    %472 = tpu.matmul %447, %21, %cst_149 {dimension_numbers = #tpu.dot_dimension_numbers<[1], [0], [0], [1], [0, 0, 1, 1], [], []>} : vector<4x64xf32>, vector<64x256xf32>, vector<4x256xf32> -> vector<4x256xf32>
    %473 = arith.addf %471, %472 : vector<4x256xf32>
    %474 = vector.extract_strided_slice %473 {offsets = [0, 0], sizes = [4, 64], strides = [1, 1]} : vector<4x256xf32> to vector<4x64xf32>
    %475 = arith.negf %474 : vector<4x64xf32>
    %476 = math.exp %475 : vector<4x64xf32>
    %cst_150 = arith.constant 1.000000e+00 : f32
    %477 = vector.broadcast %cst_150 : f32 to vector<4x64xf32>
    %478 = arith.addf %477, %476 : vector<4x64xf32>
    %479 = arith.divf %477, %478 : vector<4x64xf32>
    %480 = vector.extract_strided_slice %473 {offsets = [0, 64], sizes = [4, 64], strides = [1, 1]} : vector<4x256xf32> to vector<4x64xf32>
    %481 = arith.negf %480 : vector<4x64xf32>
    %482 = math.exp %481 : vector<4x64xf32>
    %cst_151 = arith.constant 1.000000e+00 : f32
    %483 = vector.broadcast %cst_151 : f32 to vector<4x64xf32>
    %484 = arith.addf %483, %482 : vector<4x64xf32>
    %485 = arith.divf %483, %484 : vector<4x64xf32>
    %486 = vector.extract_strided_slice %473 {offsets = [0, 128], sizes = [4, 64], strides = [1, 1]} : vector<4x256xf32> to vector<4x64xf32>
    %487 = math.tanh %486 : vector<4x64xf32>
    %488 = vector.extract_strided_slice %473 {offsets = [0, 192], sizes = [4, 64], strides = [1, 1]} : vector<4x256xf32> to vector<4x64xf32>
    %489 = arith.negf %488 : vector<4x64xf32>
    %490 = math.exp %489 : vector<4x64xf32>
    %cst_152 = arith.constant 1.000000e+00 : f32
    %491 = vector.broadcast %cst_152 : f32 to vector<4x64xf32>
    %492 = arith.addf %491, %490 : vector<4x64xf32>
    %493 = arith.divf %491, %492 : vector<4x64xf32>
    %494 = arith.mulf %485, %448 : vector<4x64xf32>
    %495 = arith.mulf %479, %487 : vector<4x64xf32>
    %496 = arith.addf %494, %495 : vector<4x64xf32>
    %497 = math.tanh %496 : vector<4x64xf32>
    %498 = arith.mulf %493, %497 : vector<4x64xf32>
    %c7_i32_153 = arith.constant 7 : i32
    %499 = vector.broadcast %c7_i32_153 : i32 to vector<4x1xi32>
    %500 = arith.cmpi sgt, %0, %499 : vector<4x1xi32>
    %c0_i32_154 = arith.constant 0 : i32
    %501 = vector.broadcast %c0_i32_154 : i32 to vector<4x1xi32>
    %502 = arith.cmpi sgt, %0, %501 : vector<4x1xi32>
    %503 = vector.extract_strided_slice %498 {offsets = [0, 0], sizes = [4, 32], strides = [1, 1]} : vector<4x64xf32> to vector<4x32xf32>
    %cst_155 = arith.constant 0.000000e+00 : f32
    %504 = vector.shape_cast %500 : vector<4x1xi1> to vector<4x1xi1>
    %505 = vector.broadcast %504 : vector<4x1xi1> to vector<4x32xi1>
    %506 = vector.broadcast %cst_155 : f32 to vector<4x32xf32>
    %507 = arith.select %505, %503, %506 : vector<4x32xi1>, vector<4x32xf32>
    %c7_156 = arith.constant 7 : index
    %c0_157 = arith.constant 0 : index
    %c0_158 = arith.constant 0 : index
    %508 = vector.load %arg15[%c7_156, %c0_157, %c0_158] : memref<8x4x32xf32, #tpu.memory_space<vmem>>, vector<1x4x32xf32>
    %509 = vector.shape_cast %508 : vector<1x4x32xf32> to vector<4x32xf32>
    %510 = vector.shape_cast %507 : vector<4x32xf32> to vector<1x4x32xf32>
    tpu.vector_store %arg15[%c7_156, %c0_157, %c0_158], %510 {strides = array<i32>} : memref<8x4x32xf32, #tpu.memory_space<vmem>>, vector<1x4x32xf32>,
    %511 = vector.extract_strided_slice %498 {offsets = [0, 32], sizes = [4, 32], strides = [1, 1]} : vector<4x64xf32> to vector<4x32xf32>
    %cst_159 = arith.constant 0.000000e+00 : f32
    %512 = vector.shape_cast %502 : vector<4x1xi1> to vector<4x1xi1>
    %513 = vector.broadcast %512 : vector<4x1xi1> to vector<4x32xi1>
    %514 = vector.broadcast %cst_159 : f32 to vector<4x32xf32>
    %515 = arith.select %513, %511, %514 : vector<4x32xi1>, vector<4x32xf32>
    %c0_160 = arith.constant 0 : index
    %c0_161 = arith.constant 0 : index
    %c0_162 = arith.constant 0 : index
    %516 = vector.load %arg16[%c0_160, %c0_161, %c0_162] : memref<8x4x32xf32, #tpu.memory_space<vmem>>, vector<1x4x32xf32>
    %517 = vector.shape_cast %516 : vector<1x4x32xf32> to vector<4x32xf32>
    %518 = vector.shape_cast %515 : vector<4x32xf32> to vector<1x4x32xf32>
    tpu.vector_store %arg16[%c0_160, %c0_161, %c0_162], %518 {strides = array<i32>} : memref<8x4x32xf32, #tpu.memory_space<vmem>>, vector<1x4x32xf32>,
    %c0_163 = arith.constant 0 : index
    %c0_164 = arith.constant 0 : index
    %c0_165 = arith.constant 0 : index
    %519 = vector.load %arg15[%c0_163, %c0_164, %c0_165] : memref<8x4x32xf32, #tpu.memory_space<vmem>>, vector<8x4x32xf32>
    %c0_166 = arith.constant 0 : index
    %c0_167 = arith.constant 0 : index
    %c0_168 = arith.constant 0 : index
    %520 = vector.load %arg16[%c0_166, %c0_167, %c0_168] : memref<8x4x32xf32, #tpu.memory_space<vmem>>, vector<8x4x32xf32>
    %521 = tpu.concatenate %519, %520 in 2 : vector<8x4x32xf32>, vector<8x4x32xf32> -> vector<8x4x64xf32>
    %522 = vector.shape_cast %521 : vector<8x4x64xf32> to vector<32x64xf32>
    %c0_169 = arith.constant 0 : index
    %c0_170 = arith.constant 0 : index
    %523 = vector.load %arg6[%c0_169, %c0_170] : memref<64x8xf32, #tpu.memory_space<vmem>>, vector<64x8xf32>
    %cst_171 = arith.constant dense<0.000000e+00> : vector<32x8xf32>
    %524 = tpu.matmul %522, %523, %cst_171 {dimension_numbers = #tpu.dot_dimension_numbers<[1], [0], [0], [1], [0, 0, 1, 1], [], []>} : vector<32x64xf32>, vector<64x8xf32>, vector<32x8xf32> -> vector<32x8xf32>
    %525 = math.tanh %524 : vector<32x8xf32>
    %c0_172 = arith.constant 0 : index
    %c0_173 = arith.constant 0 : index
    %526 = vector.load %arg7[%c0_172, %c0_173] : memref<8x4xf32, #tpu.memory_space<vmem>>, vector<8x4xf32>
    %cst_174 = arith.constant dense<0.000000e+00> : vector<32x4xf32>
    %527 = tpu.matmul %525, %526, %cst_174 {dimension_numbers = #tpu.dot_dimension_numbers<[1], [0], [0], [1], [0, 0, 1, 1], [], []>} : vector<32x8xf32>, vector<8x4xf32>, vector<32x4xf32> -> vector<32x4xf32>
    %528 = vector.shape_cast %527 : vector<32x4xf32> to vector<8x4x4xf32>
    %cst_175 = arith.constant dense<0xFF800000> : vector<4x4xf32>
    %529 = vector.multi_reduction <maximumf>, %528, %cst_175 [0] : vector<8x4x4xf32> to vector<4x4xf32>
    %530 = vector.shape_cast %529 : vector<4x4xf32> to vector<1x4x4xf32>
    %531 = vector.broadcast %530 : vector<1x4x4xf32> to vector<8x4x4xf32>
    %532 = arith.subf %528, %531 : vector<8x4x4xf32>
    %533 = math.exp %532 : vector<8x4x4xf32>
    %cst_176 = arith.constant dense<0.000000e+00> : vector<4x4xf32>
    %534 = vector.multi_reduction <add>, %533, %cst_176 [0] : vector<8x4x4xf32> to vector<4x4xf32>
    %535 = vector.shape_cast %534 : vector<4x4xf32> to vector<1x4x4xf32>
    %536 = vector.broadcast %535 : vector<1x4x4xf32> to vector<8x4x4xf32>
    %537 = arith.divf %533, %536 : vector<8x4x4xf32>
    %538 = tpu.concatenate %521, %537 in 2 : vector<8x4x64xf32>, vector<8x4x4xf32> -> vector<8x4x68xf32>
    %c0_177 = arith.constant 0 : index
    %c0_178 = arith.constant 0 : index
    %539 = vector.load %arg8[%c0_177, %c0_178] : memref<256x32xf32, #tpu.memory_space<vmem>>, vector<256x32xf32>
    %c0_179 = arith.constant 0 : index
    %c0_180 = arith.constant 0 : index
    %540 = vector.load %arg9[%c0_179, %c0_180] : memref<1x32xf32, #tpu.memory_space<vmem>>, vector<1x32xf32>
    %cst_181 = arith.constant 0.000000e+00 : f32
    %541 = vector.broadcast %cst_181 : f32 to vector<4x1xf32>
    %542 = vector.extract_strided_slice %537 {offsets = [0, 0, 0], sizes = [8, 4, 1], strides = [1, 1, 1]} : vector<8x4x4xf32> to vector<8x4x1xf32>
    %543 = vector.broadcast %542 : vector<8x4x1xf32> to vector<8x4x68xf32>
    %544 = arith.mulf %543, %538 : vector<8x4x68xf32>
    %cst_182 = arith.constant dense<0.000000e+00> : vector<4x68xf32>
    %545 = vector.multi_reduction <add>, %544, %cst_182 [0] : vector<8x4x68xf32> to vector<4x68xf32>
    %546 = vector.extract_strided_slice %545 {offsets = [0, 0], sizes = [4, 64], strides = [1, 1]} : vector<4x68xf32> to vector<4x64xf32>
    %547 = vector.extract_strided_slice %545 {offsets = [0, 64], sizes = [4, 4], strides = [1, 1]} : vector<4x68xf32> to vector<4x4xf32>
    %548 = vector.extract_strided_slice %539 {offsets = [0, 0], sizes = [64, 32], strides = [1, 1]} : vector<256x32xf32> to vector<64x32xf32>
    %cst_183 = arith.constant dense<0.000000e+00> : vector<4x32xf32>
    %549 = tpu.matmul %546, %548, %cst_183 {dimension_numbers = #tpu.dot_dimension_numbers<[1], [0], [0], [1], [0, 0, 1, 1], [], []>} : vector<4x64xf32>, vector<64x32xf32>, vector<4x32xf32> -> vector<4x32xf32>
    %550 = vector.broadcast %540 : vector<1x32xf32> to vector<4x32xf32>
    %551 = arith.addf %550, %549 : vector<4x32xf32>
    %552 = tpu.iota {dimensions = array<i32: 1>} : vector<1x4xi32>
    %c0_i32_184 = arith.constant 0 : i32
    %553 = vector.broadcast %c0_i32_184 : i32 to vector<1x4xi32>
    %554 = arith.cmpi eq, %552, %553 : vector<1x4xi32>
    %555 = arith.extui %554 : vector<1x4xi1> to vector<1x4xi32>
    %556 = arith.sitofp %555 : vector<1x4xi32> to vector<1x4xf32>
    %557 = vector.broadcast %556 : vector<1x4xf32> to vector<4x4xf32>
    %558 = arith.subf %547, %557 : vector<4x4xf32>
    %559 = arith.mulf %558, %558 : vector<4x4xf32>
    %cst_185 = arith.constant dense<0.000000e+00> : vector<4xf32>
    %560 = vector.multi_reduction <add>, %559, %cst_185 [1] : vector<4x4xf32> to vector<4xf32>
    %561 = vector.shape_cast %560 : vector<4xf32> to vector<4x1xf32>
    %562 = arith.addf %541, %561 : vector<4x1xf32>
    %563 = vector.extract_strided_slice %537 {offsets = [0, 0, 1], sizes = [8, 4, 1], strides = [1, 1, 1]} : vector<8x4x4xf32> to vector<8x4x1xf32>
    %564 = vector.broadcast %563 : vector<8x4x1xf32> to vector<8x4x68xf32>
    %565 = arith.mulf %564, %538 : vector<8x4x68xf32>
    %cst_186 = arith.constant dense<0.000000e+00> : vector<4x68xf32>
    %566 = vector.multi_reduction <add>, %565, %cst_186 [0] : vector<8x4x68xf32> to vector<4x68xf32>
    %567 = vector.extract_strided_slice %566 {offsets = [0, 0], sizes = [4, 64], strides = [1, 1]} : vector<4x68xf32> to vector<4x64xf32>
    %568 = vector.extract_strided_slice %566 {offsets = [0, 64], sizes = [4, 4], strides = [1, 1]} : vector<4x68xf32> to vector<4x4xf32>
    %569 = vector.extract_strided_slice %539 {offsets = [64, 0], sizes = [64, 32], strides = [1, 1]} : vector<256x32xf32> to vector<64x32xf32>
    %cst_187 = arith.constant dense<0.000000e+00> : vector<4x32xf32>
    %570 = tpu.matmul %567, %569, %cst_187 {dimension_numbers = #tpu.dot_dimension_numbers<[1], [0], [0], [1], [0, 0, 1, 1], [], []>} : vector<4x64xf32>, vector<64x32xf32>, vector<4x32xf32> -> vector<4x32xf32>
    %571 = arith.addf %551, %570 : vector<4x32xf32>
    %572 = tpu.iota {dimensions = array<i32: 1>} : vector<1x4xi32>
    %c1_i32_188 = arith.constant 1 : i32
    %573 = vector.broadcast %c1_i32_188 : i32 to vector<1x4xi32>
    %574 = arith.cmpi eq, %572, %573 : vector<1x4xi32>
    %575 = arith.extui %574 : vector<1x4xi1> to vector<1x4xi32>
    %576 = arith.sitofp %575 : vector<1x4xi32> to vector<1x4xf32>
    %577 = vector.broadcast %576 : vector<1x4xf32> to vector<4x4xf32>
    %578 = arith.subf %568, %577 : vector<4x4xf32>
    %579 = arith.mulf %578, %578 : vector<4x4xf32>
    %cst_189 = arith.constant dense<0.000000e+00> : vector<4xf32>
    %580 = vector.multi_reduction <add>, %579, %cst_189 [1] : vector<4x4xf32> to vector<4xf32>
    %581 = vector.shape_cast %580 : vector<4xf32> to vector<4x1xf32>
    %582 = arith.addf %562, %581 : vector<4x1xf32>
    %583 = vector.extract_strided_slice %537 {offsets = [0, 0, 2], sizes = [8, 4, 1], strides = [1, 1, 1]} : vector<8x4x4xf32> to vector<8x4x1xf32>
    %584 = vector.broadcast %583 : vector<8x4x1xf32> to vector<8x4x68xf32>
    %585 = arith.mulf %584, %538 : vector<8x4x68xf32>
    %cst_190 = arith.constant dense<0.000000e+00> : vector<4x68xf32>
    %586 = vector.multi_reduction <add>, %585, %cst_190 [0] : vector<8x4x68xf32> to vector<4x68xf32>
    %587 = vector.extract_strided_slice %586 {offsets = [0, 0], sizes = [4, 64], strides = [1, 1]} : vector<4x68xf32> to vector<4x64xf32>
    %588 = vector.extract_strided_slice %586 {offsets = [0, 64], sizes = [4, 4], strides = [1, 1]} : vector<4x68xf32> to vector<4x4xf32>
    %589 = vector.extract_strided_slice %539 {offsets = [128, 0], sizes = [64, 32], strides = [1, 1]} : vector<256x32xf32> to vector<64x32xf32>
    %cst_191 = arith.constant dense<0.000000e+00> : vector<4x32xf32>
    %590 = tpu.matmul %587, %589, %cst_191 {dimension_numbers = #tpu.dot_dimension_numbers<[1], [0], [0], [1], [0, 0, 1, 1], [], []>} : vector<4x64xf32>, vector<64x32xf32>, vector<4x32xf32> -> vector<4x32xf32>
    %591 = arith.addf %571, %590 : vector<4x32xf32>
    %592 = tpu.iota {dimensions = array<i32: 1>} : vector<1x4xi32>
    %c2_i32_192 = arith.constant 2 : i32
    %593 = vector.broadcast %c2_i32_192 : i32 to vector<1x4xi32>
    %594 = arith.cmpi eq, %592, %593 : vector<1x4xi32>
    %595 = arith.extui %594 : vector<1x4xi1> to vector<1x4xi32>
    %596 = arith.sitofp %595 : vector<1x4xi32> to vector<1x4xf32>
    %597 = vector.broadcast %596 : vector<1x4xf32> to vector<4x4xf32>
    %598 = arith.subf %588, %597 : vector<4x4xf32>
    %599 = arith.mulf %598, %598 : vector<4x4xf32>
    %cst_193 = arith.constant dense<0.000000e+00> : vector<4xf32>
    %600 = vector.multi_reduction <add>, %599, %cst_193 [1] : vector<4x4xf32> to vector<4xf32>
    %601 = vector.shape_cast %600 : vector<4xf32> to vector<4x1xf32>
    %602 = arith.addf %582, %601 : vector<4x1xf32>
    %603 = vector.extract_strided_slice %537 {offsets = [0, 0, 3], sizes = [8, 4, 1], strides = [1, 1, 1]} : vector<8x4x4xf32> to vector<8x4x1xf32>
    %604 = vector.broadcast %603 : vector<8x4x1xf32> to vector<8x4x68xf32>
    %605 = arith.mulf %604, %538 : vector<8x4x68xf32>
    %cst_194 = arith.constant dense<0.000000e+00> : vector<4x68xf32>
    %606 = vector.multi_reduction <add>, %605, %cst_194 [0] : vector<8x4x68xf32> to vector<4x68xf32>
    %607 = vector.extract_strided_slice %606 {offsets = [0, 0], sizes = [4, 64], strides = [1, 1]} : vector<4x68xf32> to vector<4x64xf32>
    %608 = vector.extract_strided_slice %606 {offsets = [0, 64], sizes = [4, 4], strides = [1, 1]} : vector<4x68xf32> to vector<4x4xf32>
    %609 = vector.extract_strided_slice %539 {offsets = [192, 0], sizes = [64, 32], strides = [1, 1]} : vector<256x32xf32> to vector<64x32xf32>
    %cst_195 = arith.constant dense<0.000000e+00> : vector<4x32xf32>
    %610 = tpu.matmul %607, %609, %cst_195 {dimension_numbers = #tpu.dot_dimension_numbers<[1], [0], [0], [1], [0, 0, 1, 1], [], []>} : vector<4x64xf32>, vector<64x32xf32>, vector<4x32xf32> -> vector<4x32xf32>
    %611 = arith.addf %591, %610 : vector<4x32xf32>
    %612 = tpu.iota {dimensions = array<i32: 1>} : vector<1x4xi32>
    %c3_i32_196 = arith.constant 3 : i32
    %613 = vector.broadcast %c3_i32_196 : i32 to vector<1x4xi32>
    %614 = arith.cmpi eq, %612, %613 : vector<1x4xi32>
    %615 = arith.extui %614 : vector<1x4xi1> to vector<1x4xi32>
    %616 = arith.sitofp %615 : vector<1x4xi32> to vector<1x4xf32>
    %617 = vector.broadcast %616 : vector<1x4xf32> to vector<4x4xf32>
    %618 = arith.subf %608, %617 : vector<4x4xf32>
    %619 = arith.mulf %618, %618 : vector<4x4xf32>
    %cst_197 = arith.constant dense<0.000000e+00> : vector<4xf32>
    %620 = vector.multi_reduction <add>, %619, %cst_197 [1] : vector<4x4xf32> to vector<4xf32>
    %621 = vector.shape_cast %620 : vector<4xf32> to vector<4x1xf32>
    %622 = arith.addf %602, %621 : vector<4x1xf32>
    %cst_198 = arith.constant 0.000000e+00 : f32
    %623 = vector.broadcast %cst_198 : f32 to vector<4x32xf32>
    %624 = arith.maximumf %611, %623 : vector<4x32xf32>
    %c0_199 = arith.constant 0 : index
    %c0_200 = arith.constant 0 : index
    %625 = vector.load %arg10[%c0_199, %c0_200] : memref<32x5xf32, #tpu.memory_space<vmem>>, vector<32x5xf32>
    %cst_201 = arith.constant dense<0.000000e+00> : vector<4x5xf32>
    %626 = tpu.matmul %624, %625, %cst_201 {dimension_numbers = #tpu.dot_dimension_numbers<[1], [0], [0], [1], [0, 0, 1, 1], [], []>} : vector<4x32xf32>, vector<32x5xf32>, vector<4x5xf32> -> vector<4x5xf32>
    %c0_202 = arith.constant 0 : index
    %c0_203 = arith.constant 0 : index
    %627 = vector.load %arg11[%c0_202, %c0_203] : memref<1x5xf32, #tpu.memory_space<vmem>>, vector<1x5xf32>
    %628 = vector.broadcast %627 : vector<1x5xf32> to vector<4x5xf32>
    %629 = arith.addf %626, %628 : vector<4x5xf32>
    %c0_204 = arith.constant 0 : index
    %c0_205 = arith.constant 0 : index
    %630 = vector.load %arg12[%c0_204, %c0_205] : memref<4x5xf32, #tpu.memory_space<vmem>>, vector<4x5xf32>
    tpu.vector_store %arg12[%c0_204, %c0_205], %629 {strides = array<i32>} : memref<4x5xf32, #tpu.memory_space<vmem>>, vector<4x5xf32>,
    %cst_206 = arith.constant 1.000000e-10 : f32
    %631 = vector.broadcast %cst_206 : f32 to vector<4x1xf32>
    %632 = arith.addf %622, %631 : vector<4x1xf32>
    %633 = math.sqrt %632 : vector<4x1xf32>
    %c0_207 = arith.constant 0 : index
    %c0_208 = arith.constant 0 : index
    %634 = vector.load %arg13[%c0_207, %c0_208] : memref<4x1xf32, #tpu.memory_space<vmem>>, vector<4x1xf32>
    tpu.vector_store %arg13[%c0_207, %c0_208], %633 {strides = array<i32>} : memref<4x1xf32, #tpu.memory_space<vmem>>, vector<4x1xf32>,
    return
  }
  func.func @transform_0(%arg0: i32) -> (i32, i32, i32) {
    %c0_i32 = arith.constant 0 : i32
    %c0_i32_0 = arith.constant 0 : i32
    %c0_i32_1 = arith.constant 0 : i32
    return %c0_i32, %arg0, %c0_i32_0 : i32, i32, i32
  }
  func.func @transform_1(%arg0: i32) -> (i32, i32) {
    %c0_i32 = arith.constant 0 : i32
    %c0_i32_0 = arith.constant 0 : i32
    return %arg0, %c0_i32 : i32, i32
  }
  func.func @transform_2(%arg0: i32) -> (i32, i32) {
    %c0_i32 = arith.constant 0 : i32
    %c0_i32_0 = arith.constant 0 : i32
    %c0_i32_1 = arith.constant 0 : i32
    return %c0_i32, %c0_i32_0 : i32, i32
  }
  func.func @transform_3(%arg0: i32) -> (i32, i32) {
    %c0_i32 = arith.constant 0 : i32
    %c0_i32_0 = arith.constant 0 : i32
    %c0_i32_1 = arith.constant 0 : i32
    return %c0_i32, %c0_i32_0 : i32, i32
  }
  func.func @transform_4(%arg0: i32) -> (i32, i32) {
    %c0_i32 = arith.constant 0 : i32
    %c0_i32_0 = arith.constant 0 : i32
    %c0_i32_1 = arith.constant 0 : i32
    return %c0_i32, %c0_i32_0 : i32, i32
  }
  func.func @transform_5(%arg0: i32) -> (i32, i32) {
    %c0_i32 = arith.constant 0 : i32
    %c0_i32_0 = arith.constant 0 : i32
    %c0_i32_1 = arith.constant 0 : i32
    return %c0_i32, %c0_i32_0 : i32, i32
  }
  func.func @transform_6(%arg0: i32) -> (i32, i32) {
    %c0_i32 = arith.constant 0 : i32
    %c0_i32_0 = arith.constant 0 : i32
    %c0_i32_1 = arith.constant 0 : i32
    return %c0_i32, %c0_i32_0 : i32, i32
  }
  func.func @transform_7(%arg0: i32) -> (i32, i32) {
    %c0_i32 = arith.constant 0 : i32
    %c0_i32_0 = arith.constant 0 : i32
    %c0_i32_1 = arith.constant 0 : i32
    return %c0_i32, %c0_i32_0 : i32, i32
  }
  func.func @transform_8(%arg0: i32) -> (i32, i32) {
    %c0_i32 = arith.constant 0 : i32
    %c0_i32_0 = arith.constant 0 : i32
    %c0_i32_1 = arith.constant 0 : i32
    return %c0_i32, %c0_i32_0 : i32, i32
  }
  func.func @transform_9(%arg0: i32) -> (i32, i32) {
    %c0_i32 = arith.constant 0 : i32
    %c0_i32_0 = arith.constant 0 : i32
    %c0_i32_1 = arith.constant 0 : i32
    return %c0_i32, %c0_i32_0 : i32, i32
  }
  func.func @transform_10(%arg0: i32) -> (i32, i32) {
    %c0_i32 = arith.constant 0 : i32
    %c0_i32_0 = arith.constant 0 : i32
    %c0_i32_1 = arith.constant 0 : i32
    return %c0_i32, %c0_i32_0 : i32, i32
  }
  func.func @transform_11(%arg0: i32) -> (i32, i32) {
    %c0_i32 = arith.constant 0 : i32
    %c0_i32_0 = arith.constant 0 : i32
    return %arg0, %c0_i32 : i32, i32
  }
  func.func @transform_12(%arg0: i32) -> (i32, i32) {
    %c0_i32 = arith.constant 0 : i32
    %c0_i32_0 = arith.constant 0 : i32
    return %arg0, %c0_i32 : i32, i32
  }
}

</mosaic_0001>

<bundles_post_ra>
// kernel: tpu_custom_call.1
= control target key start
LH: loop header
LB: loop body
LE: loop exit
PB: predicated region body
PF: predicated region fallthrough
CT: control target
= control target key end

     0   :  { %v42_v3 = vlaneseq  ;;  %v3159_v5 = vmov 0.0   ;;  %vm89_vm0 = vcmask 130048   ;;  %v3160_v15 = vmov 0   ;;  %s3161_s30 = smov 64   ;;  %s4338_s0 = inlined_call_operand.vmem [shape: f32[8,4,16], index: 0, kind: input, shape index: {}]   ;;  %s4339_s1 = inlined_call_operand.vmem [shape: s32[4,1], index: 1, kind: input, shape index: {}]   ;;  %s4340_s2 = inlined_call_operand.vmem [shape: f32[16,256], index: 2, kind: input, shape index: {}]   ;;  %s4341_s3 = inlined_call_operand.vmem [shape: f32[64,256], index: 3, kind: input, shape index: {}]   ;;  %s4342_s4 = inlined_call_operand.vmem [shape: f32[1,256], index: 4, kind: input, shape index: {}]   ;;  %s4343_s5 = inlined_call_operand.vmem [shape: f32[64,8], index: 5, kind: input, shape index: {}]   ;;  %s4344_s6 = inlined_call_operand.vmem [shape: f32[8,4], index: 6, kind: input, shape index: {}]   ;;  %s4345_s7 = inlined_call_operand.vmem [shape: f32[256,32], index: 7, kind: input, shape index: {}]   ;;  %s4346_s8 = inlined_call_operand.vmem [shape: f32[1,32], index: 8, kind: input, shape index: {}]   ;;  %s4347_s9 = inlined_call_operand.vmem [shape: f32[32,5], index: 9, kind: input, shape index: {}]   ;;  %s4348_s10 = inlined_call_operand.vmem [shape: f32[1,5], index: 10, kind: input, shape index: {}]   ;;  %s4349_s11 = inlined_call_operand.hbm [shape: f32[4,5], index: 11, kind: output, shape index: {0}]   ;;  %s4350_s12 = inlined_call_operand.vmem [shape: f32[4,1], index: 12, kind: output, shape index: {1}]  }
   0x1   :  { %v64_v0 = vld [vmem:[%s4340_s2 + $0x18] sm:$0xff]  ;;  %v63_v1 = vld [vmem:[%s4340_s2 + $0x10] sm:$0xff]  ;;  %v62_v2 = vld [vmem:[%s4340_s2 + $0x8] sm:$0xff]  ;;  %162 = vmatprep.mubr.f32.mxu0 %v3159_v5  ;;  %319 = vmatprep.mubr.f32.mxu1 %v3159_v5 }
   0x2   :  { %126 = vmatprep.subr.mxu0 %v64_v0  ;;  %v61_v4 = vld [vmem:[%s4340_s2] sm:$0xff]  ;;  %v3253_v7 = vld [vmem:[%s4341_s3 + $0x78] sm:$0xff]  ;;  %v3258_v8 = vld [vmem:[%s4341_s3 + $0x70] sm:$0xff]  ;;  %v3262_v9 = vand.u32 127, %v42_v3  ;;  %2988 = vset.pattern.permute.xlu1 %v3160_v15 }
   0x3   :  { %127 = vmatpush1.msra.mxu0 %v63_v1  ;;  %v3009_v6 = vld [vmem:[%s4338_s0] sm:$0xff]   ;;  %271 = vmatprep.subr.mxu1 %v3253_v7  ;;  %v3268_v10 = vld [vmem:[%s4341_s3 + $0x68] sm:$0xff]  ;;  %v3279_v12 = vld [vmem:[%s4341_s3 + $0x58] sm:$0xff] }
   0x4   :  { %128 = vmatprep.subr.mxu0 %v62_v2  ;;  %272 = vmatpush1.msra.mxu1 %v3258_v8  ;;  %v3274_v11 = vld [vmem:[%s4341_s3 + $0x60] sm:$0xff]  ;;  %vm44_vm1 = vcmp.lt.s32.totalorder %v3262_v9, 32  ;;  %v3010_v13 = vld [vmem:[%s4338_s0 + $0x8] sm:$0xff]   ;;  %v3290_v14 = vld [vmem:[%s4341_s3 + $0x50] sm:$0xff] }
   0x5   :  { %129 = vmatpush1.msra.mxu0 %v61_v4  ;;  %273 = vmatprep.subr.mxu1 %v3268_v10  ;;  %v3295_v16 = vsel %vm44_vm1, 1, %v3160_v15  ;;  %v3302_v17 = vld [vmem:[%s4341_s3 + $0x48] sm:$0xff]  ;;  %v3308_v18 = vld [vmem:[%s4341_s3 + $0x40] sm:$0xff]  ;;  %v3316_v19 = vld [vmem:[%s4341_s3 + $0x38] sm:$0xff] }
   0x6   :  { %2747 = vmatmul.mubr.msk.f32.vlgmr.msra.gmra.mxu0 %vm89_vm0, %v3009_v6  ;;  %274 = vmatpush1.msra.mxu1 %v3274_v11  ;;  %v3011_v20 = vld [vmem:[%s4338_s0 + $0x10] sm:$0xff]   ;;  %v3334_v22 = vld [vmem:[%s4341_s3 + $0x28] sm:$0xff]  ;;  %v3340_v23 = vld [vmem:[%s4341_s3 + $0x20] sm:$0xff] }
   0x7   :  { %168 = vmatprep.mubr.f32.mxu0 %v3159_v5  ;;  %275 = vmatprep.subr.mxu1 %v3279_v12  ;;  %v3327_v21 = vld [vmem:[%s4341_s3 + $0x30] sm:$0xff] }
   0x8   :  { %48 = vrot.lane.b32.xlu0 %v3295_v16, %s3161_s30  ;;  %276 = vmatpush1.msra.mxu1 %v3290_v14 }
   0x9   :  { %277 = vmatprep.subr.mxu1 %v3302_v17  ;;  %424 = vmatprep.subr.mxu0 %v3253_v7 }
   0xa   :  { %2748 = vmatmul.mubr.msk.f32.gmra.mxu0 %vm89_vm0, %v3010_v13  ;;  %278 = vmatpush1.msra.mxu1 %v3308_v18 }
   0xb   :  { %174 = vmatprep.mubr.f32.mxu0 %v3159_v5  ;;  %279 = vmatprep.subr.mxu1 %v3316_v19 }
   0xc   :  { %18 = vsyncpa [#allocation6], 0  ;;  %280 = vmatpush1.msra.mxu1 %v3327_v21  ;;  %v3347_v24 = vld [vmem:[%s4341_s3 + $0x18] sm:$0xff]  ;;  %425 = vmatpush1.msra.mxu0 %v3258_v8  ;;  %v3358_v26 = vld [vmem:[%s4341_s3 + $0x10] sm:$0xff]  ;;  %v3423_v32 = vshrl.u32 %v42_v3, 7  ;;  %vm50_vm4 = vcmask 523264  }
   0xd   :  { %281 = vmatprep.subr.mxu1 %v3334_v22  ;;  %v3012_v25 = vld [vmem:[%s4338_s0 + $0x18] sm:$0xff]   ;;  %v3365_v27 = vld [vmem:[%s4341_s3 + $0x8] sm:$0xff]  ;;  %v3371_v28 = vld [vmem:[%s4341_s3] sm:$0xff]  ;;  %426 = vmatprep.subr.mxu0 %v3268_v10  ;;  %s3168_s3 = smov [#allocation5]  }
   0xe   :  { %2749 = vmatmul.mubr.msk.f32.gmra.mxu0 %vm89_vm0, %v3011_v20  ;;  %282 = vmatpush1.msra.mxu1 %v3340_v23  ;;  %v3416_v29 = vld [vmem:[%s4339_s1] sm:$0xf]  ;;  %v69_v33 = vsub.s32 0, %v3423_v32  ;;  %v73_v34 = vsub.s32 1, %v3423_v32  ;;  %vm3489_vm7 = vmneg %vm44_vm1  ;;  %s2734_s15 = sshll.u32 %s3168_s3, 4  ;;  %s2735_s15 = int_to_ptr.vmem [resolvable:$true] %s2734_s15 }
   0xf   :  { %180 = vmatprep.mubr.f32.mxu0 %v3159_v5  ;;  %283 = vmatprep.subr.mxu1 %v3347_v24  ;;  %vm350_vm2 = vcmp.gt.s32.totalorder %v3416_v29, 0  ;;  %vm351_vm3 = vcmp.gt.s32.totalorder %v3416_v29, 7  ;;  %v65_v35 = vld [vmem:[%s4342_s4] sm:$0x3]  ;;  %vm507_vm13 = vcmp.gt.s32.totalorder %v3416_v29, 1  ;;  %vm508_vm14 = vcmp.gt.s32.totalorder %v3416_v29, 6  ;;  %p3142_p1 = scmp.lt.s32.totalorder %s2735_s15, %s2735_s15 }
  0x10   :  { %284 = vmatpush1.msra.mxu1 %v3358_v26  ;;  %427 = vmatpush1.msra.mxu0 %v3274_v11  ;;  %v354_v30 = vsel %vm350_vm2, 1, %v3160_v15  ;;  %v362_v31 = vsel %vm351_vm3, 1, %v3160_v15  ;;  %v70_v37 = vrot.slane %v65_v35, %v69_v33  ;;  %v74_v38 = vrot.slane %v65_v35, %v73_v34  ;;  %s3162_s4 = smov 32   ;;  %s3137_s1 = scalar_lea.vmem %s2735_s15, 64 }
  0x11   :  { %285 = vmatprep.subr.mxu1 %v3365_v27  ;;  %428 = vmatprep.subr.mxu0 %v3279_v12  ;;  %p3138_p0 = scmp.ne.s32.totalorder %s2735_s15, %s3137_s1  ;;  %p3143_p2 = scmp.lt.s32.totalorder %s3137_s1, %s3137_s1 }
  0x12   :  { %2750 = vmatmul.mubr.msk.f32.gmra.mxu0 %vm89_vm0, %v3012_v25  ;;  %286 = vmatpush1.msra.mxu1 %v3371_v28 }
  0x13   :  { %320 = vmatmul.mubr.f32.vlgmr.msra.gmra.mxu1 %v3159_v5  ;;  %429 = vmatpush1.msra.mxu0 %v3290_v14  ;;  %p3144_p3 = por %p3143_p2, %p3142_p1 }
  0x14   :  { %430 = vmatprep.subr.mxu0 %v3302_v17  ;;  %472 = vmatprep.mubr.f32.mxu0 %v3159_v5 }
  0x15   :  { %431 = vmatpush1.msra.mxu0 %v3308_v18  ;;  %2989 = vset.pattern.permute.xlu0 %v3160_v15  ;;  %p3145_p4 = pnand %p3144_p3, %p3138_p0 }
  0x16   :  { %432 = vmatprep.subr.mxu0 %v3316_v19  ;;  %577 = vmatprep.subr.mxu1 %v3253_v7 }
  0x17   :  { %433 = vmatpush1.msra.mxu0 %v3327_v21  ;;  %578 = vmatpush1.msra.mxu1 %v3258_v8 }
  0x18   :  { %434 = vmatprep.subr.mxu0 %v3334_v22  ;;  %579 = vmatprep.subr.mxu1 %v3268_v10 }
  0x19   :  { %435 = vmatpush1.msra.mxu0 %v3340_v23  ;;  %580 = vmatpush1.msra.mxu1 %v3274_v11 }
  0x1a   :  { %436 = vmatprep.subr.mxu0 %v3347_v24  ;;  %581 = vmatprep.subr.mxu1 %v3279_v12 }
  0x1b   :  { %437 = vmatpush1.msra.mxu0 %v3358_v26  ;;  %582 = vmatpush1.msra.mxu1 %v3290_v14 }
  0x1c   :  { %438 = vmatprep.subr.mxu0 %v3365_v27  ;;  %583 = vmatprep.subr.mxu1 %v3302_v17 }
  0x1d   :  { %439 = vmatpush1.msra.mxu0 %v3371_v28  ;;  %584 = vmatpush1.msra.mxu1 %v3308_v18 }
  0x1e   :  { %585 = vmatprep.subr.mxu1 %v3316_v19  ;;  %625 = vmatprep.mubr.f32.mxu1 %v3159_v5 }
  0x1f   :  { %586 = vmatpush1.msra.mxu1 %v3327_v21  ;;  %730 = vmatprep.subr.mxu0 %v3253_v7 }
  0x20   :  { %587 = vmatprep.subr.mxu1 %v3334_v22  ;;  %356 = vperm.xlu1 %2988, %v354_v30  }
  0x21   :  { %588 = vmatpush1.msra.mxu1 %v3340_v23 }
  0x22   :  { %589 = vmatprep.subr.mxu1 %v3347_v24 }
  0x23   :  { %590 = vmatpush1.msra.mxu1 %v3358_v26 }
  0x24   :  { %591 = vmatprep.subr.mxu1 %v3365_v27  ;;  %364 = vperm.xlu1 %2988, %v362_v31  }
  0x25   :  { %592 = vmatpush1.msra.mxu1 %v3371_v28 }
  0x26   :  { %881 = vmatprep.subr.mxu1 %v3253_v7 }
  0x7a   :  { %v49_v36 = vpop.permute.xlu0 %48 }
  0x7b   :  { %v51_v39 = vsel %vm50_vm4, %v3295_v16, %v49_v36 }
  0x7c   :  { %vm52_vm5 = vcmp.eq.s32.totalorder %v51_v39, 0 }
  0x7d   :  { %v238_v46 = vsel %vm52_vm5, 1, %v3160_v15 }
  0x7e   :  { %v242_v51 = vrot.slane %v238_v46, %v69_v33 }
  0x80   :  { %vm243_vm6 = vcmp.eq.s32.totalorder %v242_v51, 1 }
  0xc6   :  { %v164_v40 = vpop.f32.mrf.mxu0 }
  0xc7   :  { %v165_v42 = vadd.f32 %v164_v40, %v70_v37 }
  0xc8   :  { %v166_v41 = vpop.f32.mrf.mxu0 }
  0xc9   :  { %v167_v43 = vadd.f32 %v166_v41, %v74_v38 }
  0xca   :  { %v170_v44 = vpop.f32.mrf.mxu0 }
  0xcb   :  { %v171_v45 = vadd.f32 %v170_v44, %v70_v37  ;;  %v196_v47 = vcombine.high %v165_v42, %v167_v43  ;;  %v195_v58 = vcombine.low %v165_v42, %v167_v43  ;;  %v2798_v1 = vcombine.high %v167_v43, %v167_v43 }
  0xcc   :  { %v172_v48 = vpop.f32.mrf.mxu0  ;;  %v2796_v40 = vcombine.low %v167_v43, %v167_v43 }
  0xcd   :  { %v173_v49 = vadd.f32 %v172_v48, %v74_v38 }
  0xce   :  { %v176_v50 = vpop.f32.mrf.mxu0 }
  0xcf   :  { %v177_v52 = vadd.f32 %v176_v50, %v70_v37  ;;  %v197_v53 = vcombine.low %v171_v45, %v173_v49  ;;  %v198_v54 = vcombine.high %v171_v45, %v173_v49  ;;  %v2800_v61 = vcombine.low %v173_v49, %v173_v49 }
  0xd0   :  { %v178_v55 = vpop.f32.mrf.mxu0  ;;  %v2802_v3 = vcombine.high %v173_v49, %v173_v49 }
  0xd1   :  { %v179_v56 = vadd.f32 %v178_v55, %v74_v38 }
  0xd2   :  { %v182_v57 = vpop.f32.mrf.mxu0 }
  0xd3   :  { %v200_v59 = vcombine.high %v177_v52, %v179_v56  ;;  %v2799_v60 = vcombine.high %v179_v56, %v179_v56  ;;  %v199_v62 = vcombine.low %v177_v52, %v179_v56  ;;  %v183_v63 = vadd.f32 %v182_v57, %v70_v37  ;;  %v321_v39 = vpop.f32.mrf.mxu1 }
  0xd4   :  { %v184_v0 = vpop.f32.mrf.mxu0  ;;  %v2801_v2 = vcombine.low %v179_v56, %v179_v56 }
  0xd5   :  { %v185_v4 = vadd.f32 %v184_v0, %v74_v38  ;;  %v3434_v6 = vsel %vm243_vm6, %v200_v59, %v197_v53  ;;  %v3437_v13 = vsel %vm243_vm6, %v2799_v60, %v2800_v61  ;;  %v3440_v16 = vsel %vm243_vm6, %v199_v62, %v198_v54  ;;  %v323_v52 = vpop.f32.mrf.mxu1 }
  0xd6   :  { %v3443_v20 = vsel %vm243_vm6, %v2801_v2, %v2802_v3  ;;  %v3446_v25 = vsel %vm243_vm6, %v198_v54, %v199_v62  ;;  %v3449_v30 = vsel %vm243_vm6, %v2802_v3, %v2801_v2  ;;  %v3452_v31 = vsel %vm243_vm6, %v197_v53, %v200_v59  ;;  %v3483_v2 = vpop.permute.xlu1 %356 }
  0xd7   :  { %v202_v33 = vcombine.high %v183_v63, %v185_v4  ;;  %v2795_v34 = vcombine.high %v185_v4, %v185_v4  ;;  %v201_v35 = vcombine.low %v183_v63, %v185_v4  ;;  %v2797_v36 = vcombine.low %v185_v4, %v185_v4 }
  0xd8   :  { %v3455_v37 = vsel %vm243_vm6, %v2800_v61, %v2799_v60  ;;  %vm358_vm8 = vcmp.eq.s32.totalorder %v3483_v2, 1 }
  0xd9   :  { %v250_v38 = vsel %vm243_vm6, %v202_v33, %v195_v58  ;;  %v3459_v41 = vsel %vm243_vm6, %v201_v35, %v196_v47  ;;  %v3462_v42 = vsel %vm243_vm6, %v2797_v36, %v2798_v1  ;;  %v3465_v45 = vsel %vm243_vm6, %v196_v47, %v201_v35  ;;  %vm359_vm10 = vmand %vm44_vm1, %vm358_vm8 }
  0xda   :  { %v326_v44 = vadd.f32 %v321_v39, %v250_v38  ;;  %v3468_v46 = vsel %vm243_vm6, %v2798_v1, %v2797_v36  ;;  %v3471_v48 = vsel %vm243_vm6, %v195_v58, %v202_v33  ;;  %v3474_v49 = vsel %vm243_vm6, %v2796_v40, %v2795_v34  ;;  %v3485_v3 = vpop.permute.xlu1 %364 }
  0xdb   :  { %v251_v50 = vsel %vm243_vm6, %v2795_v34, %v2796_v40  ;;  %vm366_vm9 = vcmp.eq.s32.totalorder %v3485_v3, 1  ;;  %v509_v38 = vsel %vm507_vm13, 1, %v3160_v15  ;;  %vm660_vm6 = vcmp.gt.s32.totalorder %v3416_v29, 2  ;;  %v1453_v3 = vld [vmem:[%s4343_s5 + $0x10] sm:$0xff] }
  0xdc   :  { %v2751_v43 = vmul.f32 -1.442695, %v326_v44  ;;  %v327_v53 = vadd.f32 %v323_v52, %v251_v50  ;;  %vm367_vm11 = vmand %vm3489_vm7, %vm366_vm9 }
  0xdd   :  { %vm368_vm12 = vmor %vm359_vm10, %vm367_vm11  ;;  %vm661_vm10 = vcmp.gt.s32.totalorder %v3416_v29, 5 }
  0xde   :  { %3013 = vpow2.f32 %v2751_v43  ;;  %v2752_v58 = vmul.f32 -1.442695, %v327_v53 }
  0xdf   :  { %3015 = vtanh.f32 %v327_v53 }
  0xeb   :  { %v3014_v54 = vpop.eup %3013 }
  0xec   :  { %v331_v55 = vadd.f32 1.0, %v3014_v54  ;;  %v3016_v47 = vpop.eup %3015 }
  0xee   :  { %3017 = vrcp.f32 %v331_v55 }
  0xef   :  { %3019 = vpow2.f32 %v2752_v58 }
  0xfb   :  { %v3018_v56 = vpop.eup %3017 }
  0xfc   :  { %v342_v57 = vmul.f32 %v3018_v56, %v3016_v47  ;;  %v3020_v59 = vpop.eup %3019  ;;  %v341_v61 = vmul.f32 0.0, %v3018_v56  ;;  %v515_v56 = vsel %vm508_vm14, 1, %v3160_v15 }
  0xfd   :  { %v338_v60 = vadd.f32 1.0, %v3020_v59 }
  0xfe   :  { %344 = vrot.lane.b32.xlu0 %v342_v57, %s3161_s30 }
  0xff   :  { %3021 = vrcp.f32 %v338_v60 }
 0x10c   :  { %v3022_v51 = vpop.eup %3021 }
 0x170   :  { %v345_v62 = vpop.permute.xlu0 %344 }
 0x171   :  { %v347_v63 = vadd.f32 %v345_v62, %v341_v61 }
 0x173   :  { %3023 = vtanh.f32 %v347_v63  ;;  %375 = vrot.lane.b32.xlu1 %v347_v63, %s3161_s30 }
 0x180   :  { %v3024_v0 = vpop.eup %3023 }
 0x181   :  { %v3479_v1 = vmul.f32 %v3024_v0, %v3022_v51 }
 0x183   :  { %370 = vrot.lane.b32.xlu0 %v3479_v1, %s3161_s30 }
 0x1e5   :  { %v376_v33 = vpop.permute.xlu1 %375 }
 0x1e6   :  { %v3503_v34 = vsel %vm368_vm12, %v376_v33, 0.0 }
 0x1e7   :  { %495 = vrot.lane.b32.xlu0 %v3503_v34, %s3161_s30 }
 0x1eb   :  { %511 = vperm.xlu0 %2989, %v509_v38  }
 0x1f5   :  { %v371_v35 = vpop.permute.xlu0 %370 }
 0x1f6   :  { %v3507_v36 = vsel %vm368_vm12, %v371_v35, 0.0 }
 0x1f7   :  { %2755 = vmatmul.mubr.msk.f32.vlgmr.msra.gmra.mxu0 %vm50_vm4, %v3507_v36 }
 0x1f8   :  { %731 = vmatpush1.msra.mxu0 %v3258_v8  ;;  %778 = vmatprep.mubr.f32.mxu0 %v3159_v5 }
 0x1f9   :  { %732 = vmatprep.subr.mxu0 %v3268_v10 }
 0x1fa   :  { %733 = vmatpush1.msra.mxu0 %v3274_v11 }
 0x1fb   :  { %734 = vmatprep.subr.mxu0 %v3279_v12 }
 0x1fc   :  { %735 = vmatpush1.msra.mxu0 %v3290_v14 }
 0x1fd   :  { %736 = vmatprep.subr.mxu0 %v3302_v17 }
 0x1fe   :  { %737 = vmatpush1.msra.mxu0 %v3308_v18 }
 0x1ff   :  { %738 = vmatprep.subr.mxu0 %v3316_v19 }
 0x200   :  { %739 = vmatpush1.msra.mxu0 %v3327_v21 }
 0x201   :  { %740 = vmatprep.subr.mxu0 %v3334_v22 }
 0x202   :  { %741 = vmatpush1.msra.mxu0 %v3340_v23 }
 0x203   :  { %742 = vmatprep.subr.mxu0 %v3347_v24 }
 0x204   :  { %743 = vmatpush1.msra.mxu0 %v3358_v26 }
 0x205   :  { %744 = vmatprep.subr.mxu0 %v3365_v27 }
 0x206   :  { %745 = vmatpush1.msra.mxu0 %v3371_v28 }
 0x207   :  { %1020 = vmatprep.subr.mxu0 %v3253_v7 }
 0x259   :  { %v496_v58 = vpop.permute.xlu0 %495 }
 0x266   :  { %v3540_v0 = vpop.permute.xlu0 %511 }
 0x267   :  { %vm513_vm15 = vcmp.eq.s32.totalorder %v3540_v0, 1  ;;  %v1457_v0 = vld [vmem:[%s4343_s5 + $0x30] sm:$0xff] }
 0x268   :  { %vm514_vm2 = vmand %vm44_vm1, %vm513_vm15 }
 0x2b7   :  { %v474_v39 = vpop.f32.mrf.mxu0 }
 0x2b8   :  { %v479_v40 = vadd.f32 %v474_v39, %v3459_v41  ;;  %v662_v39 = vsel %vm660_vm6, 1, %v3160_v15 }
 0x2b9   :  { %v476_v43 = vpop.f32.mrf.mxu0 }
 0x2ba   :  { %v2756_v44 = vmul.f32 -1.442695, %v479_v40  ;;  %v480_v50 = vadd.f32 %v476_v43, %v3462_v42 }
 0x2bc   :  { %3025 = vpow2.f32 %v2756_v44  ;;  %v2757_v41 = vmul.f32 -1.442695, %v480_v50 }
 0x2bd   :  { %3027 = vtanh.f32 %v480_v50 }
 0x2c9   :  { %v3026_v52 = vpop.eup %3025 }
 0x2ca   :  { %v484_v53 = vadd.f32 1.0, %v3026_v52  ;;  %v3028_v54 = vpop.eup %3027 }
 0x2cc   :  { %3029 = vrcp.f32 %v484_v53 }
 0x2cd   :  { %3031 = vpow2.f32 %v2757_v41  ;;  %v668_v41 = vsel %vm661_vm10, 1, %v3160_v15 }
 0x2d9   :  { %v3030_v55 = vpop.eup %3029 }
 0x2da   :  { %v499_v47 = vmul.f32 %v3030_v55, %v3028_v54  ;;  %v3032_v57 = vpop.eup %3031  ;;  %v498_v42 = vmul.f32 %v3030_v55, %v496_v58 }
 0x2db   :  { %v491_v59 = vadd.f32 1.0, %v3032_v57 }
 0x2dc   :  { %501 = vrot.lane.b32.xlu1 %v499_v47, %s3161_s30 }
 0x2dd   :  { %3033 = vrcp.f32 %v491_v59 }
 0x2e0   :  { %517 = vperm.xlu1 %2988, %v515_v56  }
 0x2ea   :  { %v3034_v62 = vpop.eup %3033 }
 0x34e   :  { %v502_v60 = vpop.permute.xlu1 %501 }
 0x34f   :  { %v504_v61 = vadd.f32 %v502_v60, %v498_v42 }
 0x351   :  { %3035 = vtanh.f32 %v504_v61  ;;  %528 = vrot.lane.b32.xlu0 %v504_v61, %s3161_s30 }
 0x35b   :  { %v3542_v33 = vpop.permute.xlu1 %517 }
 0x35c   :  { %vm519_vm0 = vcmp.eq.s32.totalorder %v3542_v33, 1 }
 0x35d   :  { %vm520_vm3 = vmand %vm3489_vm7, %vm519_vm0 }
 0x35e   :  { %v3036_v63 = vpop.eup %3035  ;;  %vm521_vm5 = vmor %vm514_vm2, %vm520_vm3  ;;  %vm813_vm3 = vcmp.gt.s32.totalorder %v3416_v29, 3 }
 0x35f   :  { %v3536_v51 = vmul.f32 %v3036_v63, %v3034_v62 }
 0x361   :  { %523 = vrot.lane.b32.xlu1 %v3536_v51, %s3161_s30 }
 0x3c3   :  { %v529_v35 = vpop.permute.xlu0 %528 }
 0x3c4   :  { %v3556_v38 = vsel %vm521_vm5, %v529_v35, %v3503_v34 }
 0x3c5   :  { %648 = vrot.lane.b32.xlu1 %v3556_v38, %s3161_s30 }
 0x3c9   :  { %664 = vperm.xlu1 %2988, %v662_v39  }
 0x3d3   :  { %v524_v40 = vpop.permute.xlu1 %523 }
 0x3d4   :  { %v3562_v44 = vsel %vm521_vm5, %v524_v40, %v3507_v36  ;;  %vm814_vm5 = vcmp.gt.s32.totalorder %v3416_v29, 4 }
 0x3d5   :  { %2758 = vmatmul.mubr.msk.f32.vlgmr.msra.gmra.mxu1 %vm50_vm4, %v3562_v44 }
 0x3d6   :  { %882 = vmatpush1.msra.mxu1 %v3258_v8  ;;  %929 = vmatprep.mubr.f32.mxu1 %v3159_v5 }
 0x3d7   :  { %883 = vmatprep.subr.mxu1 %v3268_v10 }
 0x3d8   :  { %884 = vmatpush1.msra.mxu1 %v3274_v11 }
 0x3d9   :  { %885 = vmatprep.subr.mxu1 %v3279_v12 }
 0x3da   :  { %886 = vmatpush1.msra.mxu1 %v3290_v14 }
 0x3db   :  { %887 = vmatprep.subr.mxu1 %v3302_v17 }
 0x3dc   :  { %888 = vmatpush1.msra.mxu1 %v3308_v18 }
 0x3dd   :  { %889 = vmatprep.subr.mxu1 %v3316_v19 }
 0x3de   :  { %890 = vmatpush1.msra.mxu1 %v3327_v21 }
 0x3df   :  { %891 = vmatprep.subr.mxu1 %v3334_v22 }
 0x3e0   :  { %892 = vmatpush1.msra.mxu1 %v3340_v23 }
 0x3e1   :  { %893 = vmatprep.subr.mxu1 %v3347_v24 }
 0x3e2   :  { %894 = vmatpush1.msra.mxu1 %v3358_v26 }
 0x3e3   :  { %895 = vmatprep.subr.mxu1 %v3365_v27 }
 0x3e4   :  { %896 = vmatpush1.msra.mxu1 %v3371_v28 }
 0x3e5   :  { %1159 = vmatprep.subr.mxu1 %v3253_v7 }
 0x437   :  { %v649_v58 = vpop.permute.xlu1 %648 }
 0x444   :  { %v3595_v39 = vpop.permute.xlu1 %664 }
 0x445   :  { %vm666_vm12 = vcmp.eq.s32.totalorder %v3595_v39, 1 }
 0x446   :  { %vm667_vm14 = vmand %vm44_vm1, %vm666_vm12 }
 0x495   :  { %v627_v34 = vpop.f32.mrf.mxu1 }
 0x496   :  { %v632_v36 = vadd.f32 %v627_v34, %v3434_v6 }
 0x497   :  { %v629_v50 = vpop.f32.mrf.mxu1 }
 0x498   :  { %v2759_v43 = vmul.f32 -1.442695, %v632_v36  ;;  %v633_v52 = vadd.f32 %v629_v50, %v3437_v13  ;;  %v815_v36 = vsel %vm813_vm3, 1, %v3160_v15 }
 0x49a   :  { %3037 = vpow2.f32 %v2759_v43  ;;  %v2760_v6 = vmul.f32 -1.442695, %v633_v52 }
 0x49b   :  { %3039 = vtanh.f32 %v633_v52 }
 0x4a7   :  { %v3038_v53 = vpop.eup %3037 }
 0x4a8   :  { %v637_v54 = vadd.f32 1.0, %v3038_v53  ;;  %v3040_v55 = vpop.eup %3039 }
 0x4aa   :  { %3041 = vrcp.f32 %v637_v54 }
 0x4ab   :  { %3043 = vpow2.f32 %v2760_v6 }
 0x4b7   :  { %v3042_v47 = vpop.eup %3041 }
 0x4b8   :  { %v652_v56 = vmul.f32 %v3042_v47, %v3040_v55  ;;  %v3044_v57 = vpop.eup %3043  ;;  %v651_v13 = vmul.f32 %v3042_v47, %v649_v58 }
 0x4b9   :  { %v644_v59 = vadd.f32 1.0, %v3044_v57 }
 0x4ba   :  { %654 = vrot.lane.b32.xlu0 %v652_v56, %s3161_s30 }
 0x4bb   :  { %3045 = vrcp.f32 %v644_v59 }
 0x4be   :  { %670 = vperm.xlu0 %2989, %v668_v41  }
 0x4c8   :  { %v3046_v61 = vpop.eup %3045 }
 0x52c   :  { %v655_v42 = vpop.permute.xlu0 %654 }
 0x52d   :  { %v657_v60 = vadd.f32 %v655_v42, %v651_v13 }
 0x52f   :  { %3047 = vtanh.f32 %v657_v60  ;;  %681 = vrot.lane.b32.xlu0 %v657_v60, %s3161_s30 }
 0x539   :  { %v3593_v35 = vpop.permute.xlu0 %670 }
 0x53a   :  { %vm672_vm11 = vcmp.eq.s32.totalorder %v3593_v35, 1  ;;  %v1456_v35 = vld [vmem:[%s4343_s5 + $0x28] sm:$0xff] }
 0x53b   :  { %vm673_vm13 = vmand %vm3489_vm7, %vm672_vm11 }
 0x53c   :  { %v3048_v62 = vpop.eup %3047  ;;  %vm674_vm2 = vmor %vm667_vm14, %vm673_vm13 }
 0x53d   :  { %v3589_v63 = vmul.f32 %v3048_v62, %v3046_v61 }
 0x53f   :  { %676 = vrot.lane.b32.xlu1 %v3589_v63, %s3161_s30 }
 0x5a1   :  { %v682_v40 = vpop.permute.xlu0 %681 }
 0x5a2   :  { %v3609_v34 = vsel %vm674_vm2, %v682_v40, %v3556_v38 }
 0x5a3   :  { %801 = vrot.lane.b32.xlu1 %v3609_v34, %s3161_s30 }
 0x5a7   :  { %817 = vperm.xlu1 %2988, %v815_v36  }
 0x5b1   :  { %v677_v43 = vpop.permute.xlu1 %676 }
 0x5b2   :  { %v3615_v50 = vsel %vm674_vm2, %v677_v43, %v3562_v44 }
 0x5b3   :  { %2761 = vmatmul.mubr.msk.f32.vlgmr.msra.gmra.mxu0 %vm50_vm4, %v3615_v50 }
 0x5b4   :  { %1021 = vmatpush1.msra.mxu0 %v3258_v8  ;;  %1068 = vmatprep.mubr.f32.mxu0 %v3159_v5 }
 0x5b5   :  { %1022 = vmatprep.subr.mxu0 %v3268_v10 }
 0x5b6   :  { %1023 = vmatpush1.msra.mxu0 %v3274_v11 }
 0x5b7   :  { %1024 = vmatprep.subr.mxu0 %v3279_v12 }
 0x5b8   :  { %1025 = vmatpush1.msra.mxu0 %v3290_v14 }
 0x5b9   :  { %1026 = vmatprep.subr.mxu0 %v3302_v17 }
 0x5ba   :  { %1027 = vmatpush1.msra.mxu0 %v3308_v18 }
 0x5bb   :  { %1028 = vmatprep.subr.mxu0 %v3316_v19 }
 0x5bc   :  { %1029 = vmatpush1.msra.mxu0 %v3327_v21 }
 0x5bd   :  { %1030 = vmatprep.subr.mxu0 %v3334_v22 }
 0x5be   :  { %1031 = vmatpush1.msra.mxu0 %v3340_v23 }
 0x5bf   :  { %1032 = vmatprep.subr.mxu0 %v3347_v24 }
 0x5c0   :  { %1033 = vmatpush1.msra.mxu0 %v3358_v26 }
 0x5c1   :  { %1034 = vmatprep.subr.mxu0 %v3365_v27 }
 0x5c2   :  { %1035 = vmatpush1.msra.mxu0 %v3371_v28 }
 0x5c3   :  { %1298 = vmatprep.subr.mxu0 %v3253_v7  ;;  %v821_v7 = vsel %vm814_vm5, 1, %v3160_v15 }
 0x615   :  { %v802_v58 = vpop.permute.xlu1 %801 }
 0x622   :  { %v3648_v40 = vpop.permute.xlu1 %817 }
 0x623   :  { %vm819_vm10 = vcmp.eq.s32.totalorder %v3648_v40, 1  ;;  %v1455_v40 = vld [vmem:[%s4343_s5 + $0x20] sm:$0xff] }
 0x624   :  { %vm820_vm14 = vmand %vm44_vm1, %vm819_vm10 }
 0x625   :  { %vm965_vm5 = vmand %vm3489_vm7, %vm819_vm10 }
 0x673   :  { %v780_v38 = vpop.f32.mrf.mxu0 }
 0x674   :  { %v785_v44 = vadd.f32 %v780_v38, %v3440_v16 }
 0x675   :  { %v782_v53 = vpop.f32.mrf.mxu0 }
 0x676   :  { %v2762_v52 = vmul.f32 -1.442695, %v785_v44  ;;  %v786_v54 = vadd.f32 %v782_v53, %v3443_v20 }
 0x678   :  { %3049 = vpow2.f32 %v2762_v52  ;;  %v2763_v16 = vmul.f32 -1.442695, %v786_v54 }
 0x679   :  { %3051 = vtanh.f32 %v786_v54 }
 0x685   :  { %v3050_v55 = vpop.eup %3049 }
 0x686   :  { %v790_v47 = vadd.f32 1.0, %v3050_v55  ;;  %v3052_v56 = vpop.eup %3051 }
 0x688   :  { %3053 = vrcp.f32 %v790_v47 }
 0x689   :  { %3055 = vpow2.f32 %v2763_v16 }
 0x695   :  { %v3054_v41 = vpop.eup %3053 }
 0x696   :  { %v805_v6 = vmul.f32 %v3054_v41, %v3052_v56  ;;  %v3056_v57 = vpop.eup %3055  ;;  %v804_v20 = vmul.f32 %v3054_v41, %v802_v58 }
 0x697   :  { %v797_v59 = vadd.f32 1.0, %v3056_v57 }
 0x698   :  { %807 = vrot.lane.b32.xlu0 %v805_v6, %s3161_s30 }
 0x699   :  { %3057 = vrcp.f32 %v797_v59 }
 0x69c   :  { %823 = vperm.xlu0 %2989, %v821_v7  }
 0x6a6   :  { %v3058_v60 = vpop.eup %3057 }
 0x70a   :  { %v808_v13 = vpop.permute.xlu0 %807 }
 0x70b   :  { %v810_v42 = vadd.f32 %v808_v13, %v804_v20 }
 0x70d   :  { %3059 = vtanh.f32 %v810_v42  ;;  %834 = vrot.lane.b32.xlu0 %v810_v42, %s3161_s30 }
 0x717   :  { %v3646_v62 = vpop.permute.xlu0 %823 }
 0x718   :  { %vm825_vm6 = vcmp.eq.s32.totalorder %v3646_v62, 1 }
 0x719   :  { %vm826_vm13 = vmand %vm3489_vm7, %vm825_vm6 }
 0x71a   :  { %v3060_v61 = vpop.eup %3059  ;;  %vm827_vm2 = vmor %vm820_vm14, %vm826_vm13 }
 0x71b   :  { %v3642_v29 = vmul.f32 %v3060_v61, %v3058_v60  ;;  %vm964_vm3 = vmand %vm44_vm1, %vm825_vm6 }
 0x71c   :  { %vm966_vm13 = vmor %vm964_vm3, %vm965_vm5 }
 0x71d   :  { %829 = vrot.lane.b32.xlu1 %v3642_v29, %s3161_s30  ;;  %vm1103_vm14 = vmand %vm44_vm1, %vm672_vm11  ;;  %v838_v2 = vsel %vm819_vm10, %v3642_v29, 0.0 }
 0x71e   :  { %vm1243_vm5 = vmand %vm3489_vm7, %vm513_vm15 }
 0x77f   :  { %v835_v36 = vpop.permute.xlu0 %834 }
 0x780   :  { %v837_v43 = vsel %vm827_vm2, %v835_v36, %v3609_v34 }
 0x781   :  { %952 = vrot.lane.b32.xlu1 %v837_v43, %s3161_s30 }
 0x78f   :  { %v830_v38 = vpop.permute.xlu1 %829 }
 0x790   :  { %v832_v44 = vsel %vm827_vm2, %v830_v38, %v3615_v50  ;;  %vm1104_vm2 = vmand %vm3489_vm7, %vm666_vm12  ;;  %vm1442_vm7 = vcmask 261120  }
 0x791   :  { %2764 = vmatmul.mubr.msk.f32.vlgmr.msra.gmra.mxu1 %vm50_vm4, %v832_v44  ;;  %vm1105_vm3 = vmor %vm1103_vm14, %vm1104_vm2 }
 0x792   :  { %1160 = vmatpush1.msra.mxu1 %v3258_v8  ;;  %1207 = vmatprep.mubr.f32.mxu1 %v3159_v5 }
 0x793   :  { %1161 = vmatprep.subr.mxu1 %v3268_v10 }
 0x794   :  { %1162 = vmatpush1.msra.mxu1 %v3274_v11 }
 0x795   :  { %1163 = vmatprep.subr.mxu1 %v3279_v12 }
 0x796   :  { %1164 = vmatpush1.msra.mxu1 %v3290_v14 }
 0x797   :  { %1165 = vmatprep.subr.mxu1 %v3302_v17 }
 0x798   :  { %1166 = vmatpush1.msra.mxu1 %v3308_v18 }
 0x799   :  { %1167 = vmatprep.subr.mxu1 %v3316_v19 }
 0x79a   :  { %1168 = vmatpush1.msra.mxu1 %v3327_v21 }
 0x79b   :  { %1169 = vmatprep.subr.mxu1 %v3334_v22 }
 0x79c   :  { %1170 = vmatpush1.msra.mxu1 %v3340_v23 }
 0x79d   :  { %1171 = vmatprep.subr.mxu1 %v3347_v24 }
 0x79e   :  { %1172 = vmatpush1.msra.mxu1 %v3358_v26 }
 0x79f   :  { %1173 = vmatprep.subr.mxu1 %v3365_v27 }
 0x7a0   :  { %1174 = vmatpush1.msra.mxu1 %v3371_v28 }
 0x7f3   :  { %v953_v57 = vpop.permute.xlu1 %952 }
 0x851   :  { %v931_v34 = vpop.f32.mrf.mxu1 }
 0x852   :  { %v936_v50 = vadd.f32 %v931_v34, %v3446_v25 }
 0x853   :  { %v933_v53 = vpop.f32.mrf.mxu1 }
 0x854   :  { %v2765_v52 = vmul.f32 -1.442695, %v936_v50  ;;  %v937_v54 = vadd.f32 %v933_v53, %v3449_v30 }
 0x856   :  { %3061 = vpow2.f32 %v2765_v52  ;;  %v2766_v7 = vmul.f32 -1.442695, %v937_v54 }
 0x857   :  { %3063 = vtanh.f32 %v937_v54 }
 0x863   :  { %v3062_v55 = vpop.eup %3061 }
 0x864   :  { %v941_v47 = vadd.f32 1.0, %v3062_v55  ;;  %v3064_v56 = vpop.eup %3063 }
 0x866   :  { %3065 = vrcp.f32 %v941_v47 }
 0x867   :  { %3067 = vpow2.f32 %v2766_v7 }
 0x873   :  { %v3066_v41 = vpop.eup %3065 }
 0x874   :  { %v956_v6 = vmul.f32 %v3066_v41, %v3064_v56  ;;  %v3068_v16 = vpop.eup %3067  ;;  %v955_v25 = vmul.f32 %v3066_v41, %v953_v57 }
 0x875   :  { %v948_v58 = vadd.f32 1.0, %v3068_v16 }
 0x876   :  { %958 = vrot.lane.b32.xlu0 %v956_v6, %s3161_s30 }
 0x877   :  { %3069 = vrcp.f32 %v948_v58 }
 0x884   :  { %v3070_v30 = vpop.eup %3069 }
 0x8e8   :  { %v959_v59 = vpop.permute.xlu0 %958 }
 0x8e9   :  { %v961_v20 = vadd.f32 %v959_v59, %v955_v25 }
 0x8eb   :  { %3071 = vtanh.f32 %v961_v20  ;;  %973 = vrot.lane.b32.xlu0 %v961_v20, %s3161_s30 }
 0x8f8   :  { %v3072_v13 = vpop.eup %3071 }
 0x8f9   :  { %v3684_v42 = vmul.f32 %v3072_v13, %v3070_v30 }
 0x8fb   :  { %968 = vrot.lane.b32.xlu1 %v3684_v42, %s3161_s30  ;;  %v984_v4 = vsel %vm819_vm10, %v3684_v42, 0.0  ;;  %vm1912_vm10 = vcmask 551936  }
 0x95d   :  { %v974_v60 = vpop.permute.xlu0 %973 }
 0x95e   :  { %v976_v61 = vsel %vm966_vm13, %v974_v60, %v837_v43 }
 0x95f   :  { %1091 = vrot.lane.b32.xlu1 %v976_v61, %s3161_s30 }
 0x96d   :  { %v969_v36 = vpop.permute.xlu1 %968 }
 0x96e   :  { %v971_v38 = vsel %vm966_vm13, %v969_v36, %v832_v44  ;;  %vm1242_vm13 = vmand %vm44_vm1, %vm519_vm0  ;;  %vm384_vm1 = vcmask 257024  }
 0x96f   :  { %2767 = vmatmul.mubr.msk.f32.vlgmr.msra.gmra.mxu0 %vm50_vm4, %v971_v38  ;;  %vm1244_vm14 = vmor %vm1242_vm13, %vm1243_vm5  ;;  %vm2716_vm5 = vcmask 35840  }
 0x970   :  { %1299 = vmatpush1.msra.mxu0 %v3258_v8  ;;  %1346 = vmatprep.mubr.f32.mxu0 %v3159_v5 }
 0x971   :  { %1300 = vmatprep.subr.mxu0 %v3268_v10 }
 0x972   :  { %1301 = vmatpush1.msra.mxu0 %v3274_v11 }
 0x973   :  { %1302 = vmatprep.subr.mxu0 %v3279_v12 }
 0x974   :  { %1303 = vmatpush1.msra.mxu0 %v3290_v14 }
 0x975   :  { %1304 = vmatprep.subr.mxu0 %v3302_v17 }
 0x976   :  { %1305 = vmatpush1.msra.mxu0 %v3308_v18 }
 0x977   :  { %1306 = vmatprep.subr.mxu0 %v3316_v19 }
 0x978   :  { %1307 = vmatpush1.msra.mxu0 %v3327_v21 }
 0x979   :  { %1308 = vmatprep.subr.mxu0 %v3334_v22 }
 0x97a   :  { %1309 = vmatpush1.msra.mxu0 %v3340_v23 }
 0x97b   :  { %1310 = vmatprep.subr.mxu0 %v3347_v24 }
 0x97c   :  { %1311 = vmatpush1.msra.mxu0 %v3358_v26 }
 0x97d   :  { %1312 = vmatprep.subr.mxu0 %v3365_v27 }
 0x97e   :  { %1313 = vmatpush1.msra.mxu0 %v3371_v28 }
 0x9d1   :  { %v1092_v26 = vpop.permute.xlu1 %1091 }
 0xa2f   :  { %v1070_v8 = vpop.f32.mrf.mxu0 }
 0xa30   :  { %v1075_v10 = vadd.f32 %v1070_v8, %v3452_v31 }
 0xa31   :  { %v1072_v12 = vpop.f32.mrf.mxu0 }
 0xa32   :  { %v2768_v11 = vmul.f32 -1.442695, %v1075_v10  ;;  %v1076_v14 = vadd.f32 %v1072_v12, %v3455_v37  ;;  %v692_v12 = vsel %vm672_vm11, %v3589_v63, 0.0 }
 0xa34   :  { %3073 = vpow2.f32 %v2768_v11  ;;  %v2769_v23 = vmul.f32 -1.442695, %v1076_v14 }
 0xa35   :  { %3075 = vtanh.f32 %v1076_v14 }
 0xa41   :  { %v3074_v17 = vpop.eup %3073 }
 0xa42   :  { %v1080_v18 = vadd.f32 1.0, %v3074_v17  ;;  %v3076_v19 = vpop.eup %3075 }
 0xa44   :  { %3077 = vrcp.f32 %v1080_v18  ;;  %v386_v18 = vsel %vm366_vm9, %v3479_v1, 0.0 }
 0xa45   :  { %3079 = vpow2.f32 %v2769_v23 }
 0xa51   :  { %v3078_v21 = vpop.eup %3077 }
 0xa52   :  { %v1095_v22 = vmul.f32 %v3078_v21, %v3076_v19  ;;  %v3080_v24 = vpop.eup %3079  ;;  %v1094_v28 = vmul.f32 %v3078_v21, %v1092_v26  ;;  %v379_v19 = vsel %vm358_vm8, %v3479_v1, 0.0  ;;  %v685_v21 = vsel %vm666_vm12, %v3589_v63, 0.0 }
 0xa53   :  { %v1087_v27 = vadd.f32 1.0, %v3080_v24 }
 0xa54   :  { %1097 = vrot.lane.b32.xlu0 %v1095_v22, %s3161_s30  ;;  %v977_v22 = vsel %vm825_vm6, %v3684_v42, 0.0 }
 0xa55   :  { %3081 = vrcp.f32 %v1087_v27 }
 0xa62   :  { %v3082_v37 = vpop.eup %3081 }
 0xac6   :  { %v1098_v31 = vpop.permute.xlu0 %1097 }
 0xac7   :  { %v1100_v43 = vadd.f32 %v1098_v31, %v1094_v28 }
 0xac9   :  { %3083 = vtanh.f32 %v1100_v43  ;;  %1112 = vrot.lane.b32.xlu0 %v1100_v43, %s3161_s30 }
 0xad6   :  { %v3084_v44 = vpop.eup %3083 }
 0xad7   :  { %v3718_v34 = vmul.f32 %v3084_v44, %v3082_v37 }
 0xad9   :  { %1107 = vrot.lane.b32.xlu1 %v3718_v34, %s3161_s30  ;;  %v1116_v62 = vsel %vm672_vm11, %v3718_v34, 0.0  ;;  %vm2614_vm11 = vcmp.eq.s32.totalorder %v3262_v9, 3 }
 0xb3b   :  { %v1113_v50 = vpop.permute.xlu0 %1112 }
 0xb3c   :  { %v1115_v52 = vsel %vm1105_vm3, %v1113_v50, %v976_v61 }
 0xb3d   :  { %1230 = vrot.lane.b32.xlu1 %v1115_v52, %s3161_s30 }
 0xb4b   :  { %v1108_v53 = vpop.permute.xlu1 %1107 }
 0xb4c   :  { %v1110_v54 = vsel %vm1105_vm3, %v1108_v53, %v971_v38 }
 0xb4d   :  { %2770 = vmatmul.mubr.msk.f32.vlgmr.msra.gmra.mxu1 %vm50_vm4, %v1110_v54 }
 0xbaf   :  { %v1231_v30 = vpop.permute.xlu1 %1230 }
 0xc0d   :  { %v1209_v55 = vpop.f32.mrf.mxu1 }
 0xc0e   :  { %v1214_v47 = vadd.f32 %v1209_v55, %v3465_v45 }
 0xc0f   :  { %v1211_v41 = vpop.f32.mrf.mxu1 }
 0xc10   :  { %v2771_v56 = vmul.f32 -1.442695, %v1214_v47  ;;  %v1215_v6 = vadd.f32 %v1211_v41, %v3468_v46 }
 0xc12   :  { %3085 = vpow2.f32 %v2771_v56  ;;  %v2772_v59 = vmul.f32 -1.442695, %v1215_v6 }
 0xc13   :  { %3087 = vtanh.f32 %v1215_v6  ;;  %v1123_v6 = vsel %vm666_vm12, %v3718_v34, 0.0  ;;  %v1454_v34 = vld [vmem:[%s4343_s5 + $0x18] sm:$0xff]  ;;  %vm3166_vm12 = vmmov 0  }
 0xc1f   :  { %v3086_v7 = vpop.eup %3085 }
 0xc20   :  { %v1219_v16 = vadd.f32 1.0, %v3086_v7  ;;  %v3088_v57 = vpop.eup %3087 }
 0xc22   :  { %3089 = vrcp.f32 %v1219_v16 }
 0xc23   :  { %3091 = vpow2.f32 %v2772_v59 }
 0xc2f   :  { %v3090_v58 = vpop.eup %3089 }
 0xc30   :  { %v1234_v25 = vmul.f32 %v3090_v58, %v3088_v57  ;;  %v3092_v20 = vpop.eup %3091  ;;  %v1233_v45 = vmul.f32 %v3090_v58, %v1231_v30 }
 0xc31   :  { %v1226_v13 = vadd.f32 1.0, %v3092_v20 }
 0xc32   :  { %1236 = vrot.lane.b32.xlu0 %v1234_v25, %s3161_s30 }
 0xc33   :  { %3093 = vrcp.f32 %v1226_v13 }
 0xc40   :  { %v3094_v46 = vpop.eup %3093 }
 0xca4   :  { %v1237_v60 = vpop.permute.xlu0 %1236 }
 0xca5   :  { %v1239_v61 = vadd.f32 %v1237_v60, %v1233_v45  ;;  %v845_v45 = vsel %vm825_vm6, %v3642_v29, 0.0  ;;  %v539_v60 = vsel %vm519_vm0, %v3536_v51, 0.0  ;;  %vm2412_vm6 = vcmp.eq.s32.totalorder %v3262_v9, 2 }
 0xca7   :  { %3095 = vtanh.f32 %v1239_v61  ;;  %1251 = vrot.lane.b32.xlu0 %v1239_v61, %s3161_s30  ;;  %v532_v61 = vsel %vm513_vm15, %v3536_v51, 0.0  ;;  %v1458_v51 = vld [vmem:[%s4343_s5 + $0x38] sm:$0xff] }
 0xca8   :  { %2861 = vmatprep.subr.mxu1 %v1458_v51 }
 0xca9   :  { %2862 = vmatpush3.msra.mxu1 %v1458_v51 }
 0xcaa   :  { %2863 = vmatprep.subr.mxu1 %v1457_v0 }
 0xcab   :  { %2864 = vmatpush3.msra.mxu1 %v1457_v0 }
 0xcac   :  { %2865 = vmatprep.subr.mxu1 %v1456_v35 }
 0xcad   :  { %2866 = vmatpush3.msra.mxu1 %v1456_v35 }
 0xcae   :  { %2867 = vmatprep.subr.mxu1 %v1455_v40 }
 0xcaf   :  { %2868 = vmatpush3.msra.mxu1 %v1455_v40 }
 0xcb0   :  { %2869 = vmatprep.subr.mxu1 %v1454_v34 }
 0xcb1   :  { %2870 = vmatpush3.msra.mxu1 %v1454_v34 }
 0xcb2   :  { %2871 = vmatprep.subr.mxu1 %v1453_v3 }
 0xcb3   :  { %2872 = vmatpush3.msra.mxu1 %v1453_v3 }
 0xcb4   :  { %v3096_v36 = vpop.eup %3095 }
 0xcb5   :  { %v1241_v38 = vmul.f32 %v3096_v36, %v3094_v46 }
 0xcb7   :  { %1246 = vrot.lane.b32.xlu1 %v1241_v38, %s3161_s30  ;;  %v1262_v11 = vsel %vm513_vm15, %v1241_v38, 0.0  ;;  %v1255_v23 = vsel %vm519_vm0, %v1241_v38, 0.0  ;;  %vm2008_vm15 = vcmp.eq.s32.totalorder %v3262_v9, 0  ;;  %vm2210_vm0 = vcmp.eq.s32.totalorder %v3262_v9, 1 }
 0xd19   :  { %v1252_v8 = vpop.permute.xlu0 %1251 }
 0xd1a   :  { %v1254_v10 = vsel %vm1244_vm14, %v1252_v8, %v1115_v52  ;;  %v1452_v8 = vld [vmem:[%s4343_s5 + $0x8] sm:$0xff] }
 0xd1b   :  { %1369 = vrot.lane.b32.xlu1 %v1254_v10, %s3161_s30  ;;  %v1451_v10 = vld [vmem:[%s4343_s5] sm:$0xff]  ;;  %2873 = vmatprep.subr.mxu1 %v1452_v8 }
 0xd1c   :  { %2874 = vmatpush3.msra.mxu1 %v1452_v8 }
 0xd1d   :  { %2875 = vmatprep.subr.mxu1 %v1451_v10 }
 0xd1e   :  { %2876 = vmatpush3.msra.mxu1 %v1451_v10 }
 0xd1f   :  { %1264 = vrot.lane.b32.xlu1 %v1262_v11, %s3162_s4  ;;  %2910 = vmatprep.subr.mxu1 %v3159_v5 }
 0xd23   :  { %986 = vrot.lane.b32.xlu1 %v984_v4, %s3162_s4 }
 0xd27   :  { %694 = vrot.lane.b32.xlu1 %v692_v12, %s3162_s4 }
 0xd29   :  { %v1247_v14 = vpop.permute.xlu1 %1246 }
 0xd2a   :  { %v1249_v17 = vsel %vm1244_vm14, %v1247_v14, %v1110_v54 }
 0xd2b   :  { %2773 = vmatmul.mubr.msk.f32.vlgmr.msra.gmra.mxu0 %vm50_vm4, %v1249_v17  ;;  %388 = vrot.lane.b32.xlu1 %v386_v18, %s3162_s4 }
 0xd2f   :  { %381 = vrot.lane.b32.xlu1 %v379_v19, %s3161_s30 }
 0xd33   :  { %687 = vrot.lane.b32.xlu1 %v685_v21, %s3161_s30 }
 0xd37   :  { %979 = vrot.lane.b32.xlu1 %v977_v22, %s3161_s30 }
 0xd3b   :  { %1257 = vrot.lane.b32.xlu1 %v1255_v23, %s3161_s30 }
 0xd8d   :  { %v1370_v1 = vpop.permute.xlu1 %1369 }
 0xd91   :  { %v1265_v24 = vpop.permute.xlu1 %1264 }
 0xd92   :  { %1268 = vst.msk [vmem:[#allocation4 + $0x4] sm:$0xf] %vm384_vm1, %v1265_v24 }
 0xd95   :  { %v987_v26 = vpop.permute.xlu1 %986 }
 0xd96   :  { %990 = vst.msk [vmem:[#allocation4 + $0xc] sm:$0xf] %vm384_vm1, %v987_v26 }
 0xd99   :  { %v695_v63 = vpop.permute.xlu1 %694  ;;  %v1403_v33 = vld [vmem:[#allocation4 + $0x4] sm:$0xf] }
 0xd9a   :  { %698 = vst.msk [vmem:[#allocation4 + $0x14] sm:$0xf] %vm384_vm1, %v695_v63 }
 0xd9d   :  { %v389_v27 = vpop.permute.xlu1 %388  ;;  %v1405_v46 = vld [vmem:[#allocation4 + $0xc] sm:$0xf] }
 0xd9e   :  { %392 = vst.msk [vmem:[#allocation4 + $0x1c] sm:$0xf] %vm384_vm1, %v389_v27 }
 0xda1   :  { %v382_v42 = vpop.permute.xlu1 %381  ;;  %v1407_v36 = vld [vmem:[#allocation4 + $0x14] sm:$0xf] }
 0xda2   :  { %385 = vst.msk [vmem:[#allocation3] sm:$0xf] %vm384_vm1, %v382_v42 }
 0xda5   :  { %v688_v28 = vpop.permute.xlu1 %687  ;;  %v1409_v38 = vld [vmem:[#allocation4 + $0x1c] sm:$0xf] }
 0xda6   :  { %691 = vst.msk [vmem:[#allocation3 + $0x8] sm:$0xf] %vm384_vm1, %v688_v28 }
 0xda9   :  { %v980_v31 = vpop.permute.xlu1 %979 }
 0xdaa   :  { %983 = vst.msk [vmem:[#allocation3 + $0x10] sm:$0xf] %vm384_vm1, %v980_v31  ;;  %v1394_v31 = vld [vmem:[#allocation3] sm:$0xf] }
 0xdad   :  { %v1258_v43 = vpop.permute.xlu1 %1257 }
 0xdae   :  { %1261 = vst.msk [vmem:[#allocation3 + $0x18] sm:$0xf] %vm384_vm1, %v1258_v43 }
 0xdeb   :  { %v1348_v37 = vpop.f32.mrf.mxu0 }
 0xdec   :  { %v1353_v44 = vadd.f32 %v1348_v37, %v3471_v48  ;;  %v1396_v37 = vld [vmem:[#allocation3 + $0x8] sm:$0xf] }
 0xded   :  { %v1350_v52 = vpop.f32.mrf.mxu0 }
 0xdee   :  { %v2774_v50 = vmul.f32 -1.442695, %v1353_v44  ;;  %v1354_v53 = vadd.f32 %v1350_v52, %v3474_v49 }
 0xdf0   :  { %3097 = vpow2.f32 %v2774_v50  ;;  %v2775_v48 = vmul.f32 -1.442695, %v1354_v53 }
 0xdf1   :  { %3099 = vtanh.f32 %v1354_v53 }
 0xdfd   :  { %v3098_v54 = vpop.eup %3097 }
 0xdfe   :  { %v1358_v55 = vadd.f32 1.0, %v3098_v54  ;;  %v3100_v47 = vpop.eup %3099 }
 0xe00   :  { %3101 = vrcp.f32 %v1358_v55 }
 0xe01   :  { %3103 = vpow2.f32 %v2775_v48 }
 0xe0d   :  { %v3102_v56 = vpop.eup %3101 }
 0xe0e   :  { %v1373_v41 = vmul.f32 %v3102_v56, %v3100_v47  ;;  %v3104_v7 = vpop.eup %3103  ;;  %v1372_v49 = vmul.f32 %v3102_v56, %v1370_v1  ;;  %v1398_v47 = vld [vmem:[#allocation3 + $0x10] sm:$0xf] }
 0xe0f   :  { %v1365_v16 = vadd.f32 1.0, %v3104_v7 }
 0xe10   :  { %1375 = vrot.lane.b32.xlu0 %v1373_v41, %s3161_s30 }
 0xe11   :  { %3105 = vrcp.f32 %v1365_v16 }
 0xe14   :  { %1125 = vrot.lane.b32.xlu0 %v1123_v6, %s3162_s4 }
 0xe1e   :  { %v3106_v20 = vpop.eup %3105 }
 0xe82   :  { %v1376_v57 = vpop.permute.xlu0 %1375 }
 0xe83   :  { %v1378_v58 = vadd.f32 %v1376_v57, %v1372_v49  ;;  %v1400_v49 = vld [vmem:[#allocation3 + $0x18] sm:$0xf] }
 0xe85   :  { %3107 = vtanh.f32 %v1378_v58 }
 0xe86   :  { %v1126_v25 = vpop.permute.xlu0 %1125 }
 0xe87   :  { %1129 = vst.msk [vmem:[#allocation4 + $0x8] sm:$0xf] %vm384_vm1, %v1126_v25 }
 0xe8e   :  { %v1404_v59 = vld [vmem:[#allocation4 + $0x8] sm:$0xf] }
 0xe8f   :  { %1422 = vrot.lane.b32.xlu1 %v1404_v59, %s3162_s4 }
 0xe92   :  { %v3108_v39 = vpop.eup %3107 }
 0xe93   :  { %v1380_v30 = vmul.f32 %v3108_v39, %v3106_v20  ;;  %v1568_v20 = vld [vmem:[%s4344_s6] sm:$0xff] }
 0xe94   :  { %2883 = vmatprep.subr.mxu0 %v1568_v20 }
 0xe95   :  { %v1388_v13 = vsel %vm358_vm8, %v1380_v30, 0.0  ;;  %v1381_v29 = vsel %vm366_vm9, %v1380_v30, 0.0  ;;  %2884 = vmatpush3.msra.mxu0 %v1568_v20  ;;  %vm1569_vm8 = vcmask 64512   ;;  %vm1679_vm9 = vcmask 27648  }
 0xe96   :  { %1390 = vrot.lane.b32.xlu0 %v1388_v13, %s3162_s4  ;;  %2891 = vmatprep.subr.mxu0 %v3159_v5 }
 0xe9a   :  { %847 = vrot.lane.b32.xlu0 %v845_v45, %s3162_s4 }
 0xe9e   :  { %541 = vrot.lane.b32.xlu0 %v539_v60, %s3162_s4 }
 0xea2   :  { %534 = vrot.lane.b32.xlu0 %v532_v61, %s3161_s30 }
 0xea6   :  { %840 = vrot.lane.b32.xlu0 %v838_v2, %s3161_s30 }
 0xeaa   :  { %1118 = vrot.lane.b32.xlu0 %v1116_v62, %s3161_s30 }
 0xeae   :  { %1420 = vrot.lane.b32.xlu0 %v1403_v33, %s3162_s4 }
 0xeb2   :  { %1424 = vrot.lane.b32.xlu0 %v1405_v46, %s3162_s4 }
 0xeb6   :  { %1383 = vrot.lane.b32.xlu0 %v1381_v29, %s3161_s30 }
 0xeba   :  { %1428 = vrot.lane.b32.xlu0 %v1407_v36, %s3162_s4 }
 0xebe   :  { %1432 = vrot.lane.b32.xlu0 %v1409_v38, %s3162_s4 }
 0xf01   :  { %v1423_v26 = vpop.permute.xlu1 %1422 }
 0xf02   :  { %v3869_v52 = vsel %vm1442_vm7, %v1396_v37, %v1423_v26 }
 0xf08   :  { %v1391_v11 = vpop.permute.xlu0 %1390 }
 0xf09   :  { %1393 = vst.msk [vmem:[#allocation4] sm:$0xf] %vm384_vm1, %v1391_v11 }
 0xf0c   :  { %v848_v4 = vpop.permute.xlu0 %847 }
 0xf0d   :  { %851 = vst.msk [vmem:[#allocation4 + $0x10] sm:$0xf] %vm384_vm1, %v848_v4 }
 0xf10   :  { %v542_v12 = vpop.permute.xlu0 %541  ;;  %v1402_v14 = vld [vmem:[#allocation4] sm:$0xf] }
 0xf11   :  { %545 = vst.msk [vmem:[#allocation4 + $0x18] sm:$0xf] %vm384_vm1, %v542_v12  ;;  %1418 = vrot.lane.b32.xlu1 %v1402_v14, %s3162_s4 }
 0xf14   :  { %v535_v17 = vpop.permute.xlu0 %534  ;;  %v1406_v18 = vld [vmem:[#allocation4 + $0x10] sm:$0xf] }
 0xf15   :  { %538 = vst.msk [vmem:[#allocation3 + $0x4] sm:$0xf] %vm384_vm1, %v535_v17  ;;  %1426 = vrot.lane.b32.xlu1 %v1406_v18, %s3162_s4 }
 0xf18   :  { %v841_v19 = vpop.permute.xlu0 %840  ;;  %v1408_v21 = vld [vmem:[#allocation4 + $0x18] sm:$0xf] }
 0xf19   :  { %844 = vst.msk [vmem:[#allocation3 + $0xc] sm:$0xf] %vm384_vm1, %v841_v19  ;;  %1430 = vrot.lane.b32.xlu1 %v1408_v21, %s3162_s4 }
 0xf1c   :  { %v1119_v22 = vpop.permute.xlu0 %1118  ;;  %v1395_v27 = vld [vmem:[#allocation3 + $0x4] sm:$0xf] }
 0xf1d   :  { %1122 = vst.msk [vmem:[#allocation3 + $0x14] sm:$0xf] %vm384_vm1, %v1119_v22 }
 0xf20   :  { %v1421_v23 = vpop.permute.xlu0 %1420  ;;  %v1397_v63 = vld [vmem:[#allocation3 + $0xc] sm:$0xf] }
 0xf21   :  { %v3863_v44 = vsel %vm1442_vm7, %v1395_v27, %v1421_v23 }
 0xf24   :  { %v1425_v1 = vpop.permute.xlu0 %1424  ;;  %v1399_v55 = vld [vmem:[#allocation3 + $0x14] sm:$0xf] }
 0xf25   :  { %v3860_v42 = vsel %vm1442_vm7, %v1397_v63, %v1425_v1 }
 0xf26   :  { %v1468_v54 = vcombine.low %v3869_v52, %v3860_v42 }
 0xf28   :  { %v1384_v24 = vpop.permute.xlu0 %1383 }
 0xf29   :  { %1387 = vst.msk [vmem:[#allocation3 + $0x1c] sm:$0xf] %vm384_vm1, %v1384_v24 }
 0xf2c   :  { %v1429_v28 = vpop.permute.xlu0 %1428 }
 0xf2d   :  { %v3877_v41 = vsel %vm1442_vm7, %v1399_v55, %v1429_v28 }
 0xf30   :  { %v1401_v48 = vld [vmem:[#allocation3 + $0x1c] sm:$0xf]  ;;  %v1433_v7 = vpop.permute.xlu0 %1432 }
 0xf31   :  { %v3887_v58 = vsel %vm1442_vm7, %v1401_v48, %v1433_v7 }
 0xf83   :  { %v1419_v43 = vpop.permute.xlu1 %1418 }
 0xf84   :  { %v3866_v50 = vsel %vm1442_vm7, %v1394_v31, %v1419_v43 }
 0xf85   :  { %v1467_v53 = vcombine.low %v3866_v50, %v3863_v44 }
 0xf87   :  { %2877 = vmatprep.mubr.msk.f32.mxu1 %vm50_vm4, %v1467_v53  ;;  %v1427_v56 = vpop.permute.xlu1 %1426 }
 0xf88   :  { %v3880_v6 = vsel %vm1442_vm7, %v1398_v47, %v1427_v56  ;;  %2878 = vmatmul.mubr.msk.f32.vlgmr.msra.gmra.mxu1 %vm50_vm4, %v1468_v54 }
 0xf89   :  { %v1469_v16 = vcombine.low %v3880_v6, %v3877_v41 }
 0xf8b   :  { %2880 = vmatprep.mubr.msk.f32.mxu1 %vm50_vm4, %v1469_v16  ;;  %v1431_v57 = vpop.permute.xlu1 %1430 }
 0xf8c   :  { %v3890_v25 = vsel %vm1442_vm7, %v1400_v49, %v1431_v57 }
 0xf8d   :  { %v1470_v59 = vcombine.low %v3890_v25, %v3887_v58 }
 0xf8f   :  { %2881 = vmatmul.mubr.msk.f32.gmra.mxu1 %vm50_vm4, %v1470_v59 }
 0xf90   :  { %2926 = vmatprep.mubr.msk.f32.mxu1 %vm3166_vm12, %v3159_v5 }
0x1048   :  { %v2879_v39 = vpop.f32.mrf.mxu1 }
0x104a   :  { %v1545_v30 = vpop.f32.mrf.mxu1 }
0x104b   :  { %3109 = vtanh.f32 %v1545_v30 }
0x104c   :  { %3111 = vtanh.f32 %v2879_v39 }
0x104f   :  { %v2882_v13 = vpop.f32.mrf.mxu1 }
0x1051   :  { %v1555_v45 = vpop.f32.mrf.mxu1 }
0x1052   :  { %3113 = vtanh.f32 %v1555_v45 }
0x1053   :  { %3115 = vtanh.f32 %v2882_v13 }
0x1058   :  { %v3110_v60 = vpop.eup %3109 }
0x1059   :  { %v3112_v61 = vpop.eup %3111  ;;  %2885 = vmatprep.mubr.msk.f32.mxu0 %vm1569_vm8, %v3110_v60 }
0x105a   :  { %2886 = vmatmul.mubr.msk.f32.vlgmr.msra.gmra.mxu0 %vm1569_vm8, %v3112_v61 }
0x105f   :  { %v3114_v2 = vpop.eup %3113 }
0x1060   :  { %v3116_v62 = vpop.eup %3115  ;;  %2888 = vmatprep.mubr.msk.f32.mxu0 %vm1569_vm8, %v3114_v2 }
0x1061   :  { %2889 = vmatmul.mubr.msk.f32.gmra.mxu0 %vm1569_vm8, %v3116_v62 }
0x1062   :  { %2907 = vmatprep.mubr.msk.f32.mxu0 %vm3166_vm12, %v3159_v5 }
0x111a   :  { %v2887_v33 = vpop.f32.mrf.mxu0 }
0x111b   :  { %v1672_v46 = vcombine.high %v2887_v33, %v2887_v33  ;;  %v1682_v11 = vsel %vm1679_vm9, %v2887_v33, -inf }
0x111c   :  { %v1648_v51 = vpop.f32.mrf.mxu0 }
0x111d   :  { %v1671_v35 = vcombine.high %v1648_v51, %v1648_v51  ;;  %v1683_v40 = vsel %vm1679_vm9, %v1672_v46, -inf  ;;  %v1680_v4 = vsel %vm1679_vm9, %v1648_v51, -inf }
0x111f   :  { %v1681_v12 = vsel %vm1679_vm9, %v1671_v35, -inf }
0x1121   :  { %v2890_v0 = vpop.f32.mrf.mxu0 }
0x1122   :  { %v1674_v29 = vcombine.high %v2890_v0, %v2890_v0  ;;  %v1688_v36 = vsel %vm1679_vm9, %v2890_v0, -inf }
0x1123   :  { %v1658_v34 = vpop.f32.mrf.mxu0  ;;  %v1689_v17 = vmax.f32 %v1682_v11, %v1688_v36 }
0x1124   :  { %v1690_v3 = vsel %vm1679_vm9, %v1674_v29, -inf  ;;  %v1673_v38 = vcombine.high %v1658_v34, %v1658_v34  ;;  %v1684_v8 = vsel %vm1679_vm9, %v1658_v34, -inf }
0x1125   :  { %v1691_v10 = vmax.f32 %v1683_v40, %v1690_v3  ;;  %v1685_v18 = vmax.f32 %v1680_v4, %v1684_v8  ;;  %v3163_v4 = vmov 1  }
0x1126   :  { %v1686_v14 = vsel %vm1679_vm9, %v1673_v38, -inf }
0x1127   :  { %v1687_v19 = vmax.f32 %v1681_v12, %v1686_v14  ;;  %v1693_v21 = vmax.f32 %v1689_v17, %v1691_v10 }
0x1129   :  { %v1692_v22 = vmax.f32 %v1685_v18, %v1687_v19  ;;  %v3164_v19 = vmov 2  }
0x112b   :  { %v1694_v23 = vmax.f32 %v1692_v22, %v1693_v21  ;;  %v3165_v22 = vmov 3  }
0x112d   :  { %v1695_v1 = vsub.f32 %v1648_v51, %v1694_v23  ;;  %v1696_v24 = vsub.f32 %v1671_v35, %v1694_v23  ;;  %v1697_v26 = vsub.f32 %v2887_v33, %v1694_v23  ;;  %v1698_v63 = vsub.f32 %v1672_v46, %v1694_v23 }
0x112e   :  { %v1699_v27 = vsub.f32 %v1658_v34, %v1694_v23  ;;  %v1700_v37 = vsub.f32 %v1673_v38, %v1694_v23  ;;  %v1701_v54 = vsub.f32 %v2890_v0, %v1694_v23  ;;  %v1702_v47 = vsub.f32 %v1674_v29, %v1694_v23  ;;  %v1798_v23 = vld [vmem:[%s4345_s7 + $0x78] sm:$0xff] }
0x112f   :  { %v1703_v28 = vmul.f32 1.442695, %v1695_v1  ;;  %v1705_v31 = vmul.f32 1.442695, %v1696_v24  ;;  %v1707_v43 = vmul.f32 1.442695, %v1697_v26  ;;  %2911 = vmatpush3.msra.mxu1 %v1798_v23 }
0x1130   :  { %v1709_v53 = vmul.f32 1.442695, %v1698_v63  ;;  %v1711_v55 = vmul.f32 1.442695, %v1699_v27  ;;  %v1713_v56 = vmul.f32 1.442695, %v1700_v37  ;;  %2912 = vmatprep.subr.mxu1 %v3159_v5 }
0x1131   :  { %3117 = vpow2.f32 %v1703_v28  ;;  %v1715_v48 = vmul.f32 1.442695, %v1701_v54  ;;  %v1717_v7 = vmul.f32 1.442695, %v1702_v47  ;;  %v1789_v1 = vld [vmem:[%s4345_s7 + $0x30] sm:$0xff]  ;;  %v1788_v26 = vld [vmem:[%s4345_s7 + $0x28] sm:$0xff] }
0x1132   :  { %3119 = vpow2.f32 %v1705_v31  ;;  %v1797_v24 = vld [vmem:[%s4345_s7 + $0x70] sm:$0xff]  ;;  %v1796_v63 = vld [vmem:[%s4345_s7 + $0x68] sm:$0xff]  ;;  %v2786_v27 = vsel %vm2008_vm15, 1.0, %v3159_v5  ;;  %v2788_v28 = vsel %vm2210_vm0, 1.0, %v3159_v5  ;;  %v1787_v31 = vld [vmem:[%s4345_s7 + $0x20] sm:$0xff] }
0x1133   :  { %3121 = vpow2.f32 %v1707_v43  ;;  %2913 = vmatpush3.msra.mxu1 %v1797_v24  ;;  %v1795_v43 = vld [vmem:[%s4345_s7 + $0x60] sm:$0xff]  ;;  %v3004_v37 = vpack.i.bf16 %v2788_v28, %v2786_v27  ;;  %v1794_v54 = vld [vmem:[%s4345_s7 + $0x58] sm:$0xff]  ;;  %v1793_v47 = vld [vmem:[%s4345_s7 + $0x50] sm:$0xff] }
0x1134   :  { %3123 = vpow2.f32 %v1709_v53  ;;  %2914 = vmatprep.subr.mxu1 %v3159_v5  ;;  %v1786_v53 = vld [vmem:[%s4345_s7 + $0x18] sm:$0xff] }
0x1135   :  { %3125 = vpow2.f32 %v1711_v55  ;;  %2915 = vmatpush3.msra.mxu1 %v1796_v63  ;;  %v1785_v55 = vld [vmem:[%s4345_s7 + $0x10] sm:$0xff] }
0x1136   :  { %3127 = vpow2.f32 %v1713_v56  ;;  %2916 = vmatprep.subr.mxu1 %v3159_v5  ;;  %v1784_v56 = vld [vmem:[%s4345_s7 + $0x8] sm:$0xff] }
0x1137   :  { %3129 = vpow2.f32 %v1715_v48  ;;  %2917 = vmatpush3.msra.mxu1 %v1795_v43  ;;  %v2792_v48 = vsel %vm2614_vm11, 1.0, %v3159_v5 }
0x1138   :  { %3131 = vpow2.f32 %v1717_v7  ;;  %2918 = vmatprep.subr.mxu1 %v3159_v5  ;;  %v1792_v7 = vld [vmem:[%s4345_s7 + $0x48] sm:$0xff] }
0x1139   :  { %2919 = vmatpush3.msra.mxu1 %v1794_v54 }
0x113a   :  { %2920 = vmatprep.subr.mxu1 %v3159_v5 }
0x113b   :  { %2921 = vmatpush3.msra.mxu1 %v1793_v47 }
0x113c   :  { %2922 = vmatprep.subr.mxu1 %v3159_v5 }
0x113d   :  { %2923 = vmatpush3.msra.mxu1 %v1792_v7 }
0x113e   :  { %v3118_v16 = vpop.eup %3117  ;;  %2924 = vmatprep.subr.mxu1 %v3159_v5 }
0x113f   :  { %v3120_v49 = vpop.eup %3119  ;;  %v1719_v57 = vsel %vm1679_vm9, %v3118_v16, 0.0 }
0x1140   :  { %v3122_v59 = vpop.eup %3121  ;;  %v1720_v20 = vsel %vm1679_vm9, %v3120_v49, 0.0 }
0x1141   :  { %v3124_v39 = vpop.eup %3123  ;;  %v1721_v30 = vadd.f32 %v1720_v20, %v1719_v57  ;;  %v1722_v13 = vsel %vm1679_vm9, %v3122_v59, 0.0  ;;  %v2790_v57 = vsel %vm2412_vm6, 1.0, %v3159_v5 }
0x1142   :  { %v3126_v45 = vpop.eup %3125  ;;  %v1724_v61 = vsel %vm1679_vm9, %v3124_v39, 0.0 }
0x1143   :  { %v1723_v60 = vadd.f32 %v1722_v13, %v1721_v30  ;;  %v3128_v2 = vpop.eup %3127  ;;  %v1726_v33 = vsel %vm1679_vm9, %v3126_v45, 0.0 }
0x1144   :  { %v3130_v46 = vpop.eup %3129  ;;  %v1728_v0 = vsel %vm1679_vm9, %v3128_v2, 0.0 }
0x1145   :  { %v1725_v62 = vadd.f32 %v1724_v61, %v1723_v60  ;;  %v3132_v35 = vpop.eup %3131  ;;  %v1730_v40 = vsel %vm1679_vm9, %v3130_v46, 0.0 }
0x1146   :  { %v1732_v36 = vsel %vm1679_vm9, %v3132_v35, 0.0 }
0x1147   :  { %v1727_v51 = vadd.f32 %v1726_v33, %v1725_v62 }
0x1149   :  { %v1729_v29 = vadd.f32 %v1728_v0, %v1727_v51 }
0x114b   :  { %v1731_v34 = vadd.f32 %v1730_v40, %v1729_v29 }
0x114d   :  { %v1733_v3 = vadd.f32 %v1732_v36, %v1731_v34  ;;  %v3167_v34 = vmov 839922192  }
0x114e   :  { %v1821_v36 = vunpack.c.l.s4 %v3167_v34 }
0x114f   :  { %3133 = vrcp.f32 %v1733_v3 }
0x115c   :  { %v3134_v38 = vpop.eup %3133 }
0x115d   :  { %v1736_v8 = vmul.f32 %v3134_v38, %v3120_v49  ;;  %v3915_v10 = vmul.f32 %v3134_v38, %v3118_v16  ;;  %v1737_v11 = vmul.f32 %v3134_v38, %v3122_v59  ;;  %v3919_v12 = vmul.f32 %v3134_v38, %v3124_v39  ;;  %v1783_v16 = vld [vmem:[%s4345_s7] sm:$0xff] }
0x115e   :  { %v3927_v14 = vmul.f32 %v3134_v38, %v3128_v2  ;;  %v3929_v17 = vmul.f32 %v3134_v38, %v3126_v45  ;;  %v3934_v18 = vmul.f32 %v3134_v38, %v3130_v46  ;;  %v3946_v21 = vmul.f32 %v3134_v38, %v3132_v35  ;;  %v1791_v49 = vld [vmem:[%s4345_s7 + $0x40] sm:$0xff] }
0x115f   :  { %1828 = vperm.xlu0 %2989, %v1736_v8   ;;  %1817 = vperm.xlu1 %2988, %v3915_v10  }
0x1160   :  { %2925 = vmatpush3.msra.mxu1 %v1791_v49 }
0x1161   :  { %2948 = vmatprep.subr.mxu1 %v3159_v5 }
0x1163   :  { %2990 = vset.pattern.permute.xlu0 %v3163_v4  ;;  %1839 = vperm.xlu1 %2988, %v1737_v11  }
0x1164   :  { %2026 = vperm.xlu0 %2990, %v3915_v10  }
0x1167   :  { %2991 = vset.pattern.permute.xlu1 %v3163_v4 }
0x1168   :  { %2048 = vperm.xlu0 %2990, %v1737_v11   ;;  %2037 = vperm.xlu1 %2991, %v1736_v8  }
0x116c   :  { %1753 = vrot.lane.b32.xlu0 %v1736_v8, %s3161_s30  ;;  %2992 = vset.pattern.permute.xlu1 %v3160_v15 }
0x116d   :  { %1850 = vperm.xlu1 %2992, %v3919_v12  }
0x1170   :  { %2059 = vperm.xlu0 %2990, %v3919_v12  }
0x1171   :  { %1751 = vrot.lane.b32.xlu1 %v3915_v10, %s3161_s30 }
0x1174   :  { %2993 = vset.pattern.permute.xlu0 %v3160_v15 }
0x1175   :  { %1872 = vperm.xlu0 %2993, %v3927_v14   ;;  %1861 = vperm.xlu1 %2992, %v3929_v17  }
0x1179   :  { %1883 = vperm.xlu0 %2993, %v3934_v18   ;;  %1755 = vrot.lane.b32.xlu1 %v1737_v11, %s3161_s30 }
0x117a   :  { %2994 = vset.pattern.permute.xlu1 %v3163_v4 }
0x117d   :  { %1759 = vrot.lane.b32.xlu0 %v3929_v17, %s3161_s30  ;;  %2070 = vperm.xlu1 %2994, %v3929_v17  }
0x117e   :  { %2996 = vset.pattern.permute.xlu0 %v3163_v4 }
0x1181   :  { %2092 = vperm.xlu0 %2996, %v3934_v18   ;;  %1757 = vrot.lane.b32.xlu1 %v3919_v12, %s3161_s30 }
0x1185   :  { %2998 = vset.pattern.permute.xlu0 %v3164_v19  ;;  %2081 = vperm.xlu1 %2994, %v3927_v14  }
0x1186   :  { %2228 = vperm.xlu0 %2998, %v3915_v10  }
0x1189   :  { %2995 = vset.pattern.permute.xlu1 %v3160_v15  ;;  %v1790_v15 = vld [vmem:[%s4345_s7 + $0x38] sm:$0xff] }
0x118a   :  { %2250 = vperm.xlu0 %2998, %v1737_v11   ;;  %1894 = vperm.xlu1 %2995, %v3946_v21  }
0x118b   :  { %2892 = vmatpush3.msra.mxu0 %v1790_v15 }
0x118c   :  { %2893 = vmatprep.subr.mxu0 %v3159_v5 }
0x118d   :  { %2894 = vmatpush3.msra.mxu0 %v1789_v1 }
0x118e   :  { %3001 = vset.pattern.permute.xlu0 %v3165_v22  ;;  %1761 = vrot.lane.b32.xlu1 %v3927_v14, %s3161_s30 }
0x118f   :  { %2441 = vperm.xlu0 %3001, %v1736_v8   ;;  %2997 = vset.pattern.permute.xlu1 %v3163_v4 }
0x1190   :  { %2895 = vmatprep.subr.mxu0 %v3159_v5 }
0x1191   :  { %2896 = vmatpush3.msra.mxu0 %v1788_v26 }
0x1192   :  { %2103 = vperm.xlu1 %2997, %v3946_v21   ;;  %2897 = vmatprep.subr.mxu0 %v3159_v5 }
0x1193   :  { %2452 = vperm.xlu0 %3001, %v1737_v11   ;;  %2898 = vmatpush3.msra.mxu0 %v1787_v31 }
0x1194   :  { %2899 = vmatprep.subr.mxu0 %v3159_v5 }
0x1195   :  { %2900 = vmatpush3.msra.mxu0 %v1786_v53 }
0x1196   :  { %2999 = vset.pattern.permute.xlu1 %v3164_v19  ;;  %2901 = vmatprep.subr.mxu0 %v3159_v5 }
0x1197   :  { %2463 = vperm.xlu0 %3001, %v3919_v12   ;;  %2239 = vperm.xlu1 %2999, %v1736_v8   ;;  %v1822_v8 = vunpack.c.0.s8 %v1821_v36 }
0x1198   :  { %2902 = vmatpush3.msra.mxu0 %v1785_v55 }
0x1199   :  { %2903 = vmatprep.subr.mxu0 %v3159_v5  ;;  %v4067_v4 = vsub.s32 %v1822_v8, %v3423_v32 }
0x119a   :  { %2904 = vmatpush3.msra.mxu0 %v1784_v56 }
0x119b   :  { %2474 = vperm.xlu0 %3001, %v3929_v17   ;;  %1763 = vrot.lane.b32.xlu1 %v3934_v18, %s3161_s30 }
0x119c   :  { %3000 = vset.pattern.permute.xlu1 %v3165_v22  ;;  %2905 = vmatprep.subr.mxu0 %v3159_v5 }
0x119d   :  { %2906 = vmatpush3.msra.mxu0 %v1783_v16 }
0x119e   :  { %2929 = vmatprep.subr.mxu0 %v3159_v5 }
0x119f   :  { %2485 = vperm.xlu0 %3001, %v3927_v14   ;;  %2430 = vperm.xlu1 %3000, %v3915_v10  }
0x11a3   :  { %2496 = vperm.xlu0 %3001, %v3934_v18   ;;  %1765 = vrot.lane.b32.xlu1 %v3946_v21, %s3161_s30 }
0x11a4   :  { %3002 = vset.pattern.permute.xlu1 %v3164_v19 }
0x11a7   :  { %2261 = vperm.xlu1 %3002, %v3919_v12   ;;  %3005 = vrot.lane.b32.xlu0 %v3004_v37, %s3161_s30 }
0x11ab   :  { %2272 = vperm.xlu1 %3002, %v3929_v17   ;;  %2618 = vrot.lane.b32.xlu0 %v2792_v48, %s3161_s30 }
0x11af   :  { %2283 = vperm.xlu1 %3002, %v3927_v14  }
0x11b3   :  { %2294 = vperm.xlu1 %3002, %v3934_v18  }
0x11b7   :  { %2305 = vperm.xlu1 %3002, %v3946_v21  }
0x11bb   :  { %3003 = vset.pattern.permute.xlu1 %v3165_v22 }
0x11bc   :  { %2507 = vperm.xlu1 %3003, %v3946_v21  }
0x11c0   :  { %2416 = vrot.lane.b32.xlu1 %v2790_v57, %s3161_s30 }
0x11da   :  { %v1829_v59 = vpop.permute.xlu0 %1828  ;;  %v1818_v20 = vpop.permute.xlu1 %1817 }
0x11db   :  { %v1826_v18 = vrot.slane %v1818_v20, %v4067_v4  ;;  %v1837_v21 = vrot.slane %v1829_v59, %v4067_v4 }
0x11de   :  { %v1840_v39 = vpop.permute.xlu1 %1839 }
0x11df   :  { %v2027_v30 = vpop.permute.xlu0 %2026  ;;  %v1848_v23 = vrot.slane %v1840_v39, %v4067_v4 }
0x11e0   :  { %v2035_v22 = vrot.slane %v2027_v30, %v4067_v4 }
0x11e3   :  { %v2049_v13 = vpop.permute.xlu0 %2048  ;;  %v2038_v45 = vpop.permute.xlu1 %2037 }
0x11e4   :  { %v2046_v1 = vrot.slane %v2038_v45, %v4067_v4 }
0x11e7   :  { %v1754_v60 = vpop.permute.xlu0 %1753 }
0x11e8   :  { %v1851_v61 = vpop.permute.xlu1 %1850  ;;  %v4078_v19 = vsel %vm50_vm4, %v3863_v44, %v1754_v60  ;;  %v2057_v44 = vrot.slane %v2049_v13, %v4067_v4 }
0x11e9   :  { %v1905_v26 = vmul.f32 %v1837_v21, %v4078_v19  ;;  %v1859_v28 = vrot.slane %v1851_v61, %v4067_v4 }
0x11eb   :  { %v2060_v2 = vpop.permute.xlu0 %2059 }
0x11ec   :  { %v1752_v62 = vpop.permute.xlu1 %1751  ;;  %v2068_v43 = vrot.slane %v2060_v2, %v4067_v4 }
0x11ed   :  { %v4071_v14 = vsel %vm50_vm4, %v3866_v50, %v1752_v62 }
0x11ee   :  { %v1904_v32 = vmul.f32 %v1826_v18, %v4071_v14  ;;  %v2113_v63 = vmul.f32 %v2035_v22, %v4071_v14 }
0x11f0   :  { %v4050_v33 = vpop.permute.xlu0 %1872  ;;  %v4052_v9 = vpop.permute.xlu1 %1861  ;;  %v1913_v37 = vsel %vm1912_vm10, %v1904_v32, 0.0  ;;  %v2121_v56 = vsel %vm1912_vm10, %v2113_v63, 0.0 }
0x11f1   :  { %v1881_v13 = vrot.slane %v4050_v33, %v4067_v4  ;;  %v1870_v45 = vrot.slane %v4052_v9, %v4067_v4 }
0x11f4   :  { %v4054_v46 = vpop.permute.xlu0 %1883  ;;  %v1756_v51 = vpop.permute.xlu1 %1755 }
0x11f5   :  { %v4085_v15 = vsel %vm50_vm4, %v3869_v52, %v1756_v51  ;;  %v2114_v52 = vmul.f32 %v2046_v1, %v4078_v19  ;;  %v1892_v33 = vrot.slane %v4054_v46, %v4067_v4 }
0x11f6   :  { %v1906_v31 = vmul.f32 %v1848_v23, %v4085_v15  ;;  %v2115_v53 = vmul.f32 %v2057_v44, %v4085_v15 }
0x11f7   :  { %v2122_v7 = vsel %vm1912_vm10, %v2114_v52, 0.0 }
0x11f8   :  { %v1760_v0 = vpop.permute.xlu0 %1759  ;;  %v4056_v35 = vpop.permute.xlu1 %2070  ;;  %v1916_v49 = vsel %vm1912_vm10, %v1906_v31, 0.0  ;;  %v2124_v57 = vsel %vm1912_vm10, %v2115_v53, 0.0  ;;  %v2123_v30 = vadd.f32 %v2122_v7, %v2121_v56 }
0x11f9   :  { %v4119_v59 = vsel %vm50_vm4, %v3880_v6, %v1760_v0  ;;  %v2079_v20 = vrot.slane %v4056_v35, %v4067_v4 }
0x11fa   :  { %v2125_v0 = vadd.f32 %v2124_v57, %v2123_v30  ;;  %v1908_v9 = vmul.f32 %v1870_v45, %v4119_v59 }
0x11fc   :  { %v4058_v29 = vpop.permute.xlu0 %2092  ;;  %v1758_v40 = vpop.permute.xlu1 %1757  ;;  %v1920_v21 = vsel %vm1912_vm10, %v1908_v9, 0.0  ;;  %v1805_v9 = vld [vmem:[%s4345_s7 + $0xb0] sm:$0xff] }
0x11fd   :  { %v4098_v27 = vsel %vm50_vm4, %v3860_v42, %v1758_v40  ;;  %v1914_v42 = vsel %vm1912_vm10, %v1905_v26, 0.0  ;;  %v2117_v40 = vmul.f32 %v2079_v20, %v4119_v59  ;;  %v2101_v34 = vrot.slane %v4058_v29, %v4067_v4 }
0x11fe   :  { %v1907_v54 = vmul.f32 %v1859_v28, %v4098_v27  ;;  %v2116_v48 = vmul.f32 %v2068_v43, %v4098_v27  ;;  %v1915_v16 = vadd.f32 %v1914_v42, %v1913_v37 }
0x11ff   :  { %v2128_v23 = vsel %vm1912_vm10, %v2117_v40, 0.0 }
0x1200   :  { %v2082_v3 = vpop.permute.xlu1 %2081  ;;  %v1918_v60 = vsel %vm1912_vm10, %v1907_v54, 0.0  ;;  %v1917_v2 = vadd.f32 %v1916_v49, %v1915_v16  ;;  %v2126_v62 = vsel %vm1912_vm10, %v2116_v48, 0.0 }
0x1201   :  { %v4060_v38 = vpop.permute.xlu0 %2228  ;;  %v2090_v51 = vrot.slane %v2082_v3, %v4067_v4  ;;  %v2127_v8 = vadd.f32 %v2126_v62, %v2125_v0 }
0x1202   :  { %v1919_v36 = vadd.f32 %v1918_v60, %v1917_v2  ;;  %v2237_v48 = vrot.slane %v4060_v38, %v4067_v4  ;;  %v1806_v38 = vld [vmem:[%s4345_s7 + $0xb8] sm:$0xff] }
0x1203   :  { %v2129_v63 = vadd.f32 %v2128_v23, %v2127_v8  ;;  %v1803_v23 = vld [vmem:[%s4345_s7 + $0xa0] sm:$0xff] }
0x1204   :  { %v1921_v29 = vadd.f32 %v1920_v21, %v1919_v36 }
0x1205   :  { %v4062_v10 = vpop.permute.xlu0 %2250  ;;  %v4064_v11 = vpop.permute.xlu1 %1894 }
0x1206   :  { %v1903_v26 = vrot.slane %v4064_v11, %v4067_v4 }
0x1209   :  { %v1762_v12 = vpop.permute.xlu1 %1761 }
0x120a   :  { %v4073_v17 = vpop.permute.xlu0 %2441  ;;  %v4125_v39 = vsel %vm50_vm4, %v3877_v41, %v1762_v12 }
0x120b   :  { %v1909_v35 = vmul.f32 %v1881_v13, %v4125_v39  ;;  %v2118_v3 = vmul.f32 %v2090_v51, %v4125_v39  ;;  %v2450_v44 = vrot.slane %v4073_v17, %v4067_v4  ;;  %v2315_v51 = vmul.f32 %v2237_v48, %v4071_v14 }
0x120d   :  { %v4087_v50 = vpop.permute.xlu1 %2103  ;;  %v1922_v22 = vsel %vm1912_vm10, %v1909_v35, 0.0  ;;  %v2130_v1 = vsel %vm1912_vm10, %v2118_v3, 0.0  ;;  %v2518_v7 = vmul.f32 %v2450_v44, %v4078_v19  ;;  %v2323_v21 = vsel %vm1912_vm10, %v2315_v51, 0.0 }
0x120e   :  { %v4091_v24 = vpop.permute.xlu0 %2452  ;;  %v2112_v52 = vrot.slane %v4087_v50, %v4067_v4  ;;  %v1923_v37 = vadd.f32 %v1922_v22, %v1921_v29  ;;  %v2131_v11 = vadd.f32 %v2130_v1, %v2129_v63  ;;  %v1812_v63 = vld [vmem:[%s4345_s7 + $0xe8] sm:$0xff] }
0x120f   :  { %v2526_v35 = vsel %vm1912_vm10, %v2518_v7, 0.0 }
0x1212   :  { %v4107_v55 = vpop.permute.xlu0 %2463  ;;  %v4109_v47 = vpop.permute.xlu1 %2239 }
0x1213   :  { %v2248_v53 = vrot.slane %v4109_v47, %v4067_v4  ;;  %v2461_v47 = vrot.slane %v4091_v24, %v4067_v4  ;;  %v1814_v24 = vld [vmem:[%s4345_s7 + $0xf8] sm:$0xff] }
0x1215   :  { %v2316_v13 = vmul.f32 %v2248_v53, %v4078_v19  ;;  %v2519_v40 = vmul.f32 %v2461_v47, %v4085_v15 }
0x1216   :  { %v4132_v61 = vpop.permute.xlu0 %2474  ;;  %v1764_v6 = vpop.permute.xlu1 %1763 }
0x1217   :  { %v4138_v41 = vsel %vm50_vm4, %v3890_v25, %v1764_v6  ;;  %v2324_v36 = vsel %vm1912_vm10, %v2316_v13, 0.0  ;;  %v2528_v29 = vsel %vm1912_vm10, %v2519_v40, 0.0  ;;  %v1809_v13 = vld [vmem:[%s4345_s7 + $0xd0] sm:$0xff] }
0x1218   :  { %v1910_v25 = vmul.f32 %v1892_v33, %v4138_v41  ;;  %v2119_v46 = vmul.f32 %v2101_v34, %v4138_v41  ;;  %v2259_v33 = vrot.slane %v4062_v10, %v4067_v4  ;;  %v2472_v34 = vrot.slane %v4107_v55, %v4067_v4  ;;  %v1813_v55 = vld [vmem:[%s4345_s7 + $0xf0] sm:$0xff] }
0x1219   :  { %v2325_v44 = vadd.f32 %v2324_v36, %v2323_v21 }
0x121a   :  { %v4149_v12 = vpop.permute.xlu0 %2485  ;;  %v2431_v18 = vpop.permute.xlu1 %2430  ;;  %v1924_v28 = vsel %vm1912_vm10, %v1910_v25, 0.0  ;;  %v2132_v54 = vsel %vm1912_vm10, %v2119_v46, 0.0  ;;  %v2317_v22 = vmul.f32 %v2259_v33, %v4085_v15  ;;  %v2520_v1 = vmul.f32 %v2472_v34, %v4098_v27 }
0x121b   :  { %v2439_v32 = vrot.slane %v2431_v18, %v4067_v4  ;;  %v1925_v16 = vadd.f32 %v1924_v28, %v1923_v37  ;;  %v2133_v57 = vadd.f32 %v2132_v54, %v2131_v11  ;;  %v1804_v18 = vld [vmem:[%s4345_s7 + $0xa8] sm:$0xff]  ;;  %v1801_v11 = vld [vmem:[%s4345_s7 + $0x90] sm:$0xff] }
0x121c   :  { %v2326_v37 = vsel %vm1912_vm10, %v2317_v22, 0.0 }
0x121d   :  { %v2517_v42 = vmul.f32 %v2439_v32, %v4071_v14  ;;  %v2327_v48 = vadd.f32 %v2326_v37, %v2325_v44 }
0x121e   :  { %v4164_v31 = vpop.permute.xlu0 %2496  ;;  %v1766_v43 = vpop.permute.xlu1 %1765 }
0x121f   :  { %v4171_v17 = vsel %vm50_vm4, %v3887_v58, %v1766_v43  ;;  %v2525_v2 = vsel %vm1912_vm10, %v2517_v42, 0.0  ;;  %v2530_v42 = vsel %vm1912_vm10, %v2520_v1, 0.0  ;;  %v2632_v1 = vld [vmem:[%s4347_s9] sm:$0xff] }
0x1220   :  { %v1911_v50 = vmul.f32 %v1903_v26, %v4171_v17  ;;  %v2120_v56 = vmul.f32 %v2112_v52, %v4171_v17  ;;  %v2527_v3 = vadd.f32 %v2526_v35, %v2525_v2  ;;  %v2483_v26 = vrot.slane %v4132_v61, %v4067_v4  ;;  %v1811_v61 = vld [vmem:[%s4345_s7 + $0xe0] sm:$0xff] }
0x1222   :  { %v3006_v49 = vpop.permute.xlu0 %3005  ;;  %v1926_v58 = vsel %vm1912_vm10, %v1911_v50, 0.0  ;;  %v2134_v20 = vsel %vm1912_vm10, %v2120_v56, 0.0  ;;  %v2262_v30 = vpop.permute.xlu1 %2261  ;;  %v2529_v52 = vadd.f32 %v2528_v29, %v2527_v3  ;;  %v2521_v50 = vmul.f32 %v2483_v26, %v4119_v59  ;;  %v2633_v29 = vld [vmem:[%s4347_s9 + $0x8] sm:$0xff] }
0x1223   :  { %v3008_v45 = vunpack.i.h.bf16 %v3006_v49  ;;  %v3007_v60 = vunpack.i.l.bf16 %v3006_v49  ;;  %v1927_v6 = vadd.f32 %v1926_v58, %v1925_v16  ;;  %v2135_v62 = vadd.f32 %v2134_v20, %v2133_v57  ;;  %v1810_v16 = vld [vmem:[%s4345_s7 + $0xd8] sm:$0xff] }
0x1224   :  { %v2270_v0 = vrot.slane %v2262_v30, %v4067_v4  ;;  %v2494_v56 = vrot.slane %v4149_v12, %v4067_v4  ;;  %v2531_v47 = vadd.f32 %v2530_v42, %v2529_v52  ;;  %v1799_v30 = vld [vmem:[%s4345_s7 + $0x80] sm:$0xff] }
0x1225   :  { %v2015_v19 = vsub.f32 %v1927_v6, %v3007_v60  ;;  %2908 = vmatmul.mubr.msk.f32.vlgmr.msra.gmra.mxu0 %vm50_vm4, %v1927_v6  ;;  %v2217_v14 = vsub.f32 %v2135_v62, %v3008_v45  ;;  %2927 = vmatmul.mubr.msk.f32.vlgmr.msra.gmra.mxu1 %vm50_vm4, %v2135_v62  ;;  %v2532_v45 = vsel %vm1912_vm10, %v2521_v50, 0.0  ;;  %v2505_v6 = vrot.slane %v4164_v31, %v4067_v4 }
0x1226   :  { %v2273_v10 = vpop.permute.xlu1 %2272  ;;  %2930 = vmatpush3.msra.mxu0 %v1806_v38  ;;  %2949 = vmatpush3.msra.mxu1 %v1814_v24  ;;  %v2318_v32 = vmul.f32 %v2270_v0, %v4098_v27  ;;  %v1802_v27 = vld [vmem:[%s4345_s7 + $0x98] sm:$0xff]  ;;  %v2522_v60 = vmul.f32 %v2494_v56, %v4125_v39  ;;  %v2533_v51 = vadd.f32 %v2532_v45, %v2531_v47 }
0x1227   :  { %v2016_v8 = vmul.f32 %v2015_v19, %v2015_v19  ;;  %v2281_v25 = vrot.slane %v2273_v10, %v4067_v4  ;;  %2931 = vmatprep.subr.mxu0 %v3159_v5  ;;  %v2218_v46 = vmul.f32 %v2217_v14, %v2217_v14  ;;  %2950 = vmatprep.subr.mxu1 %v3159_v5  ;;  %v1807_v19 = vld [vmem:[%s4345_s7 + $0xc0] sm:$0xff] }
0x1228   :  { %2932 = vmatpush3.msra.mxu0 %v1805_v9  ;;  %2951 = vmatpush3.msra.mxu1 %v1813_v55  ;;  %v2328_v53 = vsel %vm1912_vm10, %v2318_v32, 0.0  ;;  %v2534_v0 = vsel %vm1912_vm10, %v2522_v60, 0.0  ;;  %v2523_v9 = vmul.f32 %v2505_v6, %v4138_v41 }
0x1229   :  { %2018 = vrot.lane.b32.xlu1 %v2016_v8, %s3161_s30  ;;  %2933 = vmatprep.subr.mxu0 %v3159_v5  ;;  %v2319_v28 = vmul.f32 %v2281_v25, %v4119_v59  ;;  %v1800_v59 = vld [vmem:[%s4345_s7 + $0x88] sm:$0xff]  ;;  %v2329_v12 = vadd.f32 %v2328_v53, %v2327_v48  ;;  %v2535_v14 = vadd.f32 %v2534_v0, %v2533_v51 }
0x122a   :  { %2220 = vrot.lane.b32.xlu0 %v2218_v46, %s3161_s30  ;;  %v2284_v15 = vpop.permute.xlu1 %2283  ;;  %2934 = vmatpush3.msra.mxu0 %v1804_v18  ;;  %v2536_v3 = vsel %vm1912_vm10, %v2523_v9, 0.0  ;;  %v2619_v46 = vpop.permute.xlu0 %2618 }
0x122b   :  { %v2292_v43 = vrot.slane %v2284_v15, %v4067_v4  ;;  %2935 = vmatprep.subr.mxu0 %v3159_v5  ;;  %2952 = vmatprep.subr.mxu1 %v3159_v5  ;;  %v2330_v49 = vsel %vm1912_vm10, %v2319_v28, 0.0  ;;  %v2537_v25 = vadd.f32 %v2536_v3, %v2535_v14 }
0x122c   :  { %2936 = vmatpush3.msra.mxu0 %v1803_v23  ;;  %2953 = vmatpush3.msra.mxu1 %v1812_v63  ;;  %v2331_v38 = vadd.f32 %v2330_v49, %v2329_v12  ;;  %v2634_v23 = vld [vmem:[%s4347_s9 + $0x10] sm:$0xff] }
0x122d   :  { %v2320_v54 = vmul.f32 %v2292_v43, %v4125_v39  ;;  %2937 = vmatprep.subr.mxu0 %v3159_v5  ;;  %2954 = vmatprep.subr.mxu1 %v3159_v5  ;;  %v1808_v39 = vld [vmem:[%s4345_s7 + $0xc8] sm:$0xff] }
0x122e   :  { %v2295_v7 = vpop.permute.xlu1 %2294  ;;  %2938 = vmatpush3.msra.mxu0 %v1802_v27  ;;  %2955 = vmatpush3.msra.mxu1 %v1811_v61 }
0x122f   :  { %v2303_v58 = vrot.slane %v2295_v7, %v4067_v4  ;;  %2939 = vmatprep.subr.mxu0 %v3159_v5  ;;  %2956 = vmatprep.subr.mxu1 %v3159_v5  ;;  %v2332_v57 = vsel %vm1912_vm10, %v2320_v54, 0.0  ;;  %v2785_v54 = vld [vmem:[%s4346_s8] ss:$0 sm:$0xff] }
0x1230   :  { %2940 = vmatpush3.msra.mxu0 %v1801_v11  ;;  %2957 = vmatpush3.msra.mxu1 %v1810_v16  ;;  %v2333_v31 = vadd.f32 %v2332_v57, %v2331_v38 }
0x1231   :  { %v2321_v20 = vmul.f32 %v2303_v58, %v4138_v41  ;;  %2941 = vmatprep.subr.mxu0 %v3159_v5  ;;  %2945 = vmatprep.mubr.msk.f32.mxu0 %vm3166_vm12, %v3159_v5 }
0x1232   :  { %v2306_v2 = vpop.permute.xlu1 %2305  ;;  %2942 = vmatpush3.msra.mxu0 %v1800_v59  ;;  %2958 = vmatprep.subr.mxu1 %v3159_v5 }
0x1233   :  { %v2334_v62 = vsel %vm1912_vm10, %v2321_v20, 0.0  ;;  %v2314_v24 = vrot.slane %v2306_v2, %v4067_v4  ;;  %2943 = vmatprep.subr.mxu0 %v3159_v5  ;;  %2959 = vmatpush3.msra.mxu1 %v1809_v13 }
0x1234   :  { %2944 = vmatpush3.msra.mxu0 %v1799_v30  ;;  %2960 = vmatprep.subr.mxu1 %v3159_v5  ;;  %v2335_v35 = vadd.f32 %v2334_v62, %v2333_v31 }
0x1235   :  { %v2322_v33 = vmul.f32 %v2314_v24, %v4171_v17  ;;  %2964 = vmatprep.mubr.msk.f32.mxu1 %vm3166_vm12, %v3159_v5  ;;  %2961 = vmatpush3.msra.mxu1 %v1808_v39  ;;  %v2793_v24 = vld [vmem:[%s4348_s10] ss:$0 sm:$0xff] }
0x1236   :  { %2967 = vmatprep.subr.mxu0 %v3159_v5  ;;  %2962 = vmatprep.subr.mxu1 %v3159_v5 }
0x1237   :  { %v2336_v40 = vsel %vm1912_vm10, %v2322_v33, 0.0  ;;  %v2508_v34 = vpop.permute.xlu1 %2507  ;;  %2963 = vmatpush3.msra.mxu1 %v1807_v19 }
0x1238   :  { %v2337_v10 = vadd.f32 %v2336_v40, %v2335_v35  ;;  %v2516_v36 = vrot.slane %v2508_v34, %v4067_v4 }
0x123a   :  { %v2524_v8 = vmul.f32 %v2516_v36, %v4171_v17  ;;  %2946 = vmatmul.mubr.msk.f32.vlgmr.msra.gmra.mxu0 %vm50_vm4, %v2337_v10  ;;  %v2635_v17 = vld [vmem:[%s4347_s9 + $0x18] sm:$0xff] }
0x123b   :  { %v2417_v41 = vpop.permute.xlu1 %2416  ;;  %2975 = vmatprep.mubr.msk.f32.mxu0 %vm3166_vm12, %v3159_v5  ;;  %2968 = vmatpush3.msra.mxu0 %v2635_v17 }
0x123c   :  { %v2419_v18 = vsub.f32 %v2337_v10, %v2417_v41  ;;  %v2538_v55 = vsel %vm1912_vm10, %v2524_v8, 0.0  ;;  %2969 = vmatprep.subr.mxu0 %v3159_v5 }
0x123d   :  { %v2539_v21 = vadd.f32 %v2538_v55, %v2537_v25  ;;  %2970 = vmatpush3.msra.mxu0 %v2634_v23 }
0x123e   :  { %v2420_v22 = vmul.f32 %v2419_v18, %v2419_v18  ;;  %2971 = vmatprep.subr.mxu0 %v3159_v5 }
0x123f   :  { %v2621_v32 = vsub.f32 %v2539_v21, %v2619_v46  ;;  %2965 = vmatmul.mubr.msk.f32.vlgmr.msra.gmra.mxu1 %vm50_vm4, %v2539_v21  ;;  %2972 = vmatpush3.msra.mxu0 %v2633_v29  ;;  %vm2726_vm4 = vcmask 3072  }
0x1240   :  { %2422 = vrot.lane.b32.xlu1 %v2420_v22, %s3161_s30  ;;  %2973 = vmatprep.subr.mxu0 %v3159_v5 }
0x1241   :  { %v2622_v4 = vmul.f32 %v2621_v32, %v2621_v32  ;;  %2974 = vmatpush3.msra.mxu0 %v2632_v1 }
0x1243   :  { %2624 = vrot.lane.b32.xlu0 %v2622_v4, %s3161_s30 }
0x129b   :  { %v2019_v44 = vpop.permute.xlu1 %2018 }
0x129c   :  { %v2221_v26 = vpop.permute.xlu0 %2220  ;;  %v2021_v15 = vsel %vm1679_vm9, %v2019_v44, 0.0 }
0x129d   :  { %v2223_v63 = vsel %vm1679_vm9, %v2221_v26, 0.0  ;;  %2022 = vadd.xlane.f32.xlu1 %v2021_v15 }
0x129e   :  { %2224 = vadd.xlane.f32.xlu0 %v2223_v63 }
0x12b2   :  { %v2423_v52 = vpop.permute.xlu1 %2422 }
0x12b3   :  { %v2425_v28 = vsel %vm1679_vm9, %v2423_v52, 0.0 }
0x12b4   :  { %2426 = vadd.xlane.f32.xlu0 %v2425_v28 }
0x12b5   :  { %v2625_v43 = vpop.permute.xlu0 %2624 }
0x12b6   :  { %v2627_v27 = vsel %vm1679_vm9, %v2625_v43, 0.0 }
0x12b7   :  { %2628 = vadd.xlane.f32.xlu1 %v2627_v27 }
0x12e5   :  { %v1997_v61 = vpop.f32.mrf.mxu0  ;;  %v2205_v37 = vpop.f32.mrf.mxu1 }
0x12e6   :  { %v2007_v11 = vadd.f32 %v2785_v54, %v1997_v61 }
0x12e7   :  { %v2909_v5 = vpop.f32.mrf.mxu0  ;;  %v2928_v53 = vpop.f32.mrf.mxu1 }
0x12e8   :  { %v2209_v50 = vadd.f32 %v2205_v37, %v2007_v11 }
0x12fa   :  { %v2407_v42 = vpop.f32.mrf.mxu0 }
0x12fb   :  { %v2411_v48 = vadd.f32 %v2407_v42, %v2209_v50 }
0x12fc   :  { %v2947_v56 = vpop.f32.mrf.mxu0 }
0x12ff   :  { %v2609_v7 = vpop.f32.mrf.mxu1 }
0x1300   :  { %v2613_v16 = vadd.f32 %v2609_v7, %v2411_v48 }
0x1301   :  { %v2966_v47 = vpop.f32.mrf.mxu1 }
0x1302   :  { %v2631_v49 = vmax.f32 %v2613_v16, 0.0 }
0x1304   :  { %2976 = vmatmul.mubr.msk.f32.vlgmr.msra.gmra.mxu0 %vm1442_vm7, %v2631_v49 }
0x1326   :  { %v2023_v59 = vpop.xlane.xlu1 %2022 }
0x1327   :  { %v2225_v58 = vpop.xlane.xlu0 %2224 }
0x1328   :  { %v2226_v12 = vadd.f32 %v2225_v58, %v2023_v59 }
0x133d   :  { %v2427_v57 = vpop.xlane.xlu0 %2426 }
0x133e   :  { %v2428_v20 = vadd.f32 %v2427_v57, %v2226_v12 }
0x1340   :  { %v2629_v30 = vpop.xlane.xlu1 %2628 }
0x1341   :  { %v2630_v13 = vadd.f32 %v2629_v30, %v2428_v20 }
0x1343   :  { %v2718_v45 = vadd.f32 1e-10, %v2630_v13 }
0x1345   :  { %3135 = vrsqrt.f32 %v2718_v45  ;;  %vm2721_vm2 = vcmp.eq.f32.partialorder %v2718_v45, inf  ;;  %v2724_v38 = vand.u32 2147483648, %v2718_v45  ;;  %vm2723_vm3 = vcmp.eq.f32.partialorder %v2718_v45, 0.0 }
0x1352   :  { %v3136_v60 = vpop.eup %3135 }
0x1353   :  { %v2720_v6 = vmul.f32 %v3136_v60, %v2718_v45 }
0x1355   :  { %v2722_v2 = vsel %vm2721_vm2, %v2718_v45, %v2720_v6 }
0x1356   :  { %v2725_v62 = vsel %vm2723_vm3, %v2724_v38, %v2722_v2 }
0x1357   :  { %2727 = vst.msk [vmem:[%s4350_s12] sm:$0xf] %vm2726_vm4, %v2725_v62 }
0x13c4   :  { %v2712_v39 = vpop.f32.mrf.mxu0 }
0x13c5   :  { %v2713_v51 = vadd.f32 %v2793_v24, %v2712_v39 }
0x13c6   :  { %v2977_v31 = vpop.f32.mrf.mxu0 }
0x13c7   :  { %2717 = vst.msk [vmem:[#allocation5] sm:$0xf] %vm2716_vm5, %v2713_v51 }
0x13c8   :  { %3148 = shalt.err (!%p3145_p4)
}
0x13c9   :  { %2737 = dma.vmem_to_hbm [thread:$0]  %s2735_s15, 64, %s4349_s11, [#allocation6]  }
0x13ca   :  { %3157 = dma.done.wait [#allocation6], 64  }
0x13cb   :  { %3158 = vsyncadd [#allocation6], 4294967232 }
0x13cc   :  { %2745 = vsyncpa [#allocation6], 1 }

</bundles_post_ra>
